<compile_context>
chip_gen: v7x
topology: tpu7x:2x2x1
jax: 0.10.0
libtpu: 0.0.40
codegen_flags: <defaults>
</compile_context>

<pallas_src>
import jax
import jax.numpy as jnp
from jax.experimental import pallas as pl
from jax.experimental.pallas import tpu as pltpu

LOGVAR_MIN, LOGVAR_MAX = -5.0, 5.0
LANE = 128


# --------------------------------------------------------------------------- #
# Fused kernel factory (grid = (B,), one batch element per step)
# --------------------------------------------------------------------------- #
def _make_vae_kernel(n, vu, xd, t_odd):
    """n = Tp = ceil(T/2); vu = v_dim + u_dim; xd = x_dim; t_odd = (T % 2 == 1)."""
    f32, bf16 = jnp.float32, jnp.bfloat16

    def relu(a):
        return jnp.maximum(a, 0.0)

    def mask_odd(o):
        # For odd T, time index T does not exist: the last odd-phase row is invalid and must be
        # zero so it acts as the conv zero-padding for downstream layers.  Static no-op if T even.
        if not t_odd:
            return o
        row = jax.lax.broadcasted_iota(jnp.int32, o.shape, 0)
        return jnp.where(row < n - 1, o, 0.0)

    def conv_pair(e_bf, o_bf, be, bo, w, b):
        # k=3 / s=1 / p=1 conv on the interleaved sequence x[2t]=E[t], x[2t+1]=O[t]:
        #   y_even[t] = O[t-1]@w0 + E[t]@w1 + O[t]@w2
        #   y_odd[t]  = E[t]  @w0 + O[t]@w1 + E[t+1]@w2
        # Self taps come from registers; only the +/-1 shifted taps read the guard-padded bf16
        # buffers (rows 1..n hold E/O, guard rows 0 and n+1 are zero).
        ye = jnp.dot(bo[pl.ds(0, n), :], w[0], preferred_element_type=f32)
        ye = ye + jnp.dot(e_bf, w[1], preferred_element_type=f32)
        ye = ye + jnp.dot(o_bf, w[2], preferred_element_type=f32)
        yo = jnp.dot(e_bf, w[0], preferred_element_type=f32)
        yo = yo + jnp.dot(o_bf, w[1], preferred_element_type=f32)
        yo = yo + jnp.dot(be[pl.ds(2, n), :], w[2], preferred_element_type=f32)
        return ye + b[...], yo + b[...]

    def conv_seq(h_bf, buf, w, b):
        # plain k=3 / s=1 / p=1 conv on a single sequence (buf rows 1..n = h, guards zero).
        acc = jnp.dot(buf[pl.ds(0, n), :], w[0], preferred_element_type=f32)
        acc = acc + jnp.dot(h_bf, w[1], preferred_element_type=f32)
        acc = acc + jnp.dot(buf[pl.ds(2, n), :], w[2], preferred_element_type=f32)
        return acc + b[...]

    def fc_stack(h, wf, bias):
        for i in range(wf.shape[0]):
            y = jnp.dot(h.astype(bf16), wf[i], preferred_element_type=f32)
            h = relu(y + bias[i]) + h
        return h

    def zero_guards(buf):
        # Only the two guard rows are zeroed; interior rows are fully rewritten every step.
        zr = jnp.zeros((1, buf.shape[1]), buf.dtype)
        buf[pl.ds(0, 1), :] = zr
        buf[pl.ds(n + 1, 1), :] = zr

    def kernel(xe_ref, xo_ref, eps_ref, *refs):
        (ew1, eb1, ew2, eb2, ew3, eb3, ew4, eb4, ew5, eb5, ewf, ebf, ewh, ebh,
         dw1, db1, dw2, db2, dw3, db3, dw4, db4, dw5, db5, dwf, dbf, dwh, dbh,
         enc_ref, dec_ref,
         bxe, bxo, bhe, bho, bz, bde, bdo) = refs

        for buf in (bxe, bxo, bhe, bho, bz, bde, bdo):
            zero_guards(buf)

        # ---------------- encoder (InferenceConv) ---------------- #
        xe = xe_ref[...].astype(bf16)
        xo = xo_ref[...].astype(bf16)
        bxe[pl.ds(1, n), :] = xe
        bxo[pl.ds(1, n), :] = xo
        pe, po = conv_pair(xe, xo, bxe, bxo, ew1, eb1)               # conv1
        he, ho = relu(pe), mask_odd(relu(po))
        he_bf, ho_bf = he.astype(bf16), ho.astype(bf16)
        bhe[pl.ds(1, n), :] = he_bf
        bho[pl.ds(1, n), :] = ho_bf
        pe, po = conv_pair(he_bf, ho_bf, bhe, bho, ew2, eb2)         # conv2 + residual
        he, ho = relu(pe) + he, mask_odd(relu(po) + ho)
        he_bf, ho_bf = he.astype(bf16), ho.astype(bf16)
        bho[pl.ds(1, n), :] = ho_bf
        # conv3: Conv1d(k=3, s=2, p=1): y[t] = x[2t-1]@w0 + x[2t]@w1 + x[2t+1]@w2
        h = jnp.dot(bho[pl.ds(0, n), :], ew3[0], preferred_element_type=f32)
        h = h + jnp.dot(he_bf, ew3[1], preferred_element_type=f32)
        h = h + jnp.dot(ho_bf, ew3[2], preferred_element_type=f32)
        h = relu(h + eb3[...])
        for w, b in ((ew4, eb4), (ew5, eb5)):                        # conv4 / conv5 + residual
            h_bf = h.astype(bf16)
            bhe[pl.ds(1, n), :] = h_bf
            h = relu(conv_seq(h_bf, bhe, w, b)) + h
        h = fc_stack(h, ewf, ebf)                                    # 4 residual FC layers
        # fused heads: columns [mu_v | mu_u | lv_v | lv_u]
        hh = jnp.dot(h.astype(bf16), ewh[...], preferred_element_type=f32) + ebh[...]
        mu = hh[:, :vu]
        lv = jnp.clip(hh[:, vu:], LOGVAR_MIN, LOGVAR_MAX)
        z = mu + eps_ref[...] * jnp.exp(0.5 * lv)                    # reparameterisation (EUP exp)
        enc_ref[...] = jnp.concatenate([mu, lv, z], axis=1)          # lane-packed [mu|logvar|z]

        # ---------------- decoder (EmissionConv) ---------------- #
        z_bf = z.astype(bf16)
        bz[pl.ds(1, n), :] = z_bf
        g = relu(conv_seq(z_bf, bz, dw1, db1))                       # convT1 (s=1)
        g_bf = g.astype(bf16)
        bde[pl.ds(1, n), :] = g_bf
        g = relu(conv_seq(g_bf, bde, dw2, db2)) + g                  # convT2 + residual
        g_bf = g.astype(bf16)
        bde[pl.ds(1, n), :] = g_bf
        # convT3: ConvTranspose1d(k=3, s=2, p=1, op=1):
        #   y[2t] = g[t]@W[:,:,1] + b ;  y[2t+1] = g[t]@W[:,:,2] + g[t+1]@W[:,:,0] + b
        de = jnp.dot(g_bf, dw3[1], preferred_element_type=f32) + db3[...]
        do = jnp.dot(g_bf, dw3[2], preferred_element_type=f32)
        do = do + jnp.dot(bde[pl.ds(2, n), :], dw3[0], preferred_element_type=f32) + db3[...]
        de, do = relu(de), relu(do)
        for w, b in ((dw4, db4), (dw5, db5)):                        # convT4 / convT5 + residual
            de_bf, do_bf = de.astype(bf16), do.astype(bf16)
            bde[pl.ds(1, n), :] = de_bf
            bdo[pl.ds(1, n), :] = do_bf
            pe, po = conv_pair(de_bf, do_bf, bde, bdo, w, b)
            de, do = relu(pe) + de, relu(po) + do
        h2 = jnp.concatenate([de, do], axis=0)                       # (2n, hp_e): doubles MXU M
        h2 = fc_stack(h2, dwf, dbf)                                  # 4 residual FC layers
        # fused heads: columns [mu_x | logvar_x]; clamp only the logvar half.
        oh = jnp.dot(h2.astype(bf16), dwh[...], preferred_element_type=f32) + dbh[...]
        col = jax.lax.broadcasted_iota(jnp.int32, oh.shape, 1)
        oh = jnp.where(col < xd, oh, jnp.clip(oh, LOGVAR_MIN, LOGVAR_MAX))
        # lane-packed output: [even frame (mu|lv) | odd frame (mu|lv)] -> free reshape in wrapper.
        dec_ref[...] = jnp.concatenate([oh[:n], oh[n:]], axis=1)

    return kernel


# --------------------------------------------------------------------------- #
# pallas_call plumbing
# --------------------------------------------------------------------------- #
def _batch_spec(a):
    nd = a.ndim
    return pl.BlockSpec((None,) + tuple(a.shape[1:]),
                        lambda b: (b,) + (0,) * (nd - 1))


def _full_spec(a):
    nd = a.ndim
    return pl.BlockSpec(tuple(a.shape), lambda b: (0,) * nd)


def _out_spec(s):
    nd = len(s.shape)
    return pl.BlockSpec((None,) + tuple(s.shape[1:]),
                        lambda b: (b,) + (0,) * (nd - 1))


def _pick_vmem_limit():
    # ~48 MiB on v7x (64 MiB/TC physical), ~96 MiB on v5e/v6e (128 MiB physical).
    try:
        cap = int(getattr(pltpu.get_tpu_info(), "vmem_capacity_bytes"))
    except Exception:
        cap = 64 * 1024 * 1024
    return int(max(32 * 1024 * 1024, min(100 * 1024 * 1024, (cap * 3) // 4)))


# --------------------------------------------------------------------------- #
# One-time parameter layout work (pre-transpose / flatten / pad / bf16-cast)
# --------------------------------------------------------------------------- #
def _round_up(nval, m):
    return ((nval + m - 1) // m) * m


def _pad2(m, rows, cols):
    return jnp.pad(m, ((0, rows - m.shape[0]), (0, cols - m.shape[1])))


def _pack_bias(b, cols):
    return _pad2(b.reshape(1, -1), 1, cols).astype(jnp.float32)


def _pack_conv1d(w, cin_p, cout_p):
    """Conv1d weight (Cout, Cin, 3) -> (3, cin_p, cout_p) bf16; tap k multiplies x[t-1+k]."""
    return jnp.stack([_pad2(w[:, :, k].T, cin_p, cout_p) for k in range(3)]
                     ).astype(jnp.bfloat16)


def _pack_convT1d(w, cin_p, cout_p):
    """ConvTranspose1d(k=3,s=1,p=1) weight (Cin, Cout, 3) -> (3, cin_p, cout_p) bf16, taps flipped
    so that tap k multiplies x[t-1+k]."""
    return jnp.stack([_pad2(w[:, :, 2 - k], cin_p, cout_p) for k in range(3)]
                     ).astype(jnp.bfloat16)


def _pack_convT1d_s2(w, cin_p, cout_p):
    """ConvTranspose1d(k=3,s=2,p=1,op=1) weight (Cin, Cout, 3) -> (3, cin_p, cout_p) bf16,
    native tap order."""
    return jnp.stack([_pad2(w[:, :, k], cin_p, cout_p) for k in range(3)]
                     ).astype(jnp.bfloat16)


def _pack_linear(w, in_p, out_p):
    """nn.Linear weight (out, in) -> (in_p, out_p) bf16."""
    return _pad2(w.T, in_p, out_p).astype(jnp.bfloat16)


def pack_params(raw, x_dim, v_dim, u_dim):
    inf, emi = raw['inference'], raw['emission']
    hid_i = inf['conv1'][0].shape[0]
    hid_e = emi['conv1'][0].shape[1]
    hp_i = _round_up(hid_i, LANE)          # zero-pad hidden width to a lane multiple
    hp_e = _round_up(hid_e, LANE)
    vu = v_dim + u_dim

    enc = dict(
        w1=_pack_conv1d(inf['conv1'][0], x_dim, hp_i), b1=_pack_bias(inf['conv1'][1], hp_i),
        w2=_pack_conv1d(inf['conv2'][0], hp_i, hp_i), b2=_pack_bias(inf['conv2'][1], hp_i),
        w3=_pack_conv1d(inf['conv3'][0], hp_i, hp_i), b3=_pack_bias(inf['conv3'][1], hp_i),
        w4=_pack_conv1d(inf['conv4'][0], hp_i, hp_i), b4=_pack_bias(inf['conv4'][1], hp_i),
        w5=_pack_conv1d(inf['conv5'][0], hp_i, hp_i), b5=_pack_bias(inf['conv5'][1], hp_i),
        wf=jnp.stack([_pack_linear(w, hp_i, hp_i) for w, _ in inf['fcs']]),
        bf=jnp.stack([_pack_bias(b, hp_i) for _, b in inf['fcs']]),
        # Single fused head: columns [mu_v | mu_u | lv_v | lv_u] so z == cat((v,u),-1).
        wh=jnp.concatenate([_pack_linear(inf['mu_v'][0], hp_i, v_dim),
                            _pack_linear(inf['mu_u'][0], hp_i, u_dim),
                            _pack_linear(inf['logvar_v'][0], hp_i, v_dim),
                            _pack_linear(inf['logvar_u'][0], hp_i, u_dim)], axis=1),
        bh=jnp.concatenate([_pack_bias(inf['mu_v'][1], v_dim),
                            _pack_bias(inf['mu_u'][1], u_dim),
                            _pack_bias(inf['logvar_v'][1], v_dim),
                            _pack_bias(inf['logvar_u'][1], u_dim)], axis=1),
    )
    dec = dict(
        w1=_pack_convT1d(emi['conv1'][0], vu, hp_e), b1=_pack_bias(emi['conv1'][1], hp_e),
        w2=_pack_convT1d(emi['conv2'][0], hp_e, hp_e), b2=_pack_bias(emi['conv2'][1], hp_e),
        w3=_pack_convT1d_s2(emi['conv3'][0], hp_e, hp_e), b3=_pack_bias(emi['conv3'][1], hp_e),
        w4=_pack_convT1d(emi['conv4'][0], hp_e, hp_e), b4=_pack_bias(emi['conv4'][1], hp_e),
        w5=_pack_convT1d(emi['conv5'][0], hp_e, hp_e), b5=_pack_bias(emi['conv5'][1], hp_e),
        wf=jnp.stack([_pack_linear(w, hp_e, hp_e) for w, _ in emi['fcs']]),
        bf=jnp.stack([_pack_bias(b, hp_e) for _, b in emi['fcs']]),
        # Single fused head: columns [mu_x | logvar_x].
        wh=jnp.concatenate([_pack_linear(emi['mu_x'][0], hp_e, x_dim),
                            _pack_linear(emi['logvar_x'][0], hp_e, x_dim)], axis=1),
        bh=jnp.concatenate([_pack_bias(emi['mu_x'][1], x_dim),
                            _pack_bias(emi['logvar_x'][1], x_dim)], axis=1),
    )
    dims = dict(x_dim=x_dim, v_dim=v_dim, u_dim=u_dim, hp_i=hp_i, hp_e=hp_e)
    return dict(enc=enc, dec=dec, dims=dims)


# --------------------------------------------------------------------------- #
# Synthetic parameters in the original PyTorch layouts
# --------------------------------------------------------------------------- #
def init_params(key, x_dim, v_dim, u_dim, hid_e, hid_i):
    keys = iter(jax.random.split(key, 96))

    def dense(out_d, in_d):                       # nn.Linear: (out, in), (out,)
        return (0.05 * jax.random.normal(next(keys), (out_d, in_d), jnp.float32),
                0.01 * jax.random.normal(next(keys), (out_d,), jnp.float32))

    def conv(out_d, in_d):                        # nn.Conv1d: (out, in, 3), (out,)
        return (0.05 * jax.random.normal(next(keys), (out_d, in_d, 3), jnp.float32),
                0.01 * jax.random.normal(next(keys), (out_d,), jnp.float32))

    def convT(in_d, out_d):                       # nn.ConvTranspose1d: (in, out, 3), (out,)
        return (0.05 * jax.random.normal(next(keys), (in_d, out_d, 3), jnp.float32),
                0.01 * jax.random.normal(next(keys), (out_d,), jnp.float32))

    inference = dict(
        conv1=conv(hid_i, x_dim), conv2=conv(hid_i, hid_i), conv3=conv(hid_i, hid_i),
        conv4=conv(hid_i, hid_i), conv5=conv(hid_i, hid_i),
        fcs=[dense(hid_i, hid_i) for _ in range(4)],
        mu_u=dense(u_dim, hid_i), logvar_u=dense(u_dim, hid_i),
        mu_v=dense(v_dim, hid_i), logvar_v=dense(v_dim, hid_i),
    )
    emission = dict(
        conv1=convT(u_dim + v_dim, hid_e), conv2=convT(hid_e, hid_e),
        conv3=convT(hid_e, hid_e), conv4=convT(hid_e, hid_e), conv5=convT(hid_e, hid_e),
        fcs=[dense(hid_e, hid_e) for _ in range(4)],
        mu_x=dense(x_dim, hid_e), logvar_x=dense(x_dim, hid_e),
    )
    # speaker_vectors / spk_discr_v are only used by the loss methods, not by forward().
    return dict(inference=inference, emission=emission)


# --------------------------------------------------------------------------- #
# Forward (jitted closure over the packed parameters)
# --------------------------------------------------------------------------- #
def make_forward(packed):
    dims = packed['dims']
    x_dim, v_dim, u_dim = dims['x_dim'], dims['v_dim'], dims['u_dim']
    hp_i, hp_e = dims['hp_i'], dims['hp_e']
    vu = v_dim + u_dim
    e, d = packed['enc'], packed['dec']
    weights = [e['w1'], e['b1'], e['w2'], e['b2'], e['w3'], e['b3'], e['w4'], e['b4'],
               e['w5'], e['b5'], e['wf'], e['bf'], e['wh'], e['bh'],
               d['w1'], d['b1'], d['w2'], d['b2'], d['w3'], d['b3'], d['w4'], d['b4'],
               d['w5'], d['b5'], d['wf'], d['bf'], d['wh'], d['bh']]
    vmem_limit = _pick_vmem_limit()

    @jax.jit
    def forward(x, lengths, key):
        del lengths                              # reference forward() never masks; losses only
        B, T, _ = x.shape
        Tp = (T + 1) // 2
        k_u, k_v = jax.random.split(key)
        eps = jnp.concatenate(                    # [v | u] column order, matching the fused head
            [jax.random.normal(k_v, (B, Tp, v_dim), jnp.float32),
             jax.random.normal(k_u, (B, Tp, u_dim), jnp.float32)], axis=-1)

        # Even/odd de-interleave of the (small) input once in XLA; everything downstream stays
        # phase-separated inside the single fused kernel, so no pad / strided slice / stack ever
        # touches the (B, T, hidden) activations.
        xp = x if 2 * Tp == T else jnp.pad(x, ((0, 0), (0, 1), (0, 0)))
        xr = xp.reshape(B, Tp, 2, x_dim)
        x_even, x_odd = xr[:, :, 0, :], xr[:, :, 1, :]
        data = [x_even, x_odd, eps]

        out_shapes = (jax.ShapeDtypeStruct((B, Tp, 3 * vu), jnp.float32),
                      jax.ShapeDtypeStruct((B, Tp, 4 * x_dim), jnp.float32))
        scratch = [pltpu.VMEM((Tp + 2, x_dim), jnp.bfloat16),   # x even / odd (guard-padded)
                   pltpu.VMEM((Tp + 2, x_dim), jnp.bfloat16),
                   pltpu.VMEM((Tp + 2, hp_i), jnp.bfloat16),    # encoder hidden even / odd
                   pltpu.VMEM((Tp + 2, hp_i), jnp.bfloat16),
                   pltpu.VMEM((Tp + 2, vu), jnp.bfloat16),      # z
                   pltpu.VMEM((Tp + 2, hp_e), jnp.bfloat16),    # decoder hidden even / odd
                   pltpu.VMEM((Tp + 2, hp_e), jnp.bfloat16)]
        grid_spec = pltpu.PrefetchScalarGridSpec(
            num_scalar_prefetch=0,
            grid=(B,),
            in_specs=[_batch_spec(a) for a in data] + [_full_spec(a) for a in weights],
            out_specs=tuple(_out_spec(s) for s in out_shapes),
            scratch_shapes=scratch,
        )
        kernel = _make_vae_kernel(Tp, vu, x_dim, t_odd=(T % 2 == 1))
        enc_out, dec_out = pl.pallas_call(
            kernel,
            out_shape=out_shapes,
            grid_spec=grid_spec,
            compiler_params=pltpu.CompilerParams(
                # Batch axis is independent -> shards across v7x's 2 TensorCores.
                dimension_semantics=("parallel",),
                vmem_limit_bytes=vmem_limit,
            ),
        )(*data, *weights)

        mu_v = enc_out[..., :v_dim]
        mu_u = enc_out[..., v_dim:vu]
        logvar_v = enc_out[..., vu:vu + v_dim]
        logvar_u = enc_out[..., vu + v_dim:2 * vu]
        v = enc_out[..., 2 * vu:2 * vu + v_dim]
        u = enc_out[..., 2 * vu + v_dim:]

        # Free reshape undoes the in-kernel lane packing: (B,Tp,4xd) -> (B,2Tp,2xd) interleaved.
        dec2 = dec_out.reshape(B, 2 * Tp, 2 * x_dim)
        mu_x, logvar_x = dec2[..., :x_dim], dec2[..., x_dim:]
        if 2 * Tp != T:                          # odd-length input: decoder produced T+1 frames
            mu_x, logvar_x = mu_x[:, :T], logvar_x[:, :T]
        return ((mu_x, logvar_x), (mu_v, logvar_v), (mu_u, logvar_u), u, v)

    return forward


# --------------------------------------------------------------------------- #
if __name__ == "__main__":
    B, T = 2, 16
    X_DIM, V_DIM, U_DIM, HID = 24, 8, 8, 64

    key = jax.random.PRNGKey(0)
    k_param, k_x, k_noise = jax.random.split(key, 3)

    raw_params = init_params(k_param, X_DIM, V_DIM, U_DIM, hid_e=HID, hid_i=HID)
    packed_params = pack_params(raw_params, X_DIM, V_DIM, U_DIM)   # one-time layout work
    forward = make_forward(packed_params)

    x = jax.random.normal(k_x, (B, T, X_DIM), jnp.float32)
    lengths = jnp.array([T, T - 3], dtype=jnp.int32)

    out = jax.block_until_ready(forward(x, lengths, k_noise))

    (mu_x, logvar_x), (mu_v, logvar_v), (mu_u, logvar_u), u, v = out
    Tp = (T + 1) // 2
    assert mu_x.shape == (B, T, X_DIM) and logvar_x.shape == (B, T, X_DIM)
    assert mu_v.shape == (B, Tp, V_DIM) and logvar_v.shape == (B, Tp, V_DIM)
    assert mu_u.shape == (B, Tp, U_DIM) and logvar_u.shape == (B, Tp, U_DIM)
    assert u.shape == (B, Tp, U_DIM) and v.shape == (B, Tp, V_DIM)
    assert bool(jnp.all(jnp.isfinite(mu_x))) and bool(jnp.all(jnp.isfinite(logvar_x)))
    assert bool(jnp.all(jnp.isfinite(u))) and bool(jnp.all(jnp.isfinite(v)))
    assert float(jnp.max(logvar_x)) <= LOGVAR_MAX and float(jnp.min(logvar_x)) >= LOGVAR_MIN
    assert float(jnp.max(logvar_u)) <= LOGVAR_MAX and float(jnp.min(logvar_u)) >= LOGVAR_MIN
    assert float(jnp.max(logvar_v)) <= LOGVAR_MAX and float(jnp.min(logvar_v)) >= LOGVAR_MIN
    print("KERNEL_OK")
</pallas_src>

<mosaic_0001>
module attributes {stable_mosaic.version = 11 : i64} {
  func.func @kernel(%arg0: i32, %arg1: memref<1x8x24xf32, #tpu.memory_space<vmem>>, %arg2: memref<1x8x24xf32, #tpu.memory_space<vmem>>, %arg3: memref<1x8x16xf32, #tpu.memory_space<vmem>>, %arg4: memref<3x24x128xbf16, #tpu.memory_space<vmem>>, %arg5: memref<1x128xf32, #tpu.memory_space<vmem>>, %arg6: memref<3x128x128xbf16, #tpu.memory_space<vmem>>, %arg7: memref<1x128xf32, #tpu.memory_space<vmem>>, %arg8: memref<3x128x128xbf16, #tpu.memory_space<vmem>>, %arg9: memref<1x128xf32, #tpu.memory_space<vmem>>, %arg10: memref<3x128x128xbf16, #tpu.memory_space<vmem>>, %arg11: memref<1x128xf32, #tpu.memory_space<vmem>>, %arg12: memref<3x128x128xbf16, #tpu.memory_space<vmem>>, %arg13: memref<1x128xf32, #tpu.memory_space<vmem>>, %arg14: memref<4x128x128xbf16, #tpu.memory_space<vmem>>, %arg15: memref<4x1x128xf32, #tpu.memory_space<vmem>>, %arg16: memref<128x32xbf16, #tpu.memory_space<vmem>>, %arg17: memref<1x32xf32, #tpu.memory_space<vmem>>, %arg18: memref<3x16x128xbf16, #tpu.memory_space<vmem>>, %arg19: memref<1x128xf32, #tpu.memory_space<vmem>>, %arg20: memref<3x128x128xbf16, #tpu.memory_space<vmem>>, %arg21: memref<1x128xf32, #tpu.memory_space<vmem>>, %arg22: memref<3x128x128xbf16, #tpu.memory_space<vmem>>, %arg23: memref<1x128xf32, #tpu.memory_space<vmem>>, %arg24: memref<3x128x128xbf16, #tpu.memory_space<vmem>>, %arg25: memref<1x128xf32, #tpu.memory_space<vmem>>, %arg26: memref<3x128x128xbf16, #tpu.memory_space<vmem>>, %arg27: memref<1x128xf32, #tpu.memory_space<vmem>>, %arg28: memref<4x128x128xbf16, #tpu.memory_space<vmem>>, %arg29: memref<4x1x128xf32, #tpu.memory_space<vmem>>, %arg30: memref<128x48xbf16, #tpu.memory_space<vmem>>, %arg31: memref<1x48xf32, #tpu.memory_space<vmem>>, %arg32: memref<1x8x48xf32, #tpu.memory_space<vmem>>, %arg33: memref<1x8x96xf32, #tpu.memory_space<vmem>>, %arg34: memref<10x24xbf16, #tpu.memory_space<vmem>>, %arg35: memref<10x24xbf16, #tpu.memory_space<vmem>>, %arg36: memref<10x128xbf16, #tpu.memory_space<vmem>>, %arg37: memref<10x128xbf16, #tpu.memory_space<vmem>>, %arg38: memref<10x16xbf16, #tpu.memory_space<vmem>>, %arg39: memref<10x128xbf16, #tpu.memory_space<vmem>>, %arg40: memref<10x128xbf16, #tpu.memory_space<vmem>>) attributes {dimension_semantics = [#tpu.dimension_semantics<parallel>], iteration_bounds = array<i64: 2>, scalar_prefetch = 0 : i64, scratch_operands = 7 : i64, tpu.core_type = #tpu.core_type<tc>, window_params = [{transform_indices = @transform_0, window_bounds = array<i64: 1, 8, 24>}, {transform_indices = @transform_1, window_bounds = array<i64: 1, 8, 24>}, {transform_indices = @transform_2, window_bounds = array<i64: 1, 8, 16>}, {pipeline_mode = #tpu.pipeline_mode<synchronous>, transform_indices = @transform_3, window_bounds = array<i64: 3, 24, 128>}, {pipeline_mode = #tpu.pipeline_mode<synchronous>, transform_indices = @transform_4, window_bounds = array<i64: 1, 128>}, {pipeline_mode = #tpu.pipeline_mode<synchronous>, transform_indices = @transform_5, window_bounds = array<i64: 3, 128, 128>}, {pipeline_mode = #tpu.pipeline_mode<synchronous>, transform_indices = @transform_6, window_bounds = array<i64: 1, 128>}, {pipeline_mode = #tpu.pipeline_mode<synchronous>, transform_indices = @transform_7, window_bounds = array<i64: 3, 128, 128>}, {pipeline_mode = #tpu.pipeline_mode<synchronous>, transform_indices = @transform_8, window_bounds = array<i64: 1, 128>}, {pipeline_mode = #tpu.pipeline_mode<synchronous>, transform_indices = @transform_9, window_bounds = array<i64: 3, 128, 128>}, {pipeline_mode = #tpu.pipeline_mode<synchronous>, transform_indices = @transform_10, window_bounds = array<i64: 1, 128>}, {pipeline_mode = #tpu.pipeline_mode<synchronous>, transform_indices = @transform_11, window_bounds = array<i64: 3, 128, 128>}, {pipeline_mode = #tpu.pipeline_mode<synchronous>, transform_indices = @transform_12, window_bounds = array<i64: 1, 128>}, {pipeline_mode = #tpu.pipeline_mode<synchronous>, transform_indices = @transform_13, window_bounds = array<i64: 4, 128, 128>}, {pipeline_mode = #tpu.pipeline_mode<synchronous>, transform_indices = @transform_14, window_bounds = array<i64: 4, 1, 128>}, {pipeline_mode = #tpu.pipeline_mode<synchronous>, transform_indices = @transform_15, window_bounds = array<i64: 128, 32>}, {pipeline_mode = #tpu.pipeline_mode<synchronous>, transform_indices = @transform_16, window_bounds = array<i64: 1, 32>}, {pipeline_mode = #tpu.pipeline_mode<synchronous>, transform_indices = @transform_17, window_bounds = array<i64: 3, 16, 128>}, {pipeline_mode = #tpu.pipeline_mode<synchronous>, transform_indices = @transform_18, window_bounds = array<i64: 1, 128>}, {pipeline_mode = #tpu.pipeline_mode<synchronous>, transform_indices = @transform_19, window_bounds = array<i64: 3, 128, 128>}, {pipeline_mode = #tpu.pipeline_mode<synchronous>, transform_indices = @transform_20, window_bounds = array<i64: 1, 128>}, {pipeline_mode = #tpu.pipeline_mode<synchronous>, transform_indices = @transform_21, window_bounds = array<i64: 3, 128, 128>}, {pipeline_mode = #tpu.pipeline_mode<synchronous>, transform_indices = @transform_22, window_bounds = array<i64: 1, 128>}, {pipeline_mode = #tpu.pipeline_mode<synchronous>, transform_indices = @transform_23, window_bounds = array<i64: 3, 128, 128>}, {pipeline_mode = #tpu.pipeline_mode<synchronous>, transform_indices = @transform_24, window_bounds = array<i64: 1, 128>}, {pipeline_mode = #tpu.pipeline_mode<synchronous>, transform_indices = @transform_25, window_bounds = array<i64: 3, 128, 128>}, {pipeline_mode = #tpu.pipeline_mode<synchronous>, transform_indices = @transform_26, window_bounds = array<i64: 1, 128>}, {pipeline_mode = #tpu.pipeline_mode<synchronous>, transform_indices = @transform_27, window_bounds = array<i64: 4, 128, 128>}, {pipeline_mode = #tpu.pipeline_mode<synchronous>, transform_indices = @transform_28, window_bounds = array<i64: 4, 1, 128>}, {pipeline_mode = #tpu.pipeline_mode<synchronous>, transform_indices = @transform_29, window_bounds = array<i64: 128, 48>}, {pipeline_mode = #tpu.pipeline_mode<synchronous>, transform_indices = @transform_30, window_bounds = array<i64: 1, 48>}, {transform_indices = @transform_31, window_bounds = array<i64: 1, 8, 48>}, {transform_indices = @transform_32, window_bounds = array<i64: 1, 8, 96>}]} {
    %cst = arith.constant 0.000000e+00 : bf16
    %0 = vector.broadcast %cst : bf16 to vector<1x24xbf16>
    %c0 = arith.constant 0 : index
    %c0_0 = arith.constant 0 : index
    %1 = vector.load %arg34[%c0, %c0_0] : memref<10x24xbf16, #tpu.memory_space<vmem>>, vector<1x24xbf16>
    tpu.vector_store %arg34[%c0, %c0_0], %0 {strides = array<i32>} : memref<10x24xbf16, #tpu.memory_space<vmem>>, vector<1x24xbf16>,
    %c9 = arith.constant 9 : index
    %c0_1 = arith.constant 0 : index
    %2 = vector.load %arg34[%c9, %c0_1] : memref<10x24xbf16, #tpu.memory_space<vmem>>, vector<1x24xbf16>
    tpu.vector_store %arg34[%c9, %c0_1], %0 {strides = array<i32>} : memref<10x24xbf16, #tpu.memory_space<vmem>>, vector<1x24xbf16>,
    %cst_2 = arith.constant 0.000000e+00 : bf16
    %3 = vector.broadcast %cst_2 : bf16 to vector<1x24xbf16>
    %c0_3 = arith.constant 0 : index
    %c0_4 = arith.constant 0 : index
    %4 = vector.load %arg35[%c0_3, %c0_4] : memref<10x24xbf16, #tpu.memory_space<vmem>>, vector<1x24xbf16>
    tpu.vector_store %arg35[%c0_3, %c0_4], %3 {strides = array<i32>} : memref<10x24xbf16, #tpu.memory_space<vmem>>, vector<1x24xbf16>,
    %c9_5 = arith.constant 9 : index
    %c0_6 = arith.constant 0 : index
    %5 = vector.load %arg35[%c9_5, %c0_6] : memref<10x24xbf16, #tpu.memory_space<vmem>>, vector<1x24xbf16>
    tpu.vector_store %arg35[%c9_5, %c0_6], %3 {strides = array<i32>} : memref<10x24xbf16, #tpu.memory_space<vmem>>, vector<1x24xbf16>,
    %cst_7 = arith.constant 0.000000e+00 : bf16
    %6 = vector.broadcast %cst_7 : bf16 to vector<1x128xbf16>
    %c0_8 = arith.constant 0 : index
    %c0_9 = arith.constant 0 : index
    %7 = vector.load %arg36[%c0_8, %c0_9] : memref<10x128xbf16, #tpu.memory_space<vmem>>, vector<1x128xbf16>
    tpu.vector_store %arg36[%c0_8, %c0_9], %6 {strides = array<i32>} : memref<10x128xbf16, #tpu.memory_space<vmem>>, vector<1x128xbf16>,
    %c9_10 = arith.constant 9 : index
    %c0_11 = arith.constant 0 : index
    %8 = vector.load %arg36[%c9_10, %c0_11] : memref<10x128xbf16, #tpu.memory_space<vmem>>, vector<1x128xbf16>
    tpu.vector_store %arg36[%c9_10, %c0_11], %6 {strides = array<i32>} : memref<10x128xbf16, #tpu.memory_space<vmem>>, vector<1x128xbf16>,
    %cst_12 = arith.constant 0.000000e+00 : bf16
    %9 = vector.broadcast %cst_12 : bf16 to vector<1x128xbf16>
    %c0_13 = arith.constant 0 : index
    %c0_14 = arith.constant 0 : index
    %10 = vector.load %arg37[%c0_13, %c0_14] : memref<10x128xbf16, #tpu.memory_space<vmem>>, vector<1x128xbf16>
    tpu.vector_store %arg37[%c0_13, %c0_14], %9 {strides = array<i32>} : memref<10x128xbf16, #tpu.memory_space<vmem>>, vector<1x128xbf16>,
    %c9_15 = arith.constant 9 : index
    %c0_16 = arith.constant 0 : index
    %11 = vector.load %arg37[%c9_15, %c0_16] : memref<10x128xbf16, #tpu.memory_space<vmem>>, vector<1x128xbf16>
    tpu.vector_store %arg37[%c9_15, %c0_16], %9 {strides = array<i32>} : memref<10x128xbf16, #tpu.memory_space<vmem>>, vector<1x128xbf16>,
    %cst_17 = arith.constant 0.000000e+00 : bf16
    %12 = vector.broadcast %cst_17 : bf16 to vector<1x16xbf16>
    %c0_18 = arith.constant 0 : index
    %c0_19 = arith.constant 0 : index
    %13 = vector.load %arg38[%c0_18, %c0_19] : memref<10x16xbf16, #tpu.memory_space<vmem>>, vector<1x16xbf16>
    tpu.vector_store %arg38[%c0_18, %c0_19], %12 {strides = array<i32>} : memref<10x16xbf16, #tpu.memory_space<vmem>>, vector<1x16xbf16>,
    %c9_20 = arith.constant 9 : index
    %c0_21 = arith.constant 0 : index
    %14 = vector.load %arg38[%c9_20, %c0_21] : memref<10x16xbf16, #tpu.memory_space<vmem>>, vector<1x16xbf16>
    tpu.vector_store %arg38[%c9_20, %c0_21], %12 {strides = array<i32>} : memref<10x16xbf16, #tpu.memory_space<vmem>>, vector<1x16xbf16>,
    %cst_22 = arith.constant 0.000000e+00 : bf16
    %15 = vector.broadcast %cst_22 : bf16 to vector<1x128xbf16>
    %c0_23 = arith.constant 0 : index
    %c0_24 = arith.constant 0 : index
    %16 = vector.load %arg39[%c0_23, %c0_24] : memref<10x128xbf16, #tpu.memory_space<vmem>>, vector<1x128xbf16>
    tpu.vector_store %arg39[%c0_23, %c0_24], %15 {strides = array<i32>} : memref<10x128xbf16, #tpu.memory_space<vmem>>, vector<1x128xbf16>,
    %c9_25 = arith.constant 9 : index
    %c0_26 = arith.constant 0 : index
    %17 = vector.load %arg39[%c9_25, %c0_26] : memref<10x128xbf16, #tpu.memory_space<vmem>>, vector<1x128xbf16>
    tpu.vector_store %arg39[%c9_25, %c0_26], %15 {strides = array<i32>} : memref<10x128xbf16, #tpu.memory_space<vmem>>, vector<1x128xbf16>,
    %cst_27 = arith.constant 0.000000e+00 : bf16
    %18 = vector.broadcast %cst_27 : bf16 to vector<1x128xbf16>
    %c0_28 = arith.constant 0 : index
    %c0_29 = arith.constant 0 : index
    %19 = vector.load %arg40[%c0_28, %c0_29] : memref<10x128xbf16, #tpu.memory_space<vmem>>, vector<1x128xbf16>
    tpu.vector_store %arg40[%c0_28, %c0_29], %18 {strides = array<i32>} : memref<10x128xbf16, #tpu.memory_space<vmem>>, vector<1x128xbf16>,
    %c9_30 = arith.constant 9 : index
    %c0_31 = arith.constant 0 : index
    %20 = vector.load %arg40[%c9_30, %c0_31] : memref<10x128xbf16, #tpu.memory_space<vmem>>, vector<1x128xbf16>
    tpu.vector_store %arg40[%c9_30, %c0_31], %18 {strides = array<i32>} : memref<10x128xbf16, #tpu.memory_space<vmem>>, vector<1x128xbf16>,
    %c0_32 = arith.constant 0 : index
    %c0_33 = arith.constant 0 : index
    %c0_34 = arith.constant 0 : index
    %21 = vector.load %arg1[%c0_32, %c0_33, %c0_34] : memref<1x8x24xf32, #tpu.memory_space<vmem>>, vector<1x8x24xf32>
    %22 = vector.shape_cast %21 : vector<1x8x24xf32> to vector<8x24xf32>
    %23 = arith.truncf %22 : vector<8x24xf32> to vector<8x24xbf16>
    %c0_35 = arith.constant 0 : index
    %c0_36 = arith.constant 0 : index
    %c0_37 = arith.constant 0 : index
    %24 = vector.load %arg2[%c0_35, %c0_36, %c0_37] : memref<1x8x24xf32, #tpu.memory_space<vmem>>, vector<1x8x24xf32>
    %25 = vector.shape_cast %24 : vector<1x8x24xf32> to vector<8x24xf32>
    %26 = arith.truncf %25 : vector<8x24xf32> to vector<8x24xbf16>
    %c1 = arith.constant 1 : index
    %c0_38 = arith.constant 0 : index
    %27 = vector.load %arg34[%c1, %c0_38] : memref<10x24xbf16, #tpu.memory_space<vmem>>, vector<8x24xbf16>
    tpu.vector_store %arg34[%c1, %c0_38], %23 {strides = array<i32>} : memref<10x24xbf16, #tpu.memory_space<vmem>>, vector<8x24xbf16>,
    %c1_39 = arith.constant 1 : index
    %c0_40 = arith.constant 0 : index
    %28 = vector.load %arg35[%c1_39, %c0_40] : memref<10x24xbf16, #tpu.memory_space<vmem>>, vector<8x24xbf16>
    tpu.vector_store %arg35[%c1_39, %c0_40], %26 {strides = array<i32>} : memref<10x24xbf16, #tpu.memory_space<vmem>>, vector<8x24xbf16>,
    %c0_41 = arith.constant 0 : index
    %c0_42 = arith.constant 0 : index
    %29 = vector.load %arg35[%c0_41, %c0_42] : memref<10x24xbf16, #tpu.memory_space<vmem>>, vector<8x24xbf16>
    %c0_43 = arith.constant 0 : index
    %c0_44 = arith.constant 0 : index
    %c0_45 = arith.constant 0 : index
    %30 = vector.load %arg4[%c0_43, %c0_44, %c0_45] : memref<3x24x128xbf16, #tpu.memory_space<vmem>>, vector<1x24x128xbf16>
    %31 = vector.shape_cast %30 : vector<1x24x128xbf16> to vector<24x128xbf16>
    %cst_46 = arith.constant dense<0.000000e+00> : vector<8x128xf32>
    %32 = tpu.matmul %29, %31, %cst_46 {dimension_numbers = #tpu.dot_dimension_numbers<[1], [0], [0], [1], [0, 0, 1, 1], [], []>} : vector<8x24xbf16>, vector<24x128xbf16>, vector<8x128xf32> -> vector<8x128xf32>
    %c1_47 = arith.constant 1 : index
    %c0_48 = arith.constant 0 : index
    %c0_49 = arith.constant 0 : index
    %33 = vector.load %arg4[%c1_47, %c0_48, %c0_49] : memref<3x24x128xbf16, #tpu.memory_space<vmem>>, vector<1x24x128xbf16>
    %34 = vector.shape_cast %33 : vector<1x24x128xbf16> to vector<24x128xbf16>
    %cst_50 = arith.constant dense<0.000000e+00> : vector<8x128xf32>
    %35 = tpu.matmul %23, %34, %cst_50 {dimension_numbers = #tpu.dot_dimension_numbers<[1], [0], [0], [1], [0, 0, 1, 1], [], []>} : vector<8x24xbf16>, vector<24x128xbf16>, vector<8x128xf32> -> vector<8x128xf32>
    %36 = arith.addf %32, %35 : vector<8x128xf32>
    %c2 = arith.constant 2 : index
    %c0_51 = arith.constant 0 : index
    %c0_52 = arith.constant 0 : index
    %37 = vector.load %arg4[%c2, %c0_51, %c0_52] : memref<3x24x128xbf16, #tpu.memory_space<vmem>>, vector<1x24x128xbf16>
    %38 = vector.shape_cast %37 : vector<1x24x128xbf16> to vector<24x128xbf16>
    %cst_53 = arith.constant dense<0.000000e+00> : vector<8x128xf32>
    %39 = tpu.matmul %26, %38, %cst_53 {dimension_numbers = #tpu.dot_dimension_numbers<[1], [0], [0], [1], [0, 0, 1, 1], [], []>} : vector<8x24xbf16>, vector<24x128xbf16>, vector<8x128xf32> -> vector<8x128xf32>
    %40 = arith.addf %36, %39 : vector<8x128xf32>
    %c0_54 = arith.constant 0 : index
    %c0_55 = arith.constant 0 : index
    %c0_56 = arith.constant 0 : index
    %41 = vector.load %arg4[%c0_54, %c0_55, %c0_56] : memref<3x24x128xbf16, #tpu.memory_space<vmem>>, vector<1x24x128xbf16>
    %42 = vector.shape_cast %41 : vector<1x24x128xbf16> to vector<24x128xbf16>
    %cst_57 = arith.constant dense<0.000000e+00> : vector<8x128xf32>
    %43 = tpu.matmul %23, %42, %cst_57 {dimension_numbers = #tpu.dot_dimension_numbers<[1], [0], [0], [1], [0, 0, 1, 1], [], []>} : vector<8x24xbf16>, vector<24x128xbf16>, vector<8x128xf32> -> vector<8x128xf32>
    %c1_58 = arith.constant 1 : index
    %c0_59 = arith.constant 0 : index
    %c0_60 = arith.constant 0 : index
    %44 = vector.load %arg4[%c1_58, %c0_59, %c0_60] : memref<3x24x128xbf16, #tpu.memory_space<vmem>>, vector<1x24x128xbf16>
    %45 = vector.shape_cast %44 : vector<1x24x128xbf16> to vector<24x128xbf16>
    %cst_61 = arith.constant dense<0.000000e+00> : vector<8x128xf32>
    %46 = tpu.matmul %26, %45, %cst_61 {dimension_numbers = #tpu.dot_dimension_numbers<[1], [0], [0], [1], [0, 0, 1, 1], [], []>} : vector<8x24xbf16>, vector<24x128xbf16>, vector<8x128xf32> -> vector<8x128xf32>
    %47 = arith.addf %43, %46 : vector<8x128xf32>
    %c2_62 = arith.constant 2 : index
    %c0_63 = arith.constant 0 : index
    %48 = vector.load %arg34[%c2_62, %c0_63] : memref<10x24xbf16, #tpu.memory_space<vmem>>, vector<8x24xbf16>
    %c2_64 = arith.constant 2 : index
    %c0_65 = arith.constant 0 : index
    %c0_66 = arith.constant 0 : index
    %49 = vector.load %arg4[%c2_64, %c0_65, %c0_66] : memref<3x24x128xbf16, #tpu.memory_space<vmem>>, vector<1x24x128xbf16>
    %50 = vector.shape_cast %49 : vector<1x24x128xbf16> to vector<24x128xbf16>
    %cst_67 = arith.constant dense<0.000000e+00> : vector<8x128xf32>
    %51 = tpu.matmul %48, %50, %cst_67 {dimension_numbers = #tpu.dot_dimension_numbers<[1], [0], [0], [1], [0, 0, 1, 1], [], []>} : vector<8x24xbf16>, vector<24x128xbf16>, vector<8x128xf32> -> vector<8x128xf32>
    %52 = arith.addf %47, %51 : vector<8x128xf32>
    %c0_68 = arith.constant 0 : index
    %c0_69 = arith.constant 0 : index
    %53 = vector.load %arg5[%c0_68, %c0_69] : memref<1x128xf32, #tpu.memory_space<vmem>>, vector<1x128xf32>
    %54 = vector.broadcast %53 : vector<1x128xf32> to vector<8x128xf32>
    %55 = arith.addf %40, %54 : vector<8x128xf32>
    %c0_70 = arith.constant 0 : index
    %c0_71 = arith.constant 0 : index
    %56 = vector.load %arg5[%c0_70, %c0_71] : memref<1x128xf32, #tpu.memory_space<vmem>>, vector<1x128xf32>
    %57 = vector.broadcast %56 : vector<1x128xf32> to vector<8x128xf32>
    %58 = arith.addf %52, %57 : vector<8x128xf32>
    %cst_72 = arith.constant 0.000000e+00 : f32
    %59 = vector.broadcast %cst_72 : f32 to vector<8x128xf32>
    %60 = arith.maximumf %55, %59 : vector<8x128xf32>
    %cst_73 = arith.constant 0.000000e+00 : f32
    %61 = vector.broadcast %cst_73 : f32 to vector<8x128xf32>
    %62 = arith.maximumf %58, %61 : vector<8x128xf32>
    %63 = arith.truncf %60 : vector<8x128xf32> to vector<8x128xbf16>
    %64 = arith.truncf %62 : vector<8x128xf32> to vector<8x128xbf16>
    %c1_74 = arith.constant 1 : index
    %c0_75 = arith.constant 0 : index
    %65 = vector.load %arg36[%c1_74, %c0_75] : memref<10x128xbf16, #tpu.memory_space<vmem>>, vector<8x128xbf16>
    tpu.vector_store %arg36[%c1_74, %c0_75], %63 {strides = array<i32>} : memref<10x128xbf16, #tpu.memory_space<vmem>>, vector<8x128xbf16>,
    %c1_76 = arith.constant 1 : index
    %c0_77 = arith.constant 0 : index
    %66 = vector.load %arg37[%c1_76, %c0_77] : memref<10x128xbf16, #tpu.memory_space<vmem>>, vector<8x128xbf16>
    tpu.vector_store %arg37[%c1_76, %c0_77], %64 {strides = array<i32>} : memref<10x128xbf16, #tpu.memory_space<vmem>>, vector<8x128xbf16>,
    %c0_78 = arith.constant 0 : index
    %c0_79 = arith.constant 0 : index
    %67 = vector.load %arg37[%c0_78, %c0_79] : memref<10x128xbf16, #tpu.memory_space<vmem>>, vector<8x128xbf16>
    %c0_80 = arith.constant 0 : index
    %c0_81 = arith.constant 0 : index
    %c0_82 = arith.constant 0 : index
    %68 = vector.load %arg6[%c0_80, %c0_81, %c0_82] : memref<3x128x128xbf16, #tpu.memory_space<vmem>>, vector<1x128x128xbf16>
    %69 = vector.shape_cast %68 : vector<1x128x128xbf16> to vector<128x128xbf16>
    %cst_83 = arith.constant dense<0.000000e+00> : vector<8x128xf32>
    %70 = tpu.matmul %67, %69, %cst_83 {dimension_numbers = #tpu.dot_dimension_numbers<[1], [0], [0], [1], [0, 0, 1, 1], [], []>} : vector<8x128xbf16>, vector<128x128xbf16>, vector<8x128xf32> -> vector<8x128xf32>
    %c1_84 = arith.constant 1 : index
    %c0_85 = arith.constant 0 : index
    %c0_86 = arith.constant 0 : index
    %71 = vector.load %arg6[%c1_84, %c0_85, %c0_86] : memref<3x128x128xbf16, #tpu.memory_space<vmem>>, vector<1x128x128xbf16>
    %72 = vector.shape_cast %71 : vector<1x128x128xbf16> to vector<128x128xbf16>
    %cst_87 = arith.constant dense<0.000000e+00> : vector<8x128xf32>
    %73 = tpu.matmul %63, %72, %cst_87 {dimension_numbers = #tpu.dot_dimension_numbers<[1], [0], [0], [1], [0, 0, 1, 1], [], []>} : vector<8x128xbf16>, vector<128x128xbf16>, vector<8x128xf32> -> vector<8x128xf32>
    %74 = arith.addf %70, %73 : vector<8x128xf32>
    %c2_88 = arith.constant 2 : index
    %c0_89 = arith.constant 0 : index
    %c0_90 = arith.constant 0 : index
    %75 = vector.load %arg6[%c2_88, %c0_89, %c0_90] : memref<3x128x128xbf16, #tpu.memory_space<vmem>>, vector<1x128x128xbf16>
    %76 = vector.shape_cast %75 : vector<1x128x128xbf16> to vector<128x128xbf16>
    %cst_91 = arith.constant dense<0.000000e+00> : vector<8x128xf32>
    %77 = tpu.matmul %64, %76, %cst_91 {dimension_numbers = #tpu.dot_dimension_numbers<[1], [0], [0], [1], [0, 0, 1, 1], [], []>} : vector<8x128xbf16>, vector<128x128xbf16>, vector<8x128xf32> -> vector<8x128xf32>
    %78 = arith.addf %74, %77 : vector<8x128xf32>
    %c0_92 = arith.constant 0 : index
    %c0_93 = arith.constant 0 : index
    %c0_94 = arith.constant 0 : index
    %79 = vector.load %arg6[%c0_92, %c0_93, %c0_94] : memref<3x128x128xbf16, #tpu.memory_space<vmem>>, vector<1x128x128xbf16>
    %80 = vector.shape_cast %79 : vector<1x128x128xbf16> to vector<128x128xbf16>
    %cst_95 = arith.constant dense<0.000000e+00> : vector<8x128xf32>
    %81 = tpu.matmul %63, %80, %cst_95 {dimension_numbers = #tpu.dot_dimension_numbers<[1], [0], [0], [1], [0, 0, 1, 1], [], []>} : vector<8x128xbf16>, vector<128x128xbf16>, vector<8x128xf32> -> vector<8x128xf32>
    %c1_96 = arith.constant 1 : index
    %c0_97 = arith.constant 0 : index
    %c0_98 = arith.constant 0 : index
    %82 = vector.load %arg6[%c1_96, %c0_97, %c0_98] : memref<3x128x128xbf16, #tpu.memory_space<vmem>>, vector<1x128x128xbf16>
    %83 = vector.shape_cast %82 : vector<1x128x128xbf16> to vector<128x128xbf16>
    %cst_99 = arith.constant dense<0.000000e+00> : vector<8x128xf32>
    %84 = tpu.matmul %64, %83, %cst_99 {dimension_numbers = #tpu.dot_dimension_numbers<[1], [0], [0], [1], [0, 0, 1, 1], [], []>} : vector<8x128xbf16>, vector<128x128xbf16>, vector<8x128xf32> -> vector<8x128xf32>
    %85 = arith.addf %81, %84 : vector<8x128xf32>
    %c2_100 = arith.constant 2 : index
    %c0_101 = arith.constant 0 : index
    %86 = vector.load %arg36[%c2_100, %c0_101] : memref<10x128xbf16, #tpu.memory_space<vmem>>, vector<8x128xbf16>
    %c2_102 = arith.constant 2 : index
    %c0_103 = arith.constant 0 : index
    %c0_104 = arith.constant 0 : index
    %87 = vector.load %arg6[%c2_102, %c0_103, %c0_104] : memref<3x128x128xbf16, #tpu.memory_space<vmem>>, vector<1x128x128xbf16>
    %88 = vector.shape_cast %87 : vector<1x128x128xbf16> to vector<128x128xbf16>
    %cst_105 = arith.constant dense<0.000000e+00> : vector<8x128xf32>
    %89 = tpu.matmul %86, %88, %cst_105 {dimension_numbers = #tpu.dot_dimension_numbers<[1], [0], [0], [1], [0, 0, 1, 1], [], []>} : vector<8x128xbf16>, vector<128x128xbf16>, vector<8x128xf32> -> vector<8x128xf32>
    %90 = arith.addf %85, %89 : vector<8x128xf32>
    %c0_106 = arith.constant 0 : index
    %c0_107 = arith.constant 0 : index
    %91 = vector.load %arg7[%c0_106, %c0_107] : memref<1x128xf32, #tpu.memory_space<vmem>>, vector<1x128xf32>
    %92 = vector.broadcast %91 : vector<1x128xf32> to vector<8x128xf32>
    %93 = arith.addf %78, %92 : vector<8x128xf32>
    %c0_108 = arith.constant 0 : index
    %c0_109 = arith.constant 0 : index
    %94 = vector.load %arg7[%c0_108, %c0_109] : memref<1x128xf32, #tpu.memory_space<vmem>>, vector<1x128xf32>
    %95 = vector.broadcast %94 : vector<1x128xf32> to vector<8x128xf32>
    %96 = arith.addf %90, %95 : vector<8x128xf32>
    %cst_110 = arith.constant 0.000000e+00 : f32
    %97 = vector.broadcast %cst_110 : f32 to vector<8x128xf32>
    %98 = arith.maximumf %93, %97 : vector<8x128xf32>
    %99 = arith.addf %98, %60 : vector<8x128xf32>
    %cst_111 = arith.constant 0.000000e+00 : f32
    %100 = vector.broadcast %cst_111 : f32 to vector<8x128xf32>
    %101 = arith.maximumf %96, %100 : vector<8x128xf32>
    %102 = arith.addf %101, %62 : vector<8x128xf32>
    %103 = arith.truncf %99 : vector<8x128xf32> to vector<8x128xbf16>
    %104 = arith.truncf %102 : vector<8x128xf32> to vector<8x128xbf16>
    %c1_112 = arith.constant 1 : index
    %c0_113 = arith.constant 0 : index
    %105 = vector.load %arg37[%c1_112, %c0_113] : memref<10x128xbf16, #tpu.memory_space<vmem>>, vector<8x128xbf16>
    tpu.vector_store %arg37[%c1_112, %c0_113], %104 {strides = array<i32>} : memref<10x128xbf16, #tpu.memory_space<vmem>>, vector<8x128xbf16>,
    %c0_114 = arith.constant 0 : index
    %c0_115 = arith.constant 0 : index
    %106 = vector.load %arg37[%c0_114, %c0_115] : memref<10x128xbf16, #tpu.memory_space<vmem>>, vector<8x128xbf16>
    %c0_116 = arith.constant 0 : index
    %c0_117 = arith.constant 0 : index
    %c0_118 = arith.constant 0 : index
    %107 = vector.load %arg8[%c0_116, %c0_117, %c0_118] : memref<3x128x128xbf16, #tpu.memory_space<vmem>>, vector<1x128x128xbf16>
    %108 = vector.shape_cast %107 : vector<1x128x128xbf16> to vector<128x128xbf16>
    %cst_119 = arith.constant dense<0.000000e+00> : vector<8x128xf32>
    %109 = tpu.matmul %106, %108, %cst_119 {dimension_numbers = #tpu.dot_dimension_numbers<[1], [0], [0], [1], [0, 0, 1, 1], [], []>} : vector<8x128xbf16>, vector<128x128xbf16>, vector<8x128xf32> -> vector<8x128xf32>
    %c1_120 = arith.constant 1 : index
    %c0_121 = arith.constant 0 : index
    %c0_122 = arith.constant 0 : index
    %110 = vector.load %arg8[%c1_120, %c0_121, %c0_122] : memref<3x128x128xbf16, #tpu.memory_space<vmem>>, vector<1x128x128xbf16>
    %111 = vector.shape_cast %110 : vector<1x128x128xbf16> to vector<128x128xbf16>
    %cst_123 = arith.constant dense<0.000000e+00> : vector<8x128xf32>
    %112 = tpu.matmul %103, %111, %cst_123 {dimension_numbers = #tpu.dot_dimension_numbers<[1], [0], [0], [1], [0, 0, 1, 1], [], []>} : vector<8x128xbf16>, vector<128x128xbf16>, vector<8x128xf32> -> vector<8x128xf32>
    %113 = arith.addf %109, %112 : vector<8x128xf32>
    %c2_124 = arith.constant 2 : index
    %c0_125 = arith.constant 0 : index
    %c0_126 = arith.constant 0 : index
    %114 = vector.load %arg8[%c2_124, %c0_125, %c0_126] : memref<3x128x128xbf16, #tpu.memory_space<vmem>>, vector<1x128x128xbf16>
    %115 = vector.shape_cast %114 : vector<1x128x128xbf16> to vector<128x128xbf16>
    %cst_127 = arith.constant dense<0.000000e+00> : vector<8x128xf32>
    %116 = tpu.matmul %104, %115, %cst_127 {dimension_numbers = #tpu.dot_dimension_numbers<[1], [0], [0], [1], [0, 0, 1, 1], [], []>} : vector<8x128xbf16>, vector<128x128xbf16>, vector<8x128xf32> -> vector<8x128xf32>
    %117 = arith.addf %113, %116 : vector<8x128xf32>
    %c0_128 = arith.constant 0 : index
    %c0_129 = arith.constant 0 : index
    %118 = vector.load %arg9[%c0_128, %c0_129] : memref<1x128xf32, #tpu.memory_space<vmem>>, vector<1x128xf32>
    %119 = vector.broadcast %118 : vector<1x128xf32> to vector<8x128xf32>
    %120 = arith.addf %117, %119 : vector<8x128xf32>
    %cst_130 = arith.constant 0.000000e+00 : f32
    %121 = vector.broadcast %cst_130 : f32 to vector<8x128xf32>
    %122 = arith.maximumf %120, %121 : vector<8x128xf32>
    %123 = arith.truncf %122 : vector<8x128xf32> to vector<8x128xbf16>
    %c1_131 = arith.constant 1 : index
    %c0_132 = arith.constant 0 : index
    %124 = vector.load %arg36[%c1_131, %c0_132] : memref<10x128xbf16, #tpu.memory_space<vmem>>, vector<8x128xbf16>
    tpu.vector_store %arg36[%c1_131, %c0_132], %123 {strides = array<i32>} : memref<10x128xbf16, #tpu.memory_space<vmem>>, vector<8x128xbf16>,
    %c0_133 = arith.constant 0 : index
    %c0_134 = arith.constant 0 : index
    %125 = vector.load %arg36[%c0_133, %c0_134] : memref<10x128xbf16, #tpu.memory_space<vmem>>, vector<8x128xbf16>
    %c0_135 = arith.constant 0 : index
    %c0_136 = arith.constant 0 : index
    %c0_137 = arith.constant 0 : index
    %126 = vector.load %arg10[%c0_135, %c0_136, %c0_137] : memref<3x128x128xbf16, #tpu.memory_space<vmem>>, vector<1x128x128xbf16>
    %127 = vector.shape_cast %126 : vector<1x128x128xbf16> to vector<128x128xbf16>
    %cst_138 = arith.constant dense<0.000000e+00> : vector<8x128xf32>
    %128 = tpu.matmul %125, %127, %cst_138 {dimension_numbers = #tpu.dot_dimension_numbers<[1], [0], [0], [1], [0, 0, 1, 1], [], []>} : vector<8x128xbf16>, vector<128x128xbf16>, vector<8x128xf32> -> vector<8x128xf32>
    %c1_139 = arith.constant 1 : index
    %c0_140 = arith.constant 0 : index
    %c0_141 = arith.constant 0 : index
    %129 = vector.load %arg10[%c1_139, %c0_140, %c0_141] : memref<3x128x128xbf16, #tpu.memory_space<vmem>>, vector<1x128x128xbf16>
    %130 = vector.shape_cast %129 : vector<1x128x128xbf16> to vector<128x128xbf16>
    %cst_142 = arith.constant dense<0.000000e+00> : vector<8x128xf32>
    %131 = tpu.matmul %123, %130, %cst_142 {dimension_numbers = #tpu.dot_dimension_numbers<[1], [0], [0], [1], [0, 0, 1, 1], [], []>} : vector<8x128xbf16>, vector<128x128xbf16>, vector<8x128xf32> -> vector<8x128xf32>
    %132 = arith.addf %128, %131 : vector<8x128xf32>
    %c2_143 = arith.constant 2 : index
    %c0_144 = arith.constant 0 : index
    %133 = vector.load %arg36[%c2_143, %c0_144] : memref<10x128xbf16, #tpu.memory_space<vmem>>, vector<8x128xbf16>
    %c2_145 = arith.constant 2 : index
    %c0_146 = arith.constant 0 : index
    %c0_147 = arith.constant 0 : index
    %134 = vector.load %arg10[%c2_145, %c0_146, %c0_147] : memref<3x128x128xbf16, #tpu.memory_space<vmem>>, vector<1x128x128xbf16>
    %135 = vector.shape_cast %134 : vector<1x128x128xbf16> to vector<128x128xbf16>
    %cst_148 = arith.constant dense<0.000000e+00> : vector<8x128xf32>
    %136 = tpu.matmul %133, %135, %cst_148 {dimension_numbers = #tpu.dot_dimension_numbers<[1], [0], [0], [1], [0, 0, 1, 1], [], []>} : vector<8x128xbf16>, vector<128x128xbf16>, vector<8x128xf32> -> vector<8x128xf32>
    %137 = arith.addf %132, %136 : vector<8x128xf32>
    %c0_149 = arith.constant 0 : index
    %c0_150 = arith.constant 0 : index
    %138 = vector.load %arg11[%c0_149, %c0_150] : memref<1x128xf32, #tpu.memory_space<vmem>>, vector<1x128xf32>
    %139 = vector.broadcast %138 : vector<1x128xf32> to vector<8x128xf32>
    %140 = arith.addf %137, %139 : vector<8x128xf32>
    %cst_151 = arith.constant 0.000000e+00 : f32
    %141 = vector.broadcast %cst_151 : f32 to vector<8x128xf32>
    %142 = arith.maximumf %140, %141 : vector<8x128xf32>
    %143 = arith.addf %142, %122 : vector<8x128xf32>
    %144 = arith.truncf %143 : vector<8x128xf32> to vector<8x128xbf16>
    %c1_152 = arith.constant 1 : index
    %c0_153 = arith.constant 0 : index
    %145 = vector.load %arg36[%c1_152, %c0_153] : memref<10x128xbf16, #tpu.memory_space<vmem>>, vector<8x128xbf16>
    tpu.vector_store %arg36[%c1_152, %c0_153], %144 {strides = array<i32>} : memref<10x128xbf16, #tpu.memory_space<vmem>>, vector<8x128xbf16>,
    %c0_154 = arith.constant 0 : index
    %c0_155 = arith.constant 0 : index
    %146 = vector.load %arg36[%c0_154, %c0_155] : memref<10x128xbf16, #tpu.memory_space<vmem>>, vector<8x128xbf16>
    %c0_156 = arith.constant 0 : index
    %c0_157 = arith.constant 0 : index
    %c0_158 = arith.constant 0 : index
    %147 = vector.load %arg12[%c0_156, %c0_157, %c0_158] : memref<3x128x128xbf16, #tpu.memory_space<vmem>>, vector<1x128x128xbf16>
    %148 = vector.shape_cast %147 : vector<1x128x128xbf16> to vector<128x128xbf16>
    %cst_159 = arith.constant dense<0.000000e+00> : vector<8x128xf32>
    %149 = tpu.matmul %146, %148, %cst_159 {dimension_numbers = #tpu.dot_dimension_numbers<[1], [0], [0], [1], [0, 0, 1, 1], [], []>} : vector<8x128xbf16>, vector<128x128xbf16>, vector<8x128xf32> -> vector<8x128xf32>
    %c1_160 = arith.constant 1 : index
    %c0_161 = arith.constant 0 : index
    %c0_162 = arith.constant 0 : index
    %150 = vector.load %arg12[%c1_160, %c0_161, %c0_162] : memref<3x128x128xbf16, #tpu.memory_space<vmem>>, vector<1x128x128xbf16>
    %151 = vector.shape_cast %150 : vector<1x128x128xbf16> to vector<128x128xbf16>
    %cst_163 = arith.constant dense<0.000000e+00> : vector<8x128xf32>
    %152 = tpu.matmul %144, %151, %cst_163 {dimension_numbers = #tpu.dot_dimension_numbers<[1], [0], [0], [1], [0, 0, 1, 1], [], []>} : vector<8x128xbf16>, vector<128x128xbf16>, vector<8x128xf32> -> vector<8x128xf32>
    %153 = arith.addf %149, %152 : vector<8x128xf32>
    %c2_164 = arith.constant 2 : index
    %c0_165 = arith.constant 0 : index
    %154 = vector.load %arg36[%c2_164, %c0_165] : memref<10x128xbf16, #tpu.memory_space<vmem>>, vector<8x128xbf16>
    %c2_166 = arith.constant 2 : index
    %c0_167 = arith.constant 0 : index
    %c0_168 = arith.constant 0 : index
    %155 = vector.load %arg12[%c2_166, %c0_167, %c0_168] : memref<3x128x128xbf16, #tpu.memory_space<vmem>>, vector<1x128x128xbf16>
    %156 = vector.shape_cast %155 : vector<1x128x128xbf16> to vector<128x128xbf16>
    %cst_169 = arith.constant dense<0.000000e+00> : vector<8x128xf32>
    %157 = tpu.matmul %154, %156, %cst_169 {dimension_numbers = #tpu.dot_dimension_numbers<[1], [0], [0], [1], [0, 0, 1, 1], [], []>} : vector<8x128xbf16>, vector<128x128xbf16>, vector<8x128xf32> -> vector<8x128xf32>
    %158 = arith.addf %153, %157 : vector<8x128xf32>
    %c0_170 = arith.constant 0 : index
    %c0_171 = arith.constant 0 : index
    %159 = vector.load %arg13[%c0_170, %c0_171] : memref<1x128xf32, #tpu.memory_space<vmem>>, vector<1x128xf32>
    %160 = vector.broadcast %159 : vector<1x128xf32> to vector<8x128xf32>
    %161 = arith.addf %158, %160 : vector<8x128xf32>
    %cst_172 = arith.constant 0.000000e+00 : f32
    %162 = vector.broadcast %cst_172 : f32 to vector<8x128xf32>
    %163 = arith.maximumf %161, %162 : vector<8x128xf32>
    %164 = arith.addf %163, %143 : vector<8x128xf32>
    %165 = arith.truncf %164 : vector<8x128xf32> to vector<8x128xbf16>
    %c0_173 = arith.constant 0 : index
    %c0_174 = arith.constant 0 : index
    %c0_175 = arith.constant 0 : index
    %166 = vector.load %arg14[%c0_173, %c0_174, %c0_175] : memref<4x128x128xbf16, #tpu.memory_space<vmem>>, vector<1x128x128xbf16>
    %167 = vector.shape_cast %166 : vector<1x128x128xbf16> to vector<128x128xbf16>
    %cst_176 = arith.constant dense<0.000000e+00> : vector<8x128xf32>
    %168 = tpu.matmul %165, %167, %cst_176 {dimension_numbers = #tpu.dot_dimension_numbers<[1], [0], [0], [1], [0, 0, 1, 1], [], []>} : vector<8x128xbf16>, vector<128x128xbf16>, vector<8x128xf32> -> vector<8x128xf32>
    %c0_177 = arith.constant 0 : index
    %c0_178 = arith.constant 0 : index
    %c0_179 = arith.constant 0 : index
    %169 = vector.load %arg15[%c0_177, %c0_178, %c0_179] : memref<4x1x128xf32, #tpu.memory_space<vmem>>, vector<1x1x128xf32>
    %170 = vector.shape_cast %169 : vector<1x1x128xf32> to vector<1x128xf32>
    %171 = vector.broadcast %170 : vector<1x128xf32> to vector<8x128xf32>
    %172 = arith.addf %168, %171 : vector<8x128xf32>
    %cst_180 = arith.constant 0.000000e+00 : f32
    %173 = vector.broadcast %cst_180 : f32 to vector<8x128xf32>
    %174 = arith.maximumf %172, %173 : vector<8x128xf32>
    %175 = arith.addf %174, %164 : vector<8x128xf32>
    %176 = arith.truncf %175 : vector<8x128xf32> to vector<8x128xbf16>
    %c1_181 = arith.constant 1 : index
    %c0_182 = arith.constant 0 : index
    %c0_183 = arith.constant 0 : index
    %177 = vector.load %arg14[%c1_181, %c0_182, %c0_183] : memref<4x128x128xbf16, #tpu.memory_space<vmem>>, vector<1x128x128xbf16>
    %178 = vector.shape_cast %177 : vector<1x128x128xbf16> to vector<128x128xbf16>
    %cst_184 = arith.constant dense<0.000000e+00> : vector<8x128xf32>
    %179 = tpu.matmul %176, %178, %cst_184 {dimension_numbers = #tpu.dot_dimension_numbers<[1], [0], [0], [1], [0, 0, 1, 1], [], []>} : vector<8x128xbf16>, vector<128x128xbf16>, vector<8x128xf32> -> vector<8x128xf32>
    %c1_185 = arith.constant 1 : index
    %c0_186 = arith.constant 0 : index
    %c0_187 = arith.constant 0 : index
    %180 = vector.load %arg15[%c1_185, %c0_186, %c0_187] : memref<4x1x128xf32, #tpu.memory_space<vmem>>, vector<1x1x128xf32>
    %181 = vector.shape_cast %180 : vector<1x1x128xf32> to vector<1x128xf32>
    %182 = vector.broadcast %181 : vector<1x128xf32> to vector<8x128xf32>
    %183 = arith.addf %179, %182 : vector<8x128xf32>
    %cst_188 = arith.constant 0.000000e+00 : f32
    %184 = vector.broadcast %cst_188 : f32 to vector<8x128xf32>
    %185 = arith.maximumf %183, %184 : vector<8x128xf32>
    %186 = arith.addf %185, %175 : vector<8x128xf32>
    %187 = arith.truncf %186 : vector<8x128xf32> to vector<8x128xbf16>
    %c2_189 = arith.constant 2 : index
    %c0_190 = arith.constant 0 : index
    %c0_191 = arith.constant 0 : index
    %188 = vector.load %arg14[%c2_189, %c0_190, %c0_191] : memref<4x128x128xbf16, #tpu.memory_space<vmem>>, vector<1x128x128xbf16>
    %189 = vector.shape_cast %188 : vector<1x128x128xbf16> to vector<128x128xbf16>
    %cst_192 = arith.constant dense<0.000000e+00> : vector<8x128xf32>
    %190 = tpu.matmul %187, %189, %cst_192 {dimension_numbers = #tpu.dot_dimension_numbers<[1], [0], [0], [1], [0, 0, 1, 1], [], []>} : vector<8x128xbf16>, vector<128x128xbf16>, vector<8x128xf32> -> vector<8x128xf32>
    %c2_193 = arith.constant 2 : index
    %c0_194 = arith.constant 0 : index
    %c0_195 = arith.constant 0 : index
    %191 = vector.load %arg15[%c2_193, %c0_194, %c0_195] : memref<4x1x128xf32, #tpu.memory_space<vmem>>, vector<1x1x128xf32>
    %192 = vector.shape_cast %191 : vector<1x1x128xf32> to vector<1x128xf32>
    %193 = vector.broadcast %192 : vector<1x128xf32> to vector<8x128xf32>
    %194 = arith.addf %190, %193 : vector<8x128xf32>
    %cst_196 = arith.constant 0.000000e+00 : f32
    %195 = vector.broadcast %cst_196 : f32 to vector<8x128xf32>
    %196 = arith.maximumf %194, %195 : vector<8x128xf32>
    %197 = arith.addf %196, %186 : vector<8x128xf32>
    %198 = arith.truncf %197 : vector<8x128xf32> to vector<8x128xbf16>
    %c3 = arith.constant 3 : index
    %c0_197 = arith.constant 0 : index
    %c0_198 = arith.constant 0 : index
    %199 = vector.load %arg14[%c3, %c0_197, %c0_198] : memref<4x128x128xbf16, #tpu.memory_space<vmem>>, vector<1x128x128xbf16>
    %200 = vector.shape_cast %199 : vector<1x128x128xbf16> to vector<128x128xbf16>
    %cst_199 = arith.constant dense<0.000000e+00> : vector<8x128xf32>
    %201 = tpu.matmul %198, %200, %cst_199 {dimension_numbers = #tpu.dot_dimension_numbers<[1], [0], [0], [1], [0, 0, 1, 1], [], []>} : vector<8x128xbf16>, vector<128x128xbf16>, vector<8x128xf32> -> vector<8x128xf32>
    %c3_200 = arith.constant 3 : index
    %c0_201 = arith.constant 0 : index
    %c0_202 = arith.constant 0 : index
    %202 = vector.load %arg15[%c3_200, %c0_201, %c0_202] : memref<4x1x128xf32, #tpu.memory_space<vmem>>, vector<1x1x128xf32>
    %203 = vector.shape_cast %202 : vector<1x1x128xf32> to vector<1x128xf32>
    %204 = vector.broadcast %203 : vector<1x128xf32> to vector<8x128xf32>
    %205 = arith.addf %201, %204 : vector<8x128xf32>
    %cst_203 = arith.constant 0.000000e+00 : f32
    %206 = vector.broadcast %cst_203 : f32 to vector<8x128xf32>
    %207 = arith.maximumf %205, %206 : vector<8x128xf32>
    %208 = arith.addf %207, %197 : vector<8x128xf32>
    %209 = arith.truncf %208 : vector<8x128xf32> to vector<8x128xbf16>
    %c0_204 = arith.constant 0 : index
    %c0_205 = arith.constant 0 : index
    %210 = vector.load %arg16[%c0_204, %c0_205] : memref<128x32xbf16, #tpu.memory_space<vmem>>, vector<128x32xbf16>
    %cst_206 = arith.constant dense<0.000000e+00> : vector<8x32xf32>
    %211 = tpu.matmul %209, %210, %cst_206 {dimension_numbers = #tpu.dot_dimension_numbers<[1], [0], [0], [1], [0, 0, 1, 1], [], []>} : vector<8x128xbf16>, vector<128x32xbf16>, vector<8x32xf32> -> vector<8x32xf32>
    %c0_207 = arith.constant 0 : index
    %c0_208 = arith.constant 0 : index
    %212 = vector.load %arg17[%c0_207, %c0_208] : memref<1x32xf32, #tpu.memory_space<vmem>>, vector<1x32xf32>
    %213 = vector.broadcast %212 : vector<1x32xf32> to vector<8x32xf32>
    %214 = arith.addf %211, %213 : vector<8x32xf32>
    %215 = vector.extract_strided_slice %214 {offsets = [0, 0], sizes = [8, 16], strides = [1, 1]} : vector<8x32xf32> to vector<8x16xf32>
    %216 = vector.extract_strided_slice %214 {offsets = [0, 16], sizes = [8, 16], strides = [1, 1]} : vector<8x32xf32> to vector<8x16xf32>
    %cst_209 = arith.constant -5.000000e+00 : f32
    %cst_210 = arith.constant 5.000000e+00 : f32
    %217 = vector.broadcast %cst_209 : f32 to vector<8x16xf32>
    %218 = arith.maximumf %217, %216 : vector<8x16xf32>
    %219 = vector.broadcast %cst_210 : f32 to vector<8x16xf32>
    %220 = arith.minimumf %219, %218 : vector<8x16xf32>
    %c0_211 = arith.constant 0 : index
    %c0_212 = arith.constant 0 : index
    %c0_213 = arith.constant 0 : index
    %221 = vector.load %arg3[%c0_211, %c0_212, %c0_213] : memref<1x8x16xf32, #tpu.memory_space<vmem>>, vector<1x8x16xf32>
    %222 = vector.shape_cast %221 : vector<1x8x16xf32> to vector<8x16xf32>
    %cst_214 = arith.constant 5.000000e-01 : f32
    %223 = vector.broadcast %cst_214 : f32 to vector<8x16xf32>
    %224 = arith.mulf %223, %220 : vector<8x16xf32>
    %225 = math.exp %224 : vector<8x16xf32>
    %226 = arith.mulf %222, %225 : vector<8x16xf32>
    %227 = arith.addf %215, %226 : vector<8x16xf32>
    %228 = tpu.concatenate %215, %220, %227 in 1 : vector<8x16xf32>, vector<8x16xf32>, vector<8x16xf32> -> vector<8x48xf32>
    %c0_215 = arith.constant 0 : index
    %c0_216 = arith.constant 0 : index
    %c0_217 = arith.constant 0 : index
    %229 = vector.load %arg32[%c0_215, %c0_216, %c0_217] : memref<1x8x48xf32, #tpu.memory_space<vmem>>, vector<1x8x48xf32>
    %230 = vector.shape_cast %229 : vector<1x8x48xf32> to vector<8x48xf32>
    %231 = vector.shape_cast %228 : vector<8x48xf32> to vector<1x8x48xf32>
    tpu.vector_store %arg32[%c0_215, %c0_216, %c0_217], %231 {strides = array<i32>} : memref<1x8x48xf32, #tpu.memory_space<vmem>>, vector<1x8x48xf32>,
    %232 = arith.truncf %227 : vector<8x16xf32> to vector<8x16xbf16>
    %c1_218 = arith.constant 1 : index
    %c0_219 = arith.constant 0 : index
    %233 = vector.load %arg38[%c1_218, %c0_219] : memref<10x16xbf16, #tpu.memory_space<vmem>>, vector<8x16xbf16>
    tpu.vector_store %arg38[%c1_218, %c0_219], %232 {strides = array<i32>} : memref<10x16xbf16, #tpu.memory_space<vmem>>, vector<8x16xbf16>,
    %c0_220 = arith.constant 0 : index
    %c0_221 = arith.constant 0 : index
    %234 = vector.load %arg38[%c0_220, %c0_221] : memref<10x16xbf16, #tpu.memory_space<vmem>>, vector<8x16xbf16>
    %c0_222 = arith.constant 0 : index
    %c0_223 = arith.constant 0 : index
    %c0_224 = arith.constant 0 : index
    %235 = vector.load %arg18[%c0_222, %c0_223, %c0_224] : memref<3x16x128xbf16, #tpu.memory_space<vmem>>, vector<1x16x128xbf16>
    %236 = vector.shape_cast %235 : vector<1x16x128xbf16> to vector<16x128xbf16>
    %cst_225 = arith.constant dense<0.000000e+00> : vector<8x128xf32>
    %237 = tpu.matmul %234, %236, %cst_225 {dimension_numbers = #tpu.dot_dimension_numbers<[1], [0], [0], [1], [0, 0, 1, 1], [], []>} : vector<8x16xbf16>, vector<16x128xbf16>, vector<8x128xf32> -> vector<8x128xf32>
    %c1_226 = arith.constant 1 : index
    %c0_227 = arith.constant 0 : index
    %c0_228 = arith.constant 0 : index
    %238 = vector.load %arg18[%c1_226, %c0_227, %c0_228] : memref<3x16x128xbf16, #tpu.memory_space<vmem>>, vector<1x16x128xbf16>
    %239 = vector.shape_cast %238 : vector<1x16x128xbf16> to vector<16x128xbf16>
    %cst_229 = arith.constant dense<0.000000e+00> : vector<8x128xf32>
    %240 = tpu.matmul %232, %239, %cst_229 {dimension_numbers = #tpu.dot_dimension_numbers<[1], [0], [0], [1], [0, 0, 1, 1], [], []>} : vector<8x16xbf16>, vector<16x128xbf16>, vector<8x128xf32> -> vector<8x128xf32>
    %241 = arith.addf %237, %240 : vector<8x128xf32>
    %c2_230 = arith.constant 2 : index
    %c0_231 = arith.constant 0 : index
    %242 = vector.load %arg38[%c2_230, %c0_231] : memref<10x16xbf16, #tpu.memory_space<vmem>>, vector<8x16xbf16>
    %c2_232 = arith.constant 2 : index
    %c0_233 = arith.constant 0 : index
    %c0_234 = arith.constant 0 : index
    %243 = vector.load %arg18[%c2_232, %c0_233, %c0_234] : memref<3x16x128xbf16, #tpu.memory_space<vmem>>, vector<1x16x128xbf16>
    %244 = vector.shape_cast %243 : vector<1x16x128xbf16> to vector<16x128xbf16>
    %cst_235 = arith.constant dense<0.000000e+00> : vector<8x128xf32>
    %245 = tpu.matmul %242, %244, %cst_235 {dimension_numbers = #tpu.dot_dimension_numbers<[1], [0], [0], [1], [0, 0, 1, 1], [], []>} : vector<8x16xbf16>, vector<16x128xbf16>, vector<8x128xf32> -> vector<8x128xf32>
    %246 = arith.addf %241, %245 : vector<8x128xf32>
    %c0_236 = arith.constant 0 : index
    %c0_237 = arith.constant 0 : index
    %247 = vector.load %arg19[%c0_236, %c0_237] : memref<1x128xf32, #tpu.memory_space<vmem>>, vector<1x128xf32>
    %248 = vector.broadcast %247 : vector<1x128xf32> to vector<8x128xf32>
    %249 = arith.addf %246, %248 : vector<8x128xf32>
    %cst_238 = arith.constant 0.000000e+00 : f32
    %250 = vector.broadcast %cst_238 : f32 to vector<8x128xf32>
    %251 = arith.maximumf %249, %250 : vector<8x128xf32>
    %252 = arith.truncf %251 : vector<8x128xf32> to vector<8x128xbf16>
    %c1_239 = arith.constant 1 : index
    %c0_240 = arith.constant 0 : index
    %253 = vector.load %arg39[%c1_239, %c0_240] : memref<10x128xbf16, #tpu.memory_space<vmem>>, vector<8x128xbf16>
    tpu.vector_store %arg39[%c1_239, %c0_240], %252 {strides = array<i32>} : memref<10x128xbf16, #tpu.memory_space<vmem>>, vector<8x128xbf16>,
    %c0_241 = arith.constant 0 : index
    %c0_242 = arith.constant 0 : index
    %254 = vector.load %arg39[%c0_241, %c0_242] : memref<10x128xbf16, #tpu.memory_space<vmem>>, vector<8x128xbf16>
    %c0_243 = arith.constant 0 : index
    %c0_244 = arith.constant 0 : index
    %c0_245 = arith.constant 0 : index
    %255 = vector.load %arg20[%c0_243, %c0_244, %c0_245] : memref<3x128x128xbf16, #tpu.memory_space<vmem>>, vector<1x128x128xbf16>
    %256 = vector.shape_cast %255 : vector<1x128x128xbf16> to vector<128x128xbf16>
    %cst_246 = arith.constant dense<0.000000e+00> : vector<8x128xf32>
    %257 = tpu.matmul %254, %256, %cst_246 {dimension_numbers = #tpu.dot_dimension_numbers<[1], [0], [0], [1], [0, 0, 1, 1], [], []>} : vector<8x128xbf16>, vector<128x128xbf16>, vector<8x128xf32> -> vector<8x128xf32>
    %c1_247 = arith.constant 1 : index
    %c0_248 = arith.constant 0 : index
    %c0_249 = arith.constant 0 : index
    %258 = vector.load %arg20[%c1_247, %c0_248, %c0_249] : memref<3x128x128xbf16, #tpu.memory_space<vmem>>, vector<1x128x128xbf16>
    %259 = vector.shape_cast %258 : vector<1x128x128xbf16> to vector<128x128xbf16>
    %cst_250 = arith.constant dense<0.000000e+00> : vector<8x128xf32>
    %260 = tpu.matmul %252, %259, %cst_250 {dimension_numbers = #tpu.dot_dimension_numbers<[1], [0], [0], [1], [0, 0, 1, 1], [], []>} : vector<8x128xbf16>, vector<128x128xbf16>, vector<8x128xf32> -> vector<8x128xf32>
    %261 = arith.addf %257, %260 : vector<8x128xf32>
    %c2_251 = arith.constant 2 : index
    %c0_252 = arith.constant 0 : index
    %262 = vector.load %arg39[%c2_251, %c0_252] : memref<10x128xbf16, #tpu.memory_space<vmem>>, vector<8x128xbf16>
    %c2_253 = arith.constant 2 : index
    %c0_254 = arith.constant 0 : index
    %c0_255 = arith.constant 0 : index
    %263 = vector.load %arg20[%c2_253, %c0_254, %c0_255] : memref<3x128x128xbf16, #tpu.memory_space<vmem>>, vector<1x128x128xbf16>
    %264 = vector.shape_cast %263 : vector<1x128x128xbf16> to vector<128x128xbf16>
    %cst_256 = arith.constant dense<0.000000e+00> : vector<8x128xf32>
    %265 = tpu.matmul %262, %264, %cst_256 {dimension_numbers = #tpu.dot_dimension_numbers<[1], [0], [0], [1], [0, 0, 1, 1], [], []>} : vector<8x128xbf16>, vector<128x128xbf16>, vector<8x128xf32> -> vector<8x128xf32>
    %266 = arith.addf %261, %265 : vector<8x128xf32>
    %c0_257 = arith.constant 0 : index
    %c0_258 = arith.constant 0 : index
    %267 = vector.load %arg21[%c0_257, %c0_258] : memref<1x128xf32, #tpu.memory_space<vmem>>, vector<1x128xf32>
    %268 = vector.broadcast %267 : vector<1x128xf32> to vector<8x128xf32>
    %269 = arith.addf %266, %268 : vector<8x128xf32>
    %cst_259 = arith.constant 0.000000e+00 : f32
    %270 = vector.broadcast %cst_259 : f32 to vector<8x128xf32>
    %271 = arith.maximumf %269, %270 : vector<8x128xf32>
    %272 = arith.addf %271, %251 : vector<8x128xf32>
    %273 = arith.truncf %272 : vector<8x128xf32> to vector<8x128xbf16>
    %c1_260 = arith.constant 1 : index
    %c0_261 = arith.constant 0 : index
    %274 = vector.load %arg39[%c1_260, %c0_261] : memref<10x128xbf16, #tpu.memory_space<vmem>>, vector<8x128xbf16>
    tpu.vector_store %arg39[%c1_260, %c0_261], %273 {strides = array<i32>} : memref<10x128xbf16, #tpu.memory_space<vmem>>, vector<8x128xbf16>,
    %c1_262 = arith.constant 1 : index
    %c0_263 = arith.constant 0 : index
    %c0_264 = arith.constant 0 : index
    %275 = vector.load %arg22[%c1_262, %c0_263, %c0_264] : memref<3x128x128xbf16, #tpu.memory_space<vmem>>, vector<1x128x128xbf16>
    %276 = vector.shape_cast %275 : vector<1x128x128xbf16> to vector<128x128xbf16>
    %cst_265 = arith.constant dense<0.000000e+00> : vector<8x128xf32>
    %277 = tpu.matmul %273, %276, %cst_265 {dimension_numbers = #tpu.dot_dimension_numbers<[1], [0], [0], [1], [0, 0, 1, 1], [], []>} : vector<8x128xbf16>, vector<128x128xbf16>, vector<8x128xf32> -> vector<8x128xf32>
    %c0_266 = arith.constant 0 : index
    %c0_267 = arith.constant 0 : index
    %278 = vector.load %arg23[%c0_266, %c0_267] : memref<1x128xf32, #tpu.memory_space<vmem>>, vector<1x128xf32>
    %279 = vector.broadcast %278 : vector<1x128xf32> to vector<8x128xf32>
    %280 = arith.addf %277, %279 : vector<8x128xf32>
    %c2_268 = arith.constant 2 : index
    %c0_269 = arith.constant 0 : index
    %c0_270 = arith.constant 0 : index
    %281 = vector.load %arg22[%c2_268, %c0_269, %c0_270] : memref<3x128x128xbf16, #tpu.memory_space<vmem>>, vector<1x128x128xbf16>
    %282 = vector.shape_cast %281 : vector<1x128x128xbf16> to vector<128x128xbf16>
    %cst_271 = arith.constant dense<0.000000e+00> : vector<8x128xf32>
    %283 = tpu.matmul %273, %282, %cst_271 {dimension_numbers = #tpu.dot_dimension_numbers<[1], [0], [0], [1], [0, 0, 1, 1], [], []>} : vector<8x128xbf16>, vector<128x128xbf16>, vector<8x128xf32> -> vector<8x128xf32>
    %c2_272 = arith.constant 2 : index
    %c0_273 = arith.constant 0 : index
    %284 = vector.load %arg39[%c2_272, %c0_273] : memref<10x128xbf16, #tpu.memory_space<vmem>>, vector<8x128xbf16>
    %c0_274 = arith.constant 0 : index
    %c0_275 = arith.constant 0 : index
    %c0_276 = arith.constant 0 : index
    %285 = vector.load %arg22[%c0_274, %c0_275, %c0_276] : memref<3x128x128xbf16, #tpu.memory_space<vmem>>, vector<1x128x128xbf16>
    %286 = vector.shape_cast %285 : vector<1x128x128xbf16> to vector<128x128xbf16>
    %cst_277 = arith.constant dense<0.000000e+00> : vector<8x128xf32>
    %287 = tpu.matmul %284, %286, %cst_277 {dimension_numbers = #tpu.dot_dimension_numbers<[1], [0], [0], [1], [0, 0, 1, 1], [], []>} : vector<8x128xbf16>, vector<128x128xbf16>, vector<8x128xf32> -> vector<8x128xf32>
    %288 = arith.addf %283, %287 : vector<8x128xf32>
    %c0_278 = arith.constant 0 : index
    %c0_279 = arith.constant 0 : index
    %289 = vector.load %arg23[%c0_278, %c0_279] : memref<1x128xf32, #tpu.memory_space<vmem>>, vector<1x128xf32>
    %290 = vector.broadcast %289 : vector<1x128xf32> to vector<8x128xf32>
    %291 = arith.addf %288, %290 : vector<8x128xf32>
    %cst_280 = arith.constant 0.000000e+00 : f32
    %292 = vector.broadcast %cst_280 : f32 to vector<8x128xf32>
    %293 = arith.maximumf %280, %292 : vector<8x128xf32>
    %cst_281 = arith.constant 0.000000e+00 : f32
    %294 = vector.broadcast %cst_281 : f32 to vector<8x128xf32>
    %295 = arith.maximumf %291, %294 : vector<8x128xf32>
    %296 = arith.truncf %293 : vector<8x128xf32> to vector<8x128xbf16>
    %297 = arith.truncf %295 : vector<8x128xf32> to vector<8x128xbf16>
    %c1_282 = arith.constant 1 : index
    %c0_283 = arith.constant 0 : index
    %298 = vector.load %arg39[%c1_282, %c0_283] : memref<10x128xbf16, #tpu.memory_space<vmem>>, vector<8x128xbf16>
    tpu.vector_store %arg39[%c1_282, %c0_283], %296 {strides = array<i32>} : memref<10x128xbf16, #tpu.memory_space<vmem>>, vector<8x128xbf16>,
    %c1_284 = arith.constant 1 : index
    %c0_285 = arith.constant 0 : index
    %299 = vector.load %arg40[%c1_284, %c0_285] : memref<10x128xbf16, #tpu.memory_space<vmem>>, vector<8x128xbf16>
    tpu.vector_store %arg40[%c1_284, %c0_285], %297 {strides = array<i32>} : memref<10x128xbf16, #tpu.memory_space<vmem>>, vector<8x128xbf16>,
    %c0_286 = arith.constant 0 : index
    %c0_287 = arith.constant 0 : index
    %300 = vector.load %arg40[%c0_286, %c0_287] : memref<10x128xbf16, #tpu.memory_space<vmem>>, vector<8x128xbf16>
    %c0_288 = arith.constant 0 : index
    %c0_289 = arith.constant 0 : index
    %c0_290 = arith.constant 0 : index
    %301 = vector.load %arg24[%c0_288, %c0_289, %c0_290] : memref<3x128x128xbf16, #tpu.memory_space<vmem>>, vector<1x128x128xbf16>
    %302 = vector.shape_cast %301 : vector<1x128x128xbf16> to vector<128x128xbf16>
    %cst_291 = arith.constant dense<0.000000e+00> : vector<8x128xf32>
    %303 = tpu.matmul %300, %302, %cst_291 {dimension_numbers = #tpu.dot_dimension_numbers<[1], [0], [0], [1], [0, 0, 1, 1], [], []>} : vector<8x128xbf16>, vector<128x128xbf16>, vector<8x128xf32> -> vector<8x128xf32>
    %c1_292 = arith.constant 1 : index
    %c0_293 = arith.constant 0 : index
    %c0_294 = arith.constant 0 : index
    %304 = vector.load %arg24[%c1_292, %c0_293, %c0_294] : memref<3x128x128xbf16, #tpu.memory_space<vmem>>, vector<1x128x128xbf16>
    %305 = vector.shape_cast %304 : vector<1x128x128xbf16> to vector<128x128xbf16>
    %cst_295 = arith.constant dense<0.000000e+00> : vector<8x128xf32>
    %306 = tpu.matmul %296, %305, %cst_295 {dimension_numbers = #tpu.dot_dimension_numbers<[1], [0], [0], [1], [0, 0, 1, 1], [], []>} : vector<8x128xbf16>, vector<128x128xbf16>, vector<8x128xf32> -> vector<8x128xf32>
    %307 = arith.addf %303, %306 : vector<8x128xf32>
    %c2_296 = arith.constant 2 : index
    %c0_297 = arith.constant 0 : index
    %c0_298 = arith.constant 0 : index
    %308 = vector.load %arg24[%c2_296, %c0_297, %c0_298] : memref<3x128x128xbf16, #tpu.memory_space<vmem>>, vector<1x128x128xbf16>
    %309 = vector.shape_cast %308 : vector<1x128x128xbf16> to vector<128x128xbf16>
    %cst_299 = arith.constant dense<0.000000e+00> : vector<8x128xf32>
    %310 = tpu.matmul %297, %309, %cst_299 {dimension_numbers = #tpu.dot_dimension_numbers<[1], [0], [0], [1], [0, 0, 1, 1], [], []>} : vector<8x128xbf16>, vector<128x128xbf16>, vector<8x128xf32> -> vector<8x128xf32>
    %311 = arith.addf %307, %310 : vector<8x128xf32>
    %c0_300 = arith.constant 0 : index
    %c0_301 = arith.constant 0 : index
    %c0_302 = arith.constant 0 : index
    %312 = vector.load %arg24[%c0_300, %c0_301, %c0_302] : memref<3x128x128xbf16, #tpu.memory_space<vmem>>, vector<1x128x128xbf16>
    %313 = vector.shape_cast %312 : vector<1x128x128xbf16> to vector<128x128xbf16>
    %cst_303 = arith.constant dense<0.000000e+00> : vector<8x128xf32>
    %314 = tpu.matmul %296, %313, %cst_303 {dimension_numbers = #tpu.dot_dimension_numbers<[1], [0], [0], [1], [0, 0, 1, 1], [], []>} : vector<8x128xbf16>, vector<128x128xbf16>, vector<8x128xf32> -> vector<8x128xf32>
    %c1_304 = arith.constant 1 : index
    %c0_305 = arith.constant 0 : index
    %c0_306 = arith.constant 0 : index
    %315 = vector.load %arg24[%c1_304, %c0_305, %c0_306] : memref<3x128x128xbf16, #tpu.memory_space<vmem>>, vector<1x128x128xbf16>
    %316 = vector.shape_cast %315 : vector<1x128x128xbf16> to vector<128x128xbf16>
    %cst_307 = arith.constant dense<0.000000e+00> : vector<8x128xf32>
    %317 = tpu.matmul %297, %316, %cst_307 {dimension_numbers = #tpu.dot_dimension_numbers<[1], [0], [0], [1], [0, 0, 1, 1], [], []>} : vector<8x128xbf16>, vector<128x128xbf16>, vector<8x128xf32> -> vector<8x128xf32>
    %318 = arith.addf %314, %317 : vector<8x128xf32>
    %c2_308 = arith.constant 2 : index
    %c0_309 = arith.constant 0 : index
    %319 = vector.load %arg39[%c2_308, %c0_309] : memref<10x128xbf16, #tpu.memory_space<vmem>>, vector<8x128xbf16>
    %c2_310 = arith.constant 2 : index
    %c0_311 = arith.constant 0 : index
    %c0_312 = arith.constant 0 : index
    %320 = vector.load %arg24[%c2_310, %c0_311, %c0_312] : memref<3x128x128xbf16, #tpu.memory_space<vmem>>, vector<1x128x128xbf16>
    %321 = vector.shape_cast %320 : vector<1x128x128xbf16> to vector<128x128xbf16>
    %cst_313 = arith.constant dense<0.000000e+00> : vector<8x128xf32>
    %322 = tpu.matmul %319, %321, %cst_313 {dimension_numbers = #tpu.dot_dimension_numbers<[1], [0], [0], [1], [0, 0, 1, 1], [], []>} : vector<8x128xbf16>, vector<128x128xbf16>, vector<8x128xf32> -> vector<8x128xf32>
    %323 = arith.addf %318, %322 : vector<8x128xf32>
    %c0_314 = arith.constant 0 : index
    %c0_315 = arith.constant 0 : index
    %324 = vector.load %arg25[%c0_314, %c0_315] : memref<1x128xf32, #tpu.memory_space<vmem>>, vector<1x128xf32>
    %325 = vector.broadcast %324 : vector<1x128xf32> to vector<8x128xf32>
    %326 = arith.addf %311, %325 : vector<8x128xf32>
    %c0_316 = arith.constant 0 : index
    %c0_317 = arith.constant 0 : index
    %327 = vector.load %arg25[%c0_316, %c0_317] : memref<1x128xf32, #tpu.memory_space<vmem>>, vector<1x128xf32>
    %328 = vector.broadcast %327 : vector<1x128xf32> to vector<8x128xf32>
    %329 = arith.addf %323, %328 : vector<8x128xf32>
    %cst_318 = arith.constant 0.000000e+00 : f32
    %330 = vector.broadcast %cst_318 : f32 to vector<8x128xf32>
    %331 = arith.maximumf %326, %330 : vector<8x128xf32>
    %332 = arith.addf %331, %293 : vector<8x128xf32>
    %cst_319 = arith.constant 0.000000e+00 : f32
    %333 = vector.broadcast %cst_319 : f32 to vector<8x128xf32>
    %334 = arith.maximumf %329, %333 : vector<8x128xf32>
    %335 = arith.addf %334, %295 : vector<8x128xf32>
    %336 = arith.truncf %332 : vector<8x128xf32> to vector<8x128xbf16>
    %337 = arith.truncf %335 : vector<8x128xf32> to vector<8x128xbf16>
    %c1_320 = arith.constant 1 : index
    %c0_321 = arith.constant 0 : index
    %338 = vector.load %arg39[%c1_320, %c0_321] : memref<10x128xbf16, #tpu.memory_space<vmem>>, vector<8x128xbf16>
    tpu.vector_store %arg39[%c1_320, %c0_321], %336 {strides = array<i32>} : memref<10x128xbf16, #tpu.memory_space<vmem>>, vector<8x128xbf16>,
    %c1_322 = arith.constant 1 : index
    %c0_323 = arith.constant 0 : index
    %339 = vector.load %arg40[%c1_322, %c0_323] : memref<10x128xbf16, #tpu.memory_space<vmem>>, vector<8x128xbf16>
    tpu.vector_store %arg40[%c1_322, %c0_323], %337 {strides = array<i32>} : memref<10x128xbf16, #tpu.memory_space<vmem>>, vector<8x128xbf16>,
    %c0_324 = arith.constant 0 : index
    %c0_325 = arith.constant 0 : index
    %340 = vector.load %arg40[%c0_324, %c0_325] : memref<10x128xbf16, #tpu.memory_space<vmem>>, vector<8x128xbf16>
    %c0_326 = arith.constant 0 : index
    %c0_327 = arith.constant 0 : index
    %c0_328 = arith.constant 0 : index
    %341 = vector.load %arg26[%c0_326, %c0_327, %c0_328] : memref<3x128x128xbf16, #tpu.memory_space<vmem>>, vector<1x128x128xbf16>
    %342 = vector.shape_cast %341 : vector<1x128x128xbf16> to vector<128x128xbf16>
    %cst_329 = arith.constant dense<0.000000e+00> : vector<8x128xf32>
    %343 = tpu.matmul %340, %342, %cst_329 {dimension_numbers = #tpu.dot_dimension_numbers<[1], [0], [0], [1], [0, 0, 1, 1], [], []>} : vector<8x128xbf16>, vector<128x128xbf16>, vector<8x128xf32> -> vector<8x128xf32>
    %c1_330 = arith.constant 1 : index
    %c0_331 = arith.constant 0 : index
    %c0_332 = arith.constant 0 : index
    %344 = vector.load %arg26[%c1_330, %c0_331, %c0_332] : memref<3x128x128xbf16, #tpu.memory_space<vmem>>, vector<1x128x128xbf16>
    %345 = vector.shape_cast %344 : vector<1x128x128xbf16> to vector<128x128xbf16>
    %cst_333 = arith.constant dense<0.000000e+00> : vector<8x128xf32>
    %346 = tpu.matmul %336, %345, %cst_333 {dimension_numbers = #tpu.dot_dimension_numbers<[1], [0], [0], [1], [0, 0, 1, 1], [], []>} : vector<8x128xbf16>, vector<128x128xbf16>, vector<8x128xf32> -> vector<8x128xf32>
    %347 = arith.addf %343, %346 : vector<8x128xf32>
    %c2_334 = arith.constant 2 : index
    %c0_335 = arith.constant 0 : index
    %c0_336 = arith.constant 0 : index
    %348 = vector.load %arg26[%c2_334, %c0_335, %c0_336] : memref<3x128x128xbf16, #tpu.memory_space<vmem>>, vector<1x128x128xbf16>
    %349 = vector.shape_cast %348 : vector<1x128x128xbf16> to vector<128x128xbf16>
    %cst_337 = arith.constant dense<0.000000e+00> : vector<8x128xf32>
    %350 = tpu.matmul %337, %349, %cst_337 {dimension_numbers = #tpu.dot_dimension_numbers<[1], [0], [0], [1], [0, 0, 1, 1], [], []>} : vector<8x128xbf16>, vector<128x128xbf16>, vector<8x128xf32> -> vector<8x128xf32>
    %351 = arith.addf %347, %350 : vector<8x128xf32>
    %c0_338 = arith.constant 0 : index
    %c0_339 = arith.constant 0 : index
    %c0_340 = arith.constant 0 : index
    %352 = vector.load %arg26[%c0_338, %c0_339, %c0_340] : memref<3x128x128xbf16, #tpu.memory_space<vmem>>, vector<1x128x128xbf16>
    %353 = vector.shape_cast %352 : vector<1x128x128xbf16> to vector<128x128xbf16>
    %cst_341 = arith.constant dense<0.000000e+00> : vector<8x128xf32>
    %354 = tpu.matmul %336, %353, %cst_341 {dimension_numbers = #tpu.dot_dimension_numbers<[1], [0], [0], [1], [0, 0, 1, 1], [], []>} : vector<8x128xbf16>, vector<128x128xbf16>, vector<8x128xf32> -> vector<8x128xf32>
    %c1_342 = arith.constant 1 : index
    %c0_343 = arith.constant 0 : index
    %c0_344 = arith.constant 0 : index
    %355 = vector.load %arg26[%c1_342, %c0_343, %c0_344] : memref<3x128x128xbf16, #tpu.memory_space<vmem>>, vector<1x128x128xbf16>
    %356 = vector.shape_cast %355 : vector<1x128x128xbf16> to vector<128x128xbf16>
    %cst_345 = arith.constant dense<0.000000e+00> : vector<8x128xf32>
    %357 = tpu.matmul %337, %356, %cst_345 {dimension_numbers = #tpu.dot_dimension_numbers<[1], [0], [0], [1], [0, 0, 1, 1], [], []>} : vector<8x128xbf16>, vector<128x128xbf16>, vector<8x128xf32> -> vector<8x128xf32>
    %358 = arith.addf %354, %357 : vector<8x128xf32>
    %c2_346 = arith.constant 2 : index
    %c0_347 = arith.constant 0 : index
    %359 = vector.load %arg39[%c2_346, %c0_347] : memref<10x128xbf16, #tpu.memory_space<vmem>>, vector<8x128xbf16>
    %c2_348 = arith.constant 2 : index
    %c0_349 = arith.constant 0 : index
    %c0_350 = arith.constant 0 : index
    %360 = vector.load %arg26[%c2_348, %c0_349, %c0_350] : memref<3x128x128xbf16, #tpu.memory_space<vmem>>, vector<1x128x128xbf16>
    %361 = vector.shape_cast %360 : vector<1x128x128xbf16> to vector<128x128xbf16>
    %cst_351 = arith.constant dense<0.000000e+00> : vector<8x128xf32>
    %362 = tpu.matmul %359, %361, %cst_351 {dimension_numbers = #tpu.dot_dimension_numbers<[1], [0], [0], [1], [0, 0, 1, 1], [], []>} : vector<8x128xbf16>, vector<128x128xbf16>, vector<8x128xf32> -> vector<8x128xf32>
    %363 = arith.addf %358, %362 : vector<8x128xf32>
    %c0_352 = arith.constant 0 : index
    %c0_353 = arith.constant 0 : index
    %364 = vector.load %arg27[%c0_352, %c0_353] : memref<1x128xf32, #tpu.memory_space<vmem>>, vector<1x128xf32>
    %365 = vector.broadcast %364 : vector<1x128xf32> to vector<8x128xf32>
    %366 = arith.addf %351, %365 : vector<8x128xf32>
    %c0_354 = arith.constant 0 : index
    %c0_355 = arith.constant 0 : index
    %367 = vector.load %arg27[%c0_354, %c0_355] : memref<1x128xf32, #tpu.memory_space<vmem>>, vector<1x128xf32>
    %368 = vector.broadcast %367 : vector<1x128xf32> to vector<8x128xf32>
    %369 = arith.addf %363, %368 : vector<8x128xf32>
    %cst_356 = arith.constant 0.000000e+00 : f32
    %370 = vector.broadcast %cst_356 : f32 to vector<8x128xf32>
    %371 = arith.maximumf %366, %370 : vector<8x128xf32>
    %372 = arith.addf %371, %332 : vector<8x128xf32>
    %cst_357 = arith.constant 0.000000e+00 : f32
    %373 = vector.broadcast %cst_357 : f32 to vector<8x128xf32>
    %374 = arith.maximumf %369, %373 : vector<8x128xf32>
    %375 = arith.addf %374, %335 : vector<8x128xf32>
    %376 = tpu.concatenate %372, %375 in 0 : vector<8x128xf32>, vector<8x128xf32> -> vector<16x128xf32>
    %377 = arith.truncf %376 : vector<16x128xf32> to vector<16x128xbf16>
    %c0_358 = arith.constant 0 : index
    %c0_359 = arith.constant 0 : index
    %c0_360 = arith.constant 0 : index
    %378 = vector.load %arg28[%c0_358, %c0_359, %c0_360] : memref<4x128x128xbf16, #tpu.memory_space<vmem>>, vector<1x128x128xbf16>
    %379 = vector.shape_cast %378 : vector<1x128x128xbf16> to vector<128x128xbf16>
    %cst_361 = arith.constant dense<0.000000e+00> : vector<16x128xf32>
    %380 = tpu.matmul %377, %379, %cst_361 {dimension_numbers = #tpu.dot_dimension_numbers<[1], [0], [0], [1], [0, 0, 1, 1], [], []>} : vector<16x128xbf16>, vector<128x128xbf16>, vector<16x128xf32> -> vector<16x128xf32>
    %c0_362 = arith.constant 0 : index
    %c0_363 = arith.constant 0 : index
    %c0_364 = arith.constant 0 : index
    %381 = vector.load %arg29[%c0_362, %c0_363, %c0_364] : memref<4x1x128xf32, #tpu.memory_space<vmem>>, vector<1x1x128xf32>
    %382 = vector.shape_cast %381 : vector<1x1x128xf32> to vector<1x128xf32>
    %383 = vector.broadcast %382 : vector<1x128xf32> to vector<16x128xf32>
    %384 = arith.addf %380, %383 : vector<16x128xf32>
    %cst_365 = arith.constant 0.000000e+00 : f32
    %385 = vector.broadcast %cst_365 : f32 to vector<16x128xf32>
    %386 = arith.maximumf %384, %385 : vector<16x128xf32>
    %387 = arith.addf %386, %376 : vector<16x128xf32>
    %388 = arith.truncf %387 : vector<16x128xf32> to vector<16x128xbf16>
    %c1_366 = arith.constant 1 : index
    %c0_367 = arith.constant 0 : index
    %c0_368 = arith.constant 0 : index
    %389 = vector.load %arg28[%c1_366, %c0_367, %c0_368] : memref<4x128x128xbf16, #tpu.memory_space<vmem>>, vector<1x128x128xbf16>
    %390 = vector.shape_cast %389 : vector<1x128x128xbf16> to vector<128x128xbf16>
    %cst_369 = arith.constant dense<0.000000e+00> : vector<16x128xf32>
    %391 = tpu.matmul %388, %390, %cst_369 {dimension_numbers = #tpu.dot_dimension_numbers<[1], [0], [0], [1], [0, 0, 1, 1], [], []>} : vector<16x128xbf16>, vector<128x128xbf16>, vector<16x128xf32> -> vector<16x128xf32>
    %c1_370 = arith.constant 1 : index
    %c0_371 = arith.constant 0 : index
    %c0_372 = arith.constant 0 : index
    %392 = vector.load %arg29[%c1_370, %c0_371, %c0_372] : memref<4x1x128xf32, #tpu.memory_space<vmem>>, vector<1x1x128xf32>
    %393 = vector.shape_cast %392 : vector<1x1x128xf32> to vector<1x128xf32>
    %394 = vector.broadcast %393 : vector<1x128xf32> to vector<16x128xf32>
    %395 = arith.addf %391, %394 : vector<16x128xf32>
    %cst_373 = arith.constant 0.000000e+00 : f32
    %396 = vector.broadcast %cst_373 : f32 to vector<16x128xf32>
    %397 = arith.maximumf %395, %396 : vector<16x128xf32>
    %398 = arith.addf %397, %387 : vector<16x128xf32>
    %399 = arith.truncf %398 : vector<16x128xf32> to vector<16x128xbf16>
    %c2_374 = arith.constant 2 : index
    %c0_375 = arith.constant 0 : index
    %c0_376 = arith.constant 0 : index
    %400 = vector.load %arg28[%c2_374, %c0_375, %c0_376] : memref<4x128x128xbf16, #tpu.memory_space<vmem>>, vector<1x128x128xbf16>
    %401 = vector.shape_cast %400 : vector<1x128x128xbf16> to vector<128x128xbf16>
    %cst_377 = arith.constant dense<0.000000e+00> : vector<16x128xf32>
    %402 = tpu.matmul %399, %401, %cst_377 {dimension_numbers = #tpu.dot_dimension_numbers<[1], [0], [0], [1], [0, 0, 1, 1], [], []>} : vector<16x128xbf16>, vector<128x128xbf16>, vector<16x128xf32> -> vector<16x128xf32>
    %c2_378 = arith.constant 2 : index
    %c0_379 = arith.constant 0 : index
    %c0_380 = arith.constant 0 : index
    %403 = vector.load %arg29[%c2_378, %c0_379, %c0_380] : memref<4x1x128xf32, #tpu.memory_space<vmem>>, vector<1x1x128xf32>
    %404 = vector.shape_cast %403 : vector<1x1x128xf32> to vector<1x128xf32>
    %405 = vector.broadcast %404 : vector<1x128xf32> to vector<16x128xf32>
    %406 = arith.addf %402, %405 : vector<16x128xf32>
    %cst_381 = arith.constant 0.000000e+00 : f32
    %407 = vector.broadcast %cst_381 : f32 to vector<16x128xf32>
    %408 = arith.maximumf %406, %407 : vector<16x128xf32>
    %409 = arith.addf %408, %398 : vector<16x128xf32>
    %410 = arith.truncf %409 : vector<16x128xf32> to vector<16x128xbf16>
    %c3_382 = arith.constant 3 : index
    %c0_383 = arith.constant 0 : index
    %c0_384 = arith.constant 0 : index
    %411 = vector.load %arg28[%c3_382, %c0_383, %c0_384] : memref<4x128x128xbf16, #tpu.memory_space<vmem>>, vector<1x128x128xbf16>
    %412 = vector.shape_cast %411 : vector<1x128x128xbf16> to vector<128x128xbf16>
    %cst_385 = arith.constant dense<0.000000e+00> : vector<16x128xf32>
    %413 = tpu.matmul %410, %412, %cst_385 {dimension_numbers = #tpu.dot_dimension_numbers<[1], [0], [0], [1], [0, 0, 1, 1], [], []>} : vector<16x128xbf16>, vector<128x128xbf16>, vector<16x128xf32> -> vector<16x128xf32>
    %c3_386 = arith.constant 3 : index
    %c0_387 = arith.constant 0 : index
    %c0_388 = arith.constant 0 : index
    %414 = vector.load %arg29[%c3_386, %c0_387, %c0_388] : memref<4x1x128xf32, #tpu.memory_space<vmem>>, vector<1x1x128xf32>
    %415 = vector.shape_cast %414 : vector<1x1x128xf32> to vector<1x128xf32>
    %416 = vector.broadcast %415 : vector<1x128xf32> to vector<16x128xf32>
    %417 = arith.addf %413, %416 : vector<16x128xf32>
    %cst_389 = arith.constant 0.000000e+00 : f32
    %418 = vector.broadcast %cst_389 : f32 to vector<16x128xf32>
    %419 = arith.maximumf %417, %418 : vector<16x128xf32>
    %420 = arith.addf %419, %409 : vector<16x128xf32>
    %421 = arith.truncf %420 : vector<16x128xf32> to vector<16x128xbf16>
    %c0_390 = arith.constant 0 : index
    %c0_391 = arith.constant 0 : index
    %422 = vector.load %arg30[%c0_390, %c0_391] : memref<128x48xbf16, #tpu.memory_space<vmem>>, vector<128x48xbf16>
    %cst_392 = arith.constant dense<0.000000e+00> : vector<16x48xf32>
    %423 = tpu.matmul %421, %422, %cst_392 {dimension_numbers = #tpu.dot_dimension_numbers<[1], [0], [0], [1], [0, 0, 1, 1], [], []>} : vector<16x128xbf16>, vector<128x48xbf16>, vector<16x48xf32> -> vector<16x48xf32>
    %c0_393 = arith.constant 0 : index
    %c0_394 = arith.constant 0 : index
    %424 = vector.load %arg31[%c0_393, %c0_394] : memref<1x48xf32, #tpu.memory_space<vmem>>, vector<1x48xf32>
    %425 = vector.broadcast %424 : vector<1x48xf32> to vector<16x48xf32>
    %426 = arith.addf %423, %425 : vector<16x48xf32>
    %427 = tpu.iota {dimensions = array<i32: 1>} : vector<16x48xi32>
    %c24_i32 = arith.constant 24 : i32
    %428 = vector.broadcast %c24_i32 : i32 to vector<16x48xi32>
    %429 = arith.cmpi slt, %427, %428 : vector<16x48xi32>
    %cst_395 = arith.constant -5.000000e+00 : f32
    %cst_396 = arith.constant 5.000000e+00 : f32
    %430 = vector.broadcast %cst_395 : f32 to vector<16x48xf32>
    %431 = arith.maximumf %430, %426 : vector<16x48xf32>
    %432 = vector.broadcast %cst_396 : f32 to vector<16x48xf32>
    %433 = arith.minimumf %432, %431 : vector<16x48xf32>
    %434 = arith.select %429, %426, %433 : vector<16x48xi1>, vector<16x48xf32>
    %435 = vector.extract_strided_slice %434 {offsets = [0, 0], sizes = [8, 48], strides = [1, 1]} : vector<16x48xf32> to vector<8x48xf32>
    %436 = vector.extract_strided_slice %434 {offsets = [8, 0], sizes = [8, 48], strides = [1, 1]} : vector<16x48xf32> to vector<8x48xf32>
    %437 = tpu.concatenate %435, %436 in 1 : vector<8x48xf32>, vector<8x48xf32> -> vector<8x96xf32>
    %c0_397 = arith.constant 0 : index
    %c0_398 = arith.constant 0 : index
    %c0_399 = arith.constant 0 : index
    %438 = vector.load %arg33[%c0_397, %c0_398, %c0_399] : memref<1x8x96xf32, #tpu.memory_space<vmem>>, vector<1x8x96xf32>
    %439 = vector.shape_cast %438 : vector<1x8x96xf32> to vector<8x96xf32>
    %440 = vector.shape_cast %437 : vector<8x96xf32> to vector<1x8x96xf32>
    tpu.vector_store %arg33[%c0_397, %c0_398, %c0_399], %440 {strides = array<i32>} : memref<1x8x96xf32, #tpu.memory_space<vmem>>, vector<1x8x96xf32>,
    return
  }
  func.func @transform_0(%arg0: i32) -> (i32, i32, i32) {
    %c0_i32 = arith.constant 0 : i32
    %c0_i32_0 = arith.constant 0 : i32
    %c0_i32_1 = arith.constant 0 : i32
    return %arg0, %c0_i32, %c0_i32_0 : i32, i32, i32
  }
  func.func @transform_1(%arg0: i32) -> (i32, i32, i32) {
    %c0_i32 = arith.constant 0 : i32
    %c0_i32_0 = arith.constant 0 : i32
    %c0_i32_1 = arith.constant 0 : i32
    return %arg0, %c0_i32, %c0_i32_0 : i32, i32, i32
  }
  func.func @transform_2(%arg0: i32) -> (i32, i32, i32) {
    %c0_i32 = arith.constant 0 : i32
    %c0_i32_0 = arith.constant 0 : i32
    %c0_i32_1 = arith.constant 0 : i32
    return %arg0, %c0_i32, %c0_i32_0 : i32, i32, i32
  }
  func.func @transform_3(%arg0: i32) -> (i32, i32, i32) {
    %c0_i32 = arith.constant 0 : i32
    %c0_i32_0 = arith.constant 0 : i32
    %c0_i32_1 = arith.constant 0 : i32
    %c0_i32_2 = arith.constant 0 : i32
    return %c0_i32, %c0_i32_0, %c0_i32_1 : i32, i32, i32
  }
  func.func @transform_4(%arg0: i32) -> (i32, i32) {
    %c0_i32 = arith.constant 0 : i32
    %c0_i32_0 = arith.constant 0 : i32
    %c0_i32_1 = arith.constant 0 : i32
    return %c0_i32, %c0_i32_0 : i32, i32
  }
  func.func @transform_5(%arg0: i32) -> (i32, i32, i32) {
    %c0_i32 = arith.constant 0 : i32
    %c0_i32_0 = arith.constant 0 : i32
    %c0_i32_1 = arith.constant 0 : i32
    %c0_i32_2 = arith.constant 0 : i32
    return %c0_i32, %c0_i32_0, %c0_i32_1 : i32, i32, i32
  }
  func.func @transform_6(%arg0: i32) -> (i32, i32) {
    %c0_i32 = arith.constant 0 : i32
    %c0_i32_0 = arith.constant 0 : i32
    %c0_i32_1 = arith.constant 0 : i32
    return %c0_i32, %c0_i32_0 : i32, i32
  }
  func.func @transform_7(%arg0: i32) -> (i32, i32, i32) {
    %c0_i32 = arith.constant 0 : i32
    %c0_i32_0 = arith.constant 0 : i32
    %c0_i32_1 = arith.constant 0 : i32
    %c0_i32_2 = arith.constant 0 : i32
    return %c0_i32, %c0_i32_0, %c0_i32_1 : i32, i32, i32
  }
  func.func @transform_8(%arg0: i32) -> (i32, i32) {
    %c0_i32 = arith.constant 0 : i32
    %c0_i32_0 = arith.constant 0 : i32
    %c0_i32_1 = arith.constant 0 : i32
    return %c0_i32, %c0_i32_0 : i32, i32
  }
  func.func @transform_9(%arg0: i32) -> (i32, i32, i32) {
    %c0_i32 = arith.constant 0 : i32
    %c0_i32_0 = arith.constant 0 : i32
    %c0_i32_1 = arith.constant 0 : i32
    %c0_i32_2 = arith.constant 0 : i32
    return %c0_i32, %c0_i32_0, %c0_i32_1 : i32, i32, i32
  }
  func.func @transform_10(%arg0: i32) -> (i32, i32) {
    %c0_i32 = arith.constant 0 : i32
    %c0_i32_0 = arith.constant 0 : i32
    %c0_i32_1 = arith.constant 0 : i32
    return %c0_i32, %c0_i32_0 : i32, i32
  }
  func.func @transform_11(%arg0: i32) -> (i32, i32, i32) {
    %c0_i32 = arith.constant 0 : i32
    %c0_i32_0 = arith.constant 0 : i32
    %c0_i32_1 = arith.constant 0 : i32
    %c0_i32_2 = arith.constant 0 : i32
    return %c0_i32, %c0_i32_0, %c0_i32_1 : i32, i32, i32
  }
  func.func @transform_12(%arg0: i32) -> (i32, i32) {
    %c0_i32 = arith.constant 0 : i32
    %c0_i32_0 = arith.constant 0 : i32
    %c0_i32_1 = arith.constant 0 : i32
    return %c0_i32, %c0_i32_0 : i32, i32
  }
  func.func @transform_13(%arg0: i32) -> (i32, i32, i32) {
    %c0_i32 = arith.constant 0 : i32
    %c0_i32_0 = arith.constant 0 : i32
    %c0_i32_1 = arith.constant 0 : i32
    %c0_i32_2 = arith.constant 0 : i32
    return %c0_i32, %c0_i32_0, %c0_i32_1 : i32, i32, i32
  }
  func.func @transform_14(%arg0: i32) -> (i32, i32, i32) {
    %c0_i32 = arith.constant 0 : i32
    %c0_i32_0 = arith.constant 0 : i32
    %c0_i32_1 = arith.constant 0 : i32
    %c0_i32_2 = arith.constant 0 : i32
    return %c0_i32, %c0_i32_0, %c0_i32_1 : i32, i32, i32
  }
  func.func @transform_15(%arg0: i32) -> (i32, i32) {
    %c0_i32 = arith.constant 0 : i32
    %c0_i32_0 = arith.constant 0 : i32
    %c0_i32_1 = arith.constant 0 : i32
    return %c0_i32, %c0_i32_0 : i32, i32
  }
  func.func @transform_16(%arg0: i32) -> (i32, i32) {
    %c0_i32 = arith.constant 0 : i32
    %c0_i32_0 = arith.constant 0 : i32
    %c0_i32_1 = arith.constant 0 : i32
    return %c0_i32, %c0_i32_0 : i32, i32
  }
  func.func @transform_17(%arg0: i32) -> (i32, i32, i32) {
    %c0_i32 = arith.constant 0 : i32
    %c0_i32_0 = arith.constant 0 : i32
    %c0_i32_1 = arith.constant 0 : i32
    %c0_i32_2 = arith.constant 0 : i32
    return %c0_i32, %c0_i32_0, %c0_i32_1 : i32, i32, i32
  }
  func.func @transform_18(%arg0: i32) -> (i32, i32) {
    %c0_i32 = arith.constant 0 : i32
    %c0_i32_0 = arith.constant 0 : i32
    %c0_i32_1 = arith.constant 0 : i32
    return %c0_i32, %c0_i32_0 : i32, i32
  }
  func.func @transform_19(%arg0: i32) -> (i32, i32, i32) {
    %c0_i32 = arith.constant 0 : i32
    %c0_i32_0 = arith.constant 0 : i32
    %c0_i32_1 = arith.constant 0 : i32
    %c0_i32_2 = arith.constant 0 : i32
    return %c0_i32, %c0_i32_0, %c0_i32_1 : i32, i32, i32
  }
  func.func @transform_20(%arg0: i32) -> (i32, i32) {
    %c0_i32 = arith.constant 0 : i32
    %c0_i32_0 = arith.constant 0 : i32
    %c0_i32_1 = arith.constant 0 : i32
    return %c0_i32, %c0_i32_0 : i32, i32
  }
  func.func @transform_21(%arg0: i32) -> (i32, i32, i32) {
    %c0_i32 = arith.constant 0 : i32
    %c0_i32_0 = arith.constant 0 : i32
    %c0_i32_1 = arith.constant 0 : i32
    %c0_i32_2 = arith.constant 0 : i32
    return %c0_i32, %c0_i32_0, %c0_i32_1 : i32, i32, i32
  }
  func.func @transform_22(%arg0: i32) -> (i32, i32) {
    %c0_i32 = arith.constant 0 : i32
    %c0_i32_0 = arith.constant 0 : i32
    %c0_i32_1 = arith.constant 0 : i32
    return %c0_i32, %c0_i32_0 : i32, i32
  }
  func.func @transform_23(%arg0: i32) -> (i32, i32, i32) {
    %c0_i32 = arith.constant 0 : i32
    %c0_i32_0 = arith.constant 0 : i32
    %c0_i32_1 = arith.constant 0 : i32
    %c0_i32_2 = arith.constant 0 : i32
    return %c0_i32, %c0_i32_0, %c0_i32_1 : i32, i32, i32
  }
  func.func @transform_24(%arg0: i32) -> (i32, i32) {
    %c0_i32 = arith.constant 0 : i32
    %c0_i32_0 = arith.constant 0 : i32
    %c0_i32_1 = arith.constant 0 : i32
    return %c0_i32, %c0_i32_0 : i32, i32
  }
  func.func @transform_25(%arg0: i32) -> (i32, i32, i32) {
    %c0_i32 = arith.constant 0 : i32
    %c0_i32_0 = arith.constant 0 : i32
    %c0_i32_1 = arith.constant 0 : i32
    %c0_i32_2 = arith.constant 0 : i32
    return %c0_i32, %c0_i32_0, %c0_i32_1 : i32, i32, i32
  }
  func.func @transform_26(%arg0: i32) -> (i32, i32) {
    %c0_i32 = arith.constant 0 : i32
    %c0_i32_0 = arith.constant 0 : i32
    %c0_i32_1 = arith.constant 0 : i32
    return %c0_i32, %c0_i32_0 : i32, i32
  }
  func.func @transform_27(%arg0: i32) -> (i32, i32, i32) {
    %c0_i32 = arith.constant 0 : i32
    %c0_i32_0 = arith.constant 0 : i32
    %c0_i32_1 = arith.constant 0 : i32
    %c0_i32_2 = arith.constant 0 : i32
    return %c0_i32, %c0_i32_0, %c0_i32_1 : i32, i32, i32
  }
  func.func @transform_28(%arg0: i32) -> (i32, i32, i32) {
    %c0_i32 = arith.constant 0 : i32
    %c0_i32_0 = arith.constant 0 : i32
    %c0_i32_1 = arith.constant 0 : i32
    %c0_i32_2 = arith.constant 0 : i32
    return %c0_i32, %c0_i32_0, %c0_i32_1 : i32, i32, i32
  }
  func.func @transform_29(%arg0: i32) -> (i32, i32) {
    %c0_i32 = arith.constant 0 : i32
    %c0_i32_0 = arith.constant 0 : i32
    %c0_i32_1 = arith.constant 0 : i32
    return %c0_i32, %c0_i32_0 : i32, i32
  }
  func.func @transform_30(%arg0: i32) -> (i32, i32) {
    %c0_i32 = arith.constant 0 : i32
    %c0_i32_0 = arith.constant 0 : i32
    %c0_i32_1 = arith.constant 0 : i32
    return %c0_i32, %c0_i32_0 : i32, i32
  }
  func.func @transform_31(%arg0: i32) -> (i32, i32, i32) {
    %c0_i32 = arith.constant 0 : i32
    %c0_i32_0 = arith.constant 0 : i32
    %c0_i32_1 = arith.constant 0 : i32
    return %arg0, %c0_i32, %c0_i32_0 : i32, i32, i32
  }
  func.func @transform_32(%arg0: i32) -> (i32, i32, i32) {
    %c0_i32 = arith.constant 0 : i32
    %c0_i32_0 = arith.constant 0 : i32
    %c0_i32_1 = arith.constant 0 : i32
    return %arg0, %c0_i32, %c0_i32_0 : i32, i32, i32
  }
}

</mosaic_0001>

<bundles_post_ra>
// kernel: forward.1
= control target key start
LH: loop header
LB: loop body
LE: loop exit
PB: predicated region body
PF: predicated region fallthrough
CT: control target
= control target key end

     0   :  { %s9884_s6 = smov 1   ;;  %s9885_s10 = smov 2   ;;  %s11587_s0 = inlined_call_operand.smem [shape: u32[33], index: -1, kind: input, shape index: {}] }
   0x1   :  { %s9956_s5 = sld [smem:[%s11587_s0]]   ;;  %s9886_s14 = smov 3  }
   0x2   :  { %s9961_s9 = sld [smem:[%s11587_s0 + %s9884_s6]]   ;;  %s9887_s18 = smov 4  }
   0x3   :  { %s9966_s13 = sld [smem:[%s11587_s0 + %s9885_s10]]   ;;  %s9888_s22 = smov 5  }
   0x4   :  { %s9971_s17 = sld [smem:[%s11587_s0 + %s9886_s14]]   ;;  %s9889_s26 = smov 6  }
   0x5   :  { %s9976_s21 = sld [smem:[%s11587_s0 + %s9887_s18]]   ;;  %s9890_s30 = smov 7  }
   0x6   :  { %s9981_s25 = sld [smem:[%s11587_s0 + %s9888_s22]]   ;;  %s9891_s4 = smov 8  }
   0x7   :  { %11616 = sst [smem:[#allocation56_spill]] %s9956_s5  ;;  %s9892_s10 = smov 9  }
   0x8   :  { %11617 = sst [smem:[#allocation57_spill]] %s9961_s9  ;;  %s9893_s15 = smov 10  }
   0x9   :  { %11618 = sst [smem:[#allocation58_spill]] %s9966_s13  ;;  %s9894_s20 = smov 11  }
   0xa   :  { %s9986_s29 = sld [smem:[%s11587_s0 + %s9889_s26]]   ;;  %s9895_s26 = smov 12  }
   0xb   :  { %s9991_s3 = sld [smem:[%s11587_s0 + %s9890_s30]]   ;;  %s9896_s1 = smov 13  }
   0xc   :  { %s9996_s8 = sld [smem:[%s11587_s0 + %s9891_s4]]   ;;  %s9897_s7 = smov 14  }
   0xd   :  { %s10001_s14 = sld [smem:[%s11587_s0 + %s9892_s10]]   ;;  %s9899_s22 = smov 16  }
   0xe   :  { %s10006_s19 = sld [smem:[%s11587_s0 + %s9893_s15]]   ;;  %s9898_s15 = smov 15  }
   0xf   :  { %s10011_s24 = sld [smem:[%s11587_s0 + %s9894_s20]]   ;;  %s9900_s28 = smov 17  }
  0x10   :  { %s10016_s30 = sld [smem:[%s11587_s0 + %s9895_s26]]  }
  0x11   :  { %11619 = sst [smem:[#allocation59_spill]] %s9991_s3 }
  0x12   :  { %11620 = sst [smem:[#allocation60_spill]] %s9996_s8 }
  0x13   :  { %11621 = sst [smem:[#allocation61_spill]] %s10001_s14 }
  0x14   :  { %s10021_s6 = sld [smem:[%s11587_s0 + %s9896_s1]]  }
  0x15   :  { %11622 = sst [smem:[#allocation62_spill]] %s10011_s24 }
  0x16   :  { %s10026_s12 = sld [smem:[%s11587_s0 + %s9897_s7]]   ;;  %s9901_s7 = smov 18  }
  0x17   :  { %s10031_s20 = sld [smem:[%s11587_s0 + %s9898_s15]]   ;;  %s9902_s15 = smov 19  }
  0x18   :  { %s10036_s27 = sld [smem:[%s11587_s0 + %s9899_s22]]   ;;  %s9903_s22 = smov 20  }
  0x19   :  { %s10041_s4 = sld [smem:[%s11587_s0 + %s9900_s28]]   ;;  %s9904_s28 = smov 21  }
  0x1a   :  { %11623 = sst [smem:[#allocation63_spill]] %s10021_s6 }
  0x1b   :  { %s10046_s13 = sld [smem:[%s11587_s0 + %s9901_s7]]   ;;  %s9905_s7 = smov 22  }
  0x1c   :  { %11624 = sst [smem:[#allocation64_spill]] %s10026_s12 }
  0x1d   :  { %11625 = sst [smem:[#allocation65_spill]] %s10031_s20 }
  0x1e   :  { %s10051_s9 = sld [smem:[%s11587_s0 + %s9902_s15]]   ;;  %s9906_s15 = smov 23  }
  0x1f   :  { %11626 = sst [smem:[#allocation66_spill]] %s10041_s4 }
  0x20   :  { %s10056_s5 = sld [smem:[%s11587_s0 + %s9903_s22]]   ;;  %s9907_s22 = smov 24  }
  0x21   :  { %11627 = sst [smem:[#allocation67_spill]] %s10046_s13 }
  0x22   :  { %s10061_s4 = sld [smem:[%s11587_s0 + %s9904_s28]]   ;;  %s9908_s28 = smov 25  }
  0x23   :  { %s10066_s13 = sld [smem:[%s11587_s0 + %s9905_s7]]   ;;  %s9909_s7 = smov 26  }
  0x24   :  { %11628 = sst [smem:[#allocation68_spill]] %s10051_s9 }
  0x25   :  { %s10071_s20 = sld [smem:[%s11587_s0 + %s9906_s15]]   ;;  %s9910_s15 = smov 27  }
  0x26   :  { %11629 = sst [smem:[#allocation69_spill]] %s10056_s5 }
  0x27   :  { %s10076_s5 = sld [smem:[%s11587_s0 + %s9907_s22]]   ;;  %s9911_s22 = smov 28  }
  0x28   :  { %11630 = sst [smem:[#allocation70_spill]] %s10061_s4 }
  0x29   :  { %11631 = sst [smem:[#allocation71_spill]] %s10066_s13 }
  0x2a   :  { %s10081_s6 = sld [smem:[%s11587_s0 + %s9908_s28]]   ;;  %s9912_s28 = smov 29  }
  0x2b   :  { %s10086_s13 = sld [smem:[%s11587_s0 + %s9909_s7]]   ;;  %s9913_s7 = smov 30  }
  0x2c   :  { %s10091_s24 = sld [smem:[%s11587_s0 + %s9910_s15]]   ;;  %s9914_s15 = smov 31  }
  0x2d   :  { %11632 = sst [smem:[#allocation72_spill]] %s10076_s5 }
  0x2e   :  { %s10096_s5 = sld [smem:[%s11587_s0 + %s9911_s22]]   ;;  %s9915_s22 = smov 32  }
  0x2f   :  { %s10116_s14 = sld [smem:[%s11587_s0 + %s9915_s22]]  }
  0x30   :  { %11633 = sst [smem:[#allocation73_spill]] %s10081_s6 }
  0x31   :  { %11634 = sst [smem:[#allocation74_spill]] %s10086_s13 }
  0x32   :  { %11635 = sst [smem:[#allocation75_spill]] %s10091_s24 }
  0x33   :  { %s10101_s6 = sld [smem:[%s11587_s0 + %s9912_s28]]  }
  0x34   :  { %11636 = sst [smem:[#allocation76_spill]] %s10096_s5 }
  0x35   :  { %s10106_s13 = sld [smem:[%s11587_s0 + %s9913_s7]]  }
  0x36   :  { %s10111_s24 = sld [smem:[%s11587_s0 + %s9914_s15]]  }
  0x37   :  { %71 = vsyncpa [#allocation10], 0 }
  0x38   :  { %72 = vsyncpa [#allocation12], 0 }
  0x39   :  { %73 = vsyncpa [#allocation15], 0 }
  0x3a   :  { %74 = vsyncpa [#allocation18], 0 }
  0x3b   :  { %75 = vsyncpa [#allocation21], 0 }
  0x3c   :  { %76 = vsyncpa [#allocation24], 0 }
  0x3d   :  { %77 = vsyncpa [#allocation27], 0 }
  0x3e   :  { %78 = vsyncpa [#allocation30], 0 }
  0x3f   :  { %79 = vsyncpa [#allocation33], 0 }
  0x40   :  { %80 = vsyncpa [#allocation36], 0 }
  0x41   :  { %81 = vsyncpa [#allocation39], 0 }
  0x42   :  { %82 = vsyncpa [#allocation42], 0  ;;  %s10118_s28 = smov 0  }
  0x43 LB: > { %s11637_s12 = sld [smem:[#allocation64_spill]]  ;;  %s11638_s9 = sld [smem:[#allocation68_spill]]  ;;  %s9882_s28 = sphi %s10118_s28, %s88_s28  }
  0x44   : > { %s11639_s5 = sld [smem:[#allocation76_spill]]  ;;  %s11640_s4 = sld [smem:[#allocation70_spill]] }
  0x45   : > { %s11641_s3 = sld [smem:[#allocation59_spill]]  ;;  %s11642_s8 = sld [smem:[#allocation60_spill]] }
  0x46   : > { %s9916_s0 = smov [#allocation11]   ;;  %s10124_s2 = sadd.s32 4294967295, %s9882_s28  }
  0x47   : > { %s837_s1 = sshll.u32 %s9916_s0, 4  ;;  %p6783_p0 = scmp.ge.s32.totalorder %s9882_s28, 1  ;;  %s10129_s1 = int_to_ptr.vmem [resolvable:$true] %s837_s1 }
  0x48   : > { %p811_p1 = scmp.lt.s32.totalorder %s9882_s28, 3  ;;  %p11599_p2 = scmp.eq.s32.totalorder %s10124_s2, 0 }
  0x49   : > { %s9917_s10 = smov [#allocation14]   ;;  %s9918_s15 = smov [#allocation17]  }
  0x4a   : > { %p10131_p3 = pnand %p6783_p0, %p811_p1  ;;  %s861_s11 = sshll.u32 %s9917_s10, 4  ;;  %s10137_s11 = int_to_ptr.vmem [resolvable:$true] %s861_s11 }
  0x4b   : > { %s885_s16 = sshll.u32 %s9918_s15, 4  ;;  %s9919_s22 = smov [#allocation20]   ;;  %s10145_s16 = int_to_ptr.vmem [resolvable:$true] %s885_s16 }
  0x4c   : > { %s11643_s7 = scalar_select %p10131_p3, 1, 0 }
  0x4d   : > { %p8702_p4 = pneg %p10131_p3  ;;  %s909_s23 = sshll.u32 %s9919_s22, 4  ;;  %s10147_s23 = int_to_ptr.vmem [resolvable:$true] %s909_s23 }
  0x4e   : > { %s9184_s26 = scalar_lea.hbm %s9976_s21, 16 }
  0x4f   : > { %p10141_p5 = pnand %p11599_p2, %p8702_p4  ;;  %p9185_p6 = scmp.ne.s32.totalorder %s9976_s21, %s9184_s26 }
  0x50   : > { %p9191_p10 = scmp.lt.u32.totalorder %s9184_s26, %s9976_s21 }
  0x51   : > { %p10153_p7 = pneg %p10141_p5 }
  0x53   : > { %p9187_p8 = pnand %p10153_p7, %p9185_p6 }
  0x55   : > { %p9188_p9 = pneg %p9187_p8 }
  0x57   : > { %p9193_p11 = pnand %p9191_p10, %p9188_p9 }
  0x59   : > { %9196 = shalt.err (!%p9193_p11)
}
  0x5a   : > { %s9197_s10 = scalar_lea.vmem %s10129_s1, 16  ;;  %s9204_s15 = scalar_lea.vmem %s10129_s1, 32 }
  0x5b   : > { %p9198_p12 = scmp.ne.s32.totalorder %s10129_s1, %s9197_s10  ;;  %p9205_p1 = scmp.lt.s32.totalorder %s10129_s1, %s10129_s1 }
  0x5c   : > { %p9206_p4 = scmp.lt.s32.totalorder %s9204_s15, %s9197_s10 }
  0x5d   : > { %p9200_p13 = pnand %p9198_p12, %p10153_p7 }
  0x5e   : > { %p9207_p2 = por %p9206_p4, %p9205_p1 }
  0x5f   : > { %p9201_p0 = pneg %p9200_p13 }
  0x61   : > { %p9208_p6 = pnand %p9207_p2, %p9201_p0 }
  0x63   : > { %9211 = shalt.err (!%p9208_p6)
}
  0x64   : > { %8708 = dma.hbm_to_vmem [thread:$0]  (!%p10141_p5), %s9976_s21, 16, %s10129_s1, [#allocation12]  }
  0x65   : > { %s9212_s22 = scalar_lea.hbm %s9986_s29, 16 }
  0x66   : > { %p9213_p8 = scmp.ne.s32.totalorder %s9986_s29, %s9212_s22  ;;  %p9219_p11 = scmp.lt.u32.totalorder %s9212_s22, %s9986_s29 }
  0x68   : > { %p9215_p9 = pnand %p9213_p8, %p10153_p7 }
  0x6a   : > { %p9216_p10 = pneg %p9215_p9 }
  0x6c   : > { %p9221_p12 = pnand %p9219_p11, %p9216_p10 }
  0x6e   : > { %9224 = shalt.err (!%p9221_p12)
}
  0x6f   : > { %s9225_s26 = scalar_lea.vmem %s10137_s11, 16  ;;  %s9232_s10 = scalar_lea.vmem %s10137_s11, 32 }
  0x70   : > { %p9226_p2 = scmp.ne.s32.totalorder %s10137_s11, %s9225_s26  ;;  %p9233_p1 = scmp.lt.s32.totalorder %s10137_s11, %s10137_s11 }
  0x71   : > { %p9234_p4 = scmp.lt.s32.totalorder %s9232_s10, %s9225_s26 }
  0x72   : > { %p9228_p13 = pnand %p9226_p2, %p10153_p7 }
  0x73   : > { %p9235_p6 = por %p9234_p4, %p9233_p1 }
  0x74   : > { %p9229_p0 = pneg %p9228_p13 }
  0x76   : > { %p9236_p8 = pnand %p9235_p6, %p9229_p0 }
  0x78   : > { %9239 = shalt.err (!%p9236_p8)
}
  0x79   : > { %8714 = dma.hbm_to_vmem [thread:$0]  (!%p10141_p5), %s9986_s29, 16, %s10137_s11, [#allocation15]  }
  0x7a   : > { %s9240_s1 = scalar_lea.hbm %s11642_s8, 16 }
  0x7b   : > { %p9241_p9 = scmp.ne.s32.totalorder %s11642_s8, %s9240_s1  ;;  %p9247_p12 = scmp.lt.u32.totalorder %s9240_s1, %s11642_s8 }
  0x7d   : > { %p9243_p10 = pnand %p9241_p9, %p10153_p7 }
  0x7f   : > { %p9244_p11 = pneg %p9243_p10 }
  0x81   : > { %p9249_p2 = pnand %p9247_p12, %p9244_p11 }
  0x83   : > { %9252 = shalt.err (!%p9249_p2)
}
  0x84   : > { %s9253_s15 = scalar_lea.vmem %s10145_s16, 16  ;;  %s9260_s22 = scalar_lea.vmem %s10145_s16, 32 }
  0x85   : > { %p9254_p13 = scmp.ne.s32.totalorder %s10145_s16, %s9253_s15  ;;  %p9261_p4 = scmp.lt.s32.totalorder %s10145_s16, %s10145_s16 }
  0x86   : > { %p9262_p6 = scmp.lt.s32.totalorder %s9260_s22, %s9253_s15 }
  0x87   : > { %p9256_p0 = pnand %p9254_p13, %p10153_p7 }
  0x88   : > { %p9263_p8 = por %p9262_p6, %p9261_p4 }
  0x89   : > { %p9257_p1 = pneg %p9256_p0 }
  0x8b   : > { %p9264_p9 = pnand %p9263_p8, %p9257_p1 }
  0x8d   : > { %9267 = shalt.err (!%p9264_p9)
}
  0x8e   : > { %8720 = dma.hbm_to_vmem [thread:$0]  (!%p10141_p5), %s11642_s8, 16, %s10145_s16, [#allocation18]  }
  0x8f   : > { %s9268_s11 = scalar_lea.hbm %s10006_s19, 16 }
  0x90   : > { %p9269_p10 = scmp.ne.s32.totalorder %s10006_s19, %s9268_s11  ;;  %p9275_p2 = scmp.lt.u32.totalorder %s9268_s11, %s10006_s19 }
  0x92   : > { %p9271_p11 = pnand %p9269_p10, %p10153_p7 }
  0x94   : > { %p9272_p12 = pneg %p9271_p11 }
  0x96   : > { %p9277_p13 = pnand %p9275_p2, %p9272_p12 }
  0x98   : > { %9280 = shalt.err (!%p9277_p13)
}
  0x99   : > { %s9281_s26 = scalar_lea.vmem %s10147_s23, 16  ;;  %s9288_s10 = scalar_lea.vmem %s10147_s23, 32 }
  0x9a   : > { %p9282_p0 = scmp.ne.s32.totalorder %s10147_s23, %s9281_s26  ;;  %p9289_p6 = scmp.lt.s32.totalorder %s10147_s23, %s10147_s23 }
  0x9b   : > { %p9290_p8 = scmp.lt.s32.totalorder %s9288_s10, %s9281_s26 }
  0x9c   : > { %p9284_p1 = pnand %p9282_p0, %p10153_p7 }
  0x9d   : > { %p9291_p9 = por %p9290_p8, %p9289_p6 }
  0x9e   : > { %p9285_p4 = pneg %p9284_p1 }
  0xa0   : > { %p9292_p10 = pnand %p9291_p9, %p9285_p4 }
  0xa2   : > { %9295 = shalt.err (!%p9292_p10)
}
  0xa3   : > { %8726 = dma.hbm_to_vmem [thread:$0]  (!%p10141_p5), %s10006_s19, 16, %s10147_s23, [#allocation21]  }
  0xa4   : > { %s9920_s16 = smov [#allocation23]   ;;  %s9921_s15 = smov [#allocation26]  }
  0xa5   : > { %s933_s1 = sshll.u32 %s9920_s16, 4  ;;  %s956_s22 = sshll.u32 %s9921_s15, 4  ;;  %s934_s1 = int_to_ptr.vmem [resolvable:$true] %s933_s1  ;;  %s957_s22 = int_to_ptr.vmem [resolvable:$true] %s956_s22 }
  0xa6   : > { %s9296_s11 = scalar_lea.hbm %s10016_s30, 16 }
  0xa7   : > { %p9297_p11 = scmp.ne.s32.totalorder %s10016_s30, %s9296_s11  ;;  %p9303_p13 = scmp.lt.u32.totalorder %s9296_s11, %s10016_s30 }
  0xa9   : > { %p9299_p12 = pnand %p9297_p11, %p10153_p7 }
  0xab   : > { %p9300_p2 = pneg %p9299_p12 }
  0xad   : > { %p9305_p0 = pnand %p9303_p13, %p9300_p2 }
  0xaf   : > { %9308 = shalt.err (!%p9305_p0)
}
  0xb0   : > { %s9309_s26 = scalar_lea.vmem %s934_s1, 16  ;;  %s9316_s23 = scalar_lea.vmem %s934_s1, 32 }
  0xb1   : > { %p9310_p1 = scmp.ne.s32.totalorder %s934_s1, %s9309_s26  ;;  %p9317_p8 = scmp.lt.s32.totalorder %s934_s1, %s934_s1 }
  0xb2   : > { %p9318_p9 = scmp.lt.s32.totalorder %s9316_s23, %s9309_s26 }
  0xb3   : > { %p9312_p4 = pnand %p9310_p1, %p10153_p7 }
  0xb4   : > { %p9319_p10 = por %p9318_p9, %p9317_p8 }
  0xb5   : > { %p9313_p6 = pneg %p9312_p4 }
  0xb7   : > { %p9320_p3 = pnand %p9319_p10, %p9313_p6 }
  0xb9   : > { %9323 = shalt.err (!%p9320_p3)
}
  0xba   : > { %8732 = dma.hbm_to_vmem [thread:$0]  (!%p10141_p5), %s10016_s30, 16, %s934_s1, [#allocation24]  }
  0xbb   : > { %s9324_s10 = scalar_lea.hbm %s11637_s12, 64 }
  0xbc   : > { %p9325_p11 = scmp.ne.s32.totalorder %s11637_s12, %s9324_s10  ;;  %p9331_p13 = scmp.lt.u32.totalorder %s9324_s10, %s11637_s12 }
  0xbe   : > { %p9327_p12 = pnand %p9325_p11, %p10153_p7 }
  0xc0   : > { %p9328_p2 = pneg %p9327_p12 }
  0xc2   : > { %p9333_p0 = pnand %p9331_p13, %p9328_p2 }
  0xc4   : > { %9336 = shalt.err (!%p9333_p0)
}
  0xc5   : > { %s9337_s16 = scalar_lea.vmem %s957_s22, 64  ;;  %p9345_p6 = scmp.lt.s32.totalorder %s957_s22, %s957_s22 }
  0xc6   : > { %p9338_p3 = scmp.ne.s32.totalorder %s957_s22, %s9337_s16  ;;  %p9346_p8 = scmp.lt.s32.totalorder %s9337_s16, %s9337_s16 }
  0xc8   : > { %p9340_p1 = pnand %p9338_p3, %p10153_p7  ;;  %p9347_p9 = por %p9346_p8, %p9345_p6 }
  0xca   : > { %p9341_p4 = pneg %p9340_p1 }
  0xcc   : > { %p9348_p10 = pnand %p9347_p9, %p9341_p4 }
  0xce   : > { %9351 = shalt.err (!%p9348_p10)
}
  0xcf   : > { %s11601_s1 = smov 16   ;;  %s11602_s15 = smov 1  }
  0xd0   : > { %8738 = dma.hbm_to_vmem [thread:$0]  (!%p10141_p5), %s11637_s12, 64, %s957_s22, [#allocation27], %s11601_s1, %s11601_s1, %s11602_s15  }
  0xd1   : > { %s9924_s11 = smov [#allocation29]   ;;  %s9352_s23 = scalar_lea.hbm %s10036_s27, 16 }
  0xd2   : > { %s983_s26 = sshll.u32 %s9924_s11, 4  ;;  %p9353_p11 = scmp.ne.s32.totalorder %s10036_s27, %s9352_s23  ;;  %s984_s26 = int_to_ptr.vmem [resolvable:$true] %s983_s26 }
  0xd3   : > { %p9359_p13 = scmp.lt.u32.totalorder %s9352_s23, %s10036_s27 }
  0xd4   : > { %p9355_p12 = pnand %p9353_p11, %p10153_p7 }
  0xd6   : > { %p9356_p2 = pneg %p9355_p12 }
  0xd8   : > { %p9361_p0 = pnand %p9359_p13, %p9356_p2 }
  0xda   : > { %9364 = shalt.err (!%p9361_p0)
}
  0xdb   : > { %s9365_s10 = scalar_lea.vmem %s984_s26, 16  ;;  %s9372_s16 = scalar_lea.vmem %s984_s26, 32 }
  0xdc   : > { %p9366_p3 = scmp.ne.s32.totalorder %s984_s26, %s9365_s10  ;;  %p9373_p6 = scmp.lt.s32.totalorder %s984_s26, %s984_s26 }
  0xdd   : > { %p9374_p8 = scmp.lt.s32.totalorder %s9372_s16, %s9365_s10 }
  0xde   : > { %p9368_p1 = pnand %p9366_p3, %p10153_p7 }
  0xdf   : > { %p9375_p9 = por %p9374_p8, %p9373_p6 }
  0xe0   : > { %p9369_p4 = pneg %p9368_p1 }
  0xe2   : > { %p9376_p10 = pnand %p9375_p9, %p9369_p4 }
  0xe4   : > { %9379 = shalt.err (!%p9376_p10)
}
  0xe5   : > { %8744 = dma.hbm_to_vmem [thread:$0]  (!%p10141_p5), %s10036_s27, 16, %s984_s26, [#allocation30]  }
  0xe6   : > { %s9925_s22 = smov [#allocation32]   ;;  %s9926_s23 = smov [#allocation35]  }
  0xe7   : > { %s1007_s11 = sshll.u32 %s9925_s22, 4  ;;  %s1031_s1 = sshll.u32 %s9926_s23, 4  ;;  %s1008_s11 = int_to_ptr.vmem [resolvable:$true] %s1007_s11  ;;  %s10252_s1 = int_to_ptr.vmem [resolvable:$true] %s1031_s1 }
  0xe8   : > { %s9380_s15 = scalar_lea.hbm %s11638_s9, 3072 }
  0xe9   : > { %p9381_p11 = scmp.ne.s32.totalorder %s11638_s9, %s9380_s15  ;;  %p9387_p13 = scmp.lt.u32.totalorder %s9380_s15, %s11638_s9 }
  0xeb   : > { %p9383_p12 = pnand %p9381_p11, %p10153_p7 }
  0xed   : > { %p9384_p2 = pneg %p9383_p12 }
  0xef   : > { %p9389_p0 = pnand %p9387_p13, %p9384_p2 }
  0xf1   : > { %9392 = shalt.err (!%p9389_p0)
}
  0xf2   : > { %s9393_s10 = scalar_lea.vmem %s1008_s11, 3072  ;;  %p9401_p6 = scmp.lt.s32.totalorder %s1008_s11, %s1008_s11 }
  0xf3   : > { %p9394_p3 = scmp.ne.s32.totalorder %s1008_s11, %s9393_s10  ;;  %p9402_p8 = scmp.lt.s32.totalorder %s9393_s10, %s9393_s10 }
  0xf5   : > { %p9396_p1 = pnand %p9394_p3, %p10153_p7  ;;  %p9403_p9 = por %p9402_p8, %p9401_p6 }
  0xf7   : > { %p9397_p4 = pneg %p9396_p1 }
  0xf9   : > { %p9404_p10 = pnand %p9403_p9, %p9397_p4 }
  0xfb   : > { %9407 = shalt.err (!%p9404_p10)
}
  0xfc   : > { %s11604_s26 = smov 64   ;;  %s11606_s15 = smov 4  }
  0xfd   : > { %8750 = dma.hbm_to_vmem [thread:$0]  (!%p10141_p5), %s11638_s9, 3072, %s1008_s11, [#allocation33], %s11604_s26, %s11604_s26, %s11606_s15  }
  0xfe   : > { %s9408_s16 = scalar_lea.hbm %s11640_s4, 3072 }
  0xff   : > { %p9409_p11 = scmp.ne.s32.totalorder %s11640_s4, %s9408_s16  ;;  %p9415_p13 = scmp.lt.u32.totalorder %s9408_s16, %s11640_s4 }
 0x101   : > { %p9411_p12 = pnand %p9409_p11, %p10153_p7 }
 0x103   : > { %p9412_p2 = pneg %p9411_p12 }
 0x105   : > { %p9417_p0 = pnand %p9415_p13, %p9412_p2 }
 0x107   : > { %9420 = shalt.err (!%p9417_p0)
}
 0x108   : > { %s9421_s22 = scalar_lea.vmem %s10252_s1, 3072  ;;  %p9429_p6 = scmp.lt.s32.totalorder %s10252_s1, %s10252_s1 }
 0x109   : > { %p9422_p3 = scmp.ne.s32.totalorder %s10252_s1, %s9421_s22  ;;  %p9430_p8 = scmp.lt.s32.totalorder %s9421_s22, %s9421_s22 }
 0x10b   : > { %p9424_p1 = pnand %p9422_p3, %p10153_p7  ;;  %p9431_p9 = por %p9430_p8, %p9429_p6 }
 0x10d   : > { %p9425_p4 = pneg %p9424_p1 }
 0x10f   : > { %p9432_p10 = pnand %p9431_p9, %p9425_p4 }
 0x111   : > { %9435 = shalt.err (!%p9432_p10)
}
 0x112   : > { %8756 = dma.hbm_to_vmem [thread:$0]  (!%p10141_p5), %s11640_s4, 3072, %s10252_s1, [#allocation36], %s11604_s26, %s11604_s26, %s11606_s15  }
 0x113   : > { %s9929_s11 = smov [#allocation38]   ;;  %s9930_s10 = smov [#allocation41]  }
 0x114   : > { %s1055_s23 = sshll.u32 %s9929_s11, 4  ;;  %s1088_s16 = sshll.u32 %s9930_s10, 4  ;;  %s1056_s23 = int_to_ptr.vmem [resolvable:$true] %s1055_s23  ;;  %s10285_s16 = int_to_ptr.vmem [resolvable:$true] %s1088_s16 }
 0x115   : > { %s9436_s22 = scalar_lea.hbm %s10071_s20, 3072 }
 0x116   : > { %p9437_p11 = scmp.ne.s32.totalorder %s10071_s20, %s9436_s22  ;;  %p9443_p13 = scmp.lt.u32.totalorder %s9436_s22, %s10071_s20 }
 0x118   : > { %p9439_p12 = pnand %p9437_p11, %p10153_p7 }
 0x11a   : > { %p9440_p2 = pneg %p9439_p12 }
 0x11c   : > { %p9445_p0 = pnand %p9443_p13, %p9440_p2 }
 0x11e   : > { %9448 = shalt.err (!%p9445_p0)
}
 0x11f   : > { %s9449_s8 = scalar_lea.vmem %s1056_s23, 3072  ;;  %p9457_p6 = scmp.lt.s32.totalorder %s1056_s23, %s1056_s23 }
 0x120   : > { %p9450_p3 = scmp.ne.s32.totalorder %s1056_s23, %s9449_s8  ;;  %p9458_p8 = scmp.lt.s32.totalorder %s9449_s8, %s9449_s8 }
 0x122   : > { %p9452_p1 = pnand %p9450_p3, %p10153_p7  ;;  %p9459_p9 = por %p9458_p8, %p9457_p6 }
 0x124   : > { %p9453_p4 = pneg %p9452_p1 }
 0x126   : > { %p9460_p10 = pnand %p9459_p9, %p9453_p4 }
 0x128   : > { %9463 = shalt.err (!%p9460_p10)
}
 0x129   : > { %8762 = dma.hbm_to_vmem [thread:$0]  (!%p10141_p5), %s10071_s20, 3072, %s1056_s23, [#allocation39], %s11604_s26, %s11604_s26, %s11606_s15  }
 0x12a   : > { %s9464_s1 = scalar_lea.hbm %s11639_s5, 64 }
 0x12b   : > { %p9465_p11 = scmp.ne.s32.totalorder %s11639_s5, %s9464_s1  ;;  %p9471_p13 = scmp.lt.u32.totalorder %s9464_s1, %s11639_s5 }
 0x12d   : > { %p9467_p12 = pnand %p9465_p11, %p10153_p7 }
 0x12f   : > { %p9468_p2 = pneg %p9467_p12 }
 0x131   : > { %p9473_p0 = pnand %p9471_p13, %p9468_p2 }
 0x133   : > { %9476 = shalt.err (!%p9473_p0)
}
 0x134   : > { %s9477_s8 = scalar_lea.vmem %s10285_s16, 64  ;;  %p9485_p6 = scmp.lt.s32.totalorder %s10285_s16, %s10285_s16 }
 0x135   : > { %p9478_p3 = scmp.ne.s32.totalorder %s10285_s16, %s9477_s8  ;;  %p9486_p8 = scmp.lt.s32.totalorder %s9477_s8, %s9477_s8 }
 0x137   : > { %p9480_p1 = pnand %p9478_p3, %p10153_p7  ;;  %p9487_p9 = por %p9486_p8, %p9485_p6 }
 0x139   : > { %p9481_p4 = pneg %p9480_p1 }
 0x13b   : > { %p9488_p10 = pnand %p9487_p9, %p9481_p4 }
 0x13d   : > { %9491 = shalt.err (!%p9488_p10)
}
 0x13e   : > { %s11646_s11 = smov 1   ;;  %s11647_s23 = smov 16  }
 0x13f   : > { %8768 = dma.hbm_to_vmem [thread:$0]  (!%p10141_p5), %s11639_s5, 64, %s10285_s16, [#allocation42], %s11647_s23, %s11647_s23, %s11646_s11  }
 0x140   : > { %s9931_s10 = smov [#allocation9]   ;;  %s9932_s1 = smov [#allocation13]  }
 0x141   : > { %s823_s22 = sshll.u32 %s9931_s10, 4  ;;  %s847_s26 = sshll.u32 %s9932_s1, 4  ;;  %s824_s22 = int_to_ptr.vmem [resolvable:$true] %s823_s22  ;;  %s10318_s26 = int_to_ptr.vmem [resolvable:$true] %s847_s26 }
 0x142   : > { %s9492_s8 = scalar_lea.hbm %s9971_s17, 576 }
 0x143   : > { %p9493_p11 = scmp.ne.s32.totalorder %s9971_s17, %s9492_s8  ;;  %p9499_p13 = scmp.lt.u32.totalorder %s9492_s8, %s9971_s17 }
 0x145   : > { %p9495_p12 = pnand %p9493_p11, %p10153_p7 }
 0x147   : > { %p9496_p2 = pneg %p9495_p12 }
 0x149   : > { %p9501_p0 = pnand %p9499_p13, %p9496_p2 }
 0x14b   : > { %9504 = shalt.err (!%p9501_p0)
}
 0x14c   : > { %s9505_s15 = scalar_lea.vmem %s824_s22, 576  ;;  %p9513_p6 = scmp.lt.s32.totalorder %s824_s22, %s824_s22 }
 0x14d   : > { %p9506_p3 = scmp.ne.s32.totalorder %s824_s22, %s9505_s15  ;;  %p9514_p8 = scmp.lt.s32.totalorder %s9505_s15, %s9505_s15 }
 0x14f   : > { %p9508_p1 = pnand %p9506_p3, %p10153_p7  ;;  %p9515_p9 = por %p9514_p8, %p9513_p6 }
 0x151   : > { %p9509_p4 = pneg %p9508_p1 }
 0x153   : > { %p9516_p10 = pnand %p9515_p9, %p9509_p4 }
 0x155   : > { %9519 = shalt.err (!%p9516_p10)
}
 0x156   : > { %s11648_s16 = smov 4   ;;  %s11649_s11 = smov 64  }
 0x157   : > { %8705 = dma.hbm_to_vmem [thread:$0]  (!%p10141_p5), %s9971_s17, 576, %s824_s22, [#allocation10], %s11649_s11, %s11649_s11, %s11648_s16  }
 0x158   : > { %s9520_s23 = scalar_lea.hbm %s9981_s25, 3072 }
 0x159   : > { %p9521_p11 = scmp.ne.s32.totalorder %s9981_s25, %s9520_s23  ;;  %p9527_p13 = scmp.lt.u32.totalorder %s9520_s23, %s9981_s25 }
 0x15b   : > { %p9523_p12 = pnand %p9521_p11, %p10153_p7 }
 0x15d   : > { %p9524_p2 = pneg %p9523_p12 }
 0x15f   : > { %p9529_p0 = pnand %p9527_p13, %p9524_p2 }
 0x161   : > { %9532 = shalt.err (!%p9529_p0)
}
 0x162   : > { %s9533_s15 = scalar_lea.vmem %s10318_s26, 3072  ;;  %p9541_p6 = scmp.lt.s32.totalorder %s10318_s26, %s10318_s26 }
 0x163   : > { %p9534_p3 = scmp.ne.s32.totalorder %s10318_s26, %s9533_s15  ;;  %p9542_p8 = scmp.lt.s32.totalorder %s9533_s15, %s9533_s15 }
 0x165   : > { %p9536_p1 = pnand %p9534_p3, %p10153_p7  ;;  %p9543_p9 = por %p9542_p8, %p9541_p6 }
 0x167   : > { %p9537_p4 = pneg %p9536_p1 }
 0x169   : > { %p9544_p10 = pnand %p9543_p9, %p9537_p4 }
 0x16b   : > { %9547 = shalt.err (!%p9544_p10)
}
 0x16c   : > { %8711 = dma.hbm_to_vmem [thread:$0]  (!%p10141_p5), %s9981_s25, 3072, %s10318_s26, [#allocation12], %s11649_s11, %s11649_s11, %s11648_s16  }
 0x16d   : > { %s9933_s10 = smov [#allocation16]   ;;  %s9934_s1 = smov [#allocation19]  }
 0x16e   : > { %s871_s22 = sshll.u32 %s9933_s10, 4  ;;  %s895_s8 = sshll.u32 %s9934_s1, 4  ;;  %s872_s22 = int_to_ptr.vmem [resolvable:$true] %s871_s22  ;;  %s10351_s8 = int_to_ptr.vmem [resolvable:$true] %s895_s8 }
 0x16f   : > { %s9548_s23 = scalar_lea.hbm %s11641_s3, 3072 }
 0x170   : > { %p9549_p11 = scmp.ne.s32.totalorder %s11641_s3, %s9548_s23  ;;  %p9555_p13 = scmp.lt.u32.totalorder %s9548_s23, %s11641_s3 }
 0x172   : > { %p9551_p12 = pnand %p9549_p11, %p10153_p7 }
 0x174   : > { %p9552_p2 = pneg %p9551_p12 }
 0x176   : > { %p9557_p0 = pnand %p9555_p13, %p9552_p2 }
 0x178   : > { %9560 = shalt.err (!%p9557_p0)
}
 0x179   : > { %s9561_s15 = scalar_lea.vmem %s872_s22, 3072  ;;  %p9569_p6 = scmp.lt.s32.totalorder %s872_s22, %s872_s22 }
 0x17a   : > { %p9562_p3 = scmp.ne.s32.totalorder %s872_s22, %s9561_s15  ;;  %p9570_p8 = scmp.lt.s32.totalorder %s9561_s15, %s9561_s15 }
 0x17c   : > { %p9564_p1 = pnand %p9562_p3, %p10153_p7  ;;  %p9571_p9 = por %p9570_p8, %p9569_p6 }
 0x17e   : > { %p9565_p4 = pneg %p9564_p1 }
 0x180   : > { %p9572_p10 = pnand %p9571_p9, %p9565_p4 }
 0x182   : > { %9575 = shalt.err (!%p9572_p10)
}
 0x183   : > { %s11650_s26 = sld [smem:[#allocation61_spill]] }
 0x184   : > { %8717 = dma.hbm_to_vmem [thread:$0]  (!%p10141_p5), %s11641_s3, 3072, %s872_s22, [#allocation15], %s11649_s11, %s11649_s11, %s11648_s16  }
 0x189   : > { %s9576_s10 = scalar_lea.hbm %s11650_s26, 3072 }
 0x18a   : > { %p9577_p11 = scmp.ne.s32.totalorder %s11650_s26, %s9576_s10  ;;  %p9583_p13 = scmp.lt.u32.totalorder %s9576_s10, %s11650_s26 }
 0x18c   : > { %p9579_p12 = pnand %p9577_p11, %p10153_p7 }
 0x18e   : > { %p9580_p2 = pneg %p9579_p12 }
 0x190   : > { %p9585_p0 = pnand %p9583_p13, %p9580_p2 }
 0x192   : > { %9588 = shalt.err (!%p9585_p0)
}
 0x193   : > { %s9589_s1 = scalar_lea.vmem %s10351_s8, 3072  ;;  %p9597_p6 = scmp.lt.s32.totalorder %s10351_s8, %s10351_s8 }
 0x194   : > { %p9590_p3 = scmp.ne.s32.totalorder %s10351_s8, %s9589_s1  ;;  %p9598_p8 = scmp.lt.s32.totalorder %s9589_s1, %s9589_s1 }
 0x196   : > { %p9592_p1 = pnand %p9590_p3, %p10153_p7  ;;  %p9599_p9 = por %p9598_p8, %p9597_p6 }
 0x198   : > { %p9593_p4 = pneg %p9592_p1 }
 0x19a   : > { %p9600_p10 = pnand %p9599_p9, %p9593_p4 }
 0x19c   : > { %9603 = shalt.err (!%p9600_p10)
}
 0x19d   : > { %s11651_s22 = sld [smem:[#allocation62_spill]]  ;;  %s9935_s23 = smov [#allocation22]  }
 0x19e   : > { %8723 = dma.hbm_to_vmem [thread:$0]  (!%p10141_p5), %s11650_s26, 3072, %s10351_s8, [#allocation18], %s11649_s11, %s11649_s11, %s11648_s16  }
 0x19f   : > { %s919_s15 = sshll.u32 %s9935_s23, 4  ;;  %s9936_s10 = smov [#allocation25]   ;;  %s920_s15 = int_to_ptr.vmem [resolvable:$true] %s919_s15 }
 0x1a0   : > { %s943_s3 = sshll.u32 %s9936_s10, 4  ;;  %s10384_s3 = int_to_ptr.vmem [resolvable:$true] %s943_s3 }
 0x1a3   : > { %s9604_s1 = scalar_lea.hbm %s11651_s22, 3072 }
 0x1a4   : > { %p9605_p11 = scmp.ne.s32.totalorder %s11651_s22, %s9604_s1  ;;  %p9611_p13 = scmp.lt.u32.totalorder %s9604_s1, %s11651_s22 }
 0x1a6   : > { %p9607_p12 = pnand %p9605_p11, %p10153_p7 }
 0x1a8   : > { %p9608_p2 = pneg %p9607_p12 }
 0x1aa   : > { %p9613_p0 = pnand %p9611_p13, %p9608_p2 }
 0x1ac   : > { %9616 = shalt.err (!%p9613_p0)
}
 0x1ad   : > { %s9617_s4 = scalar_lea.vmem %s920_s15, 3072  ;;  %p9625_p6 = scmp.lt.s32.totalorder %s920_s15, %s920_s15 }
 0x1ae   : > { %p9618_p3 = scmp.ne.s32.totalorder %s920_s15, %s9617_s4  ;;  %p9626_p8 = scmp.lt.s32.totalorder %s9617_s4, %s9617_s4 }
 0x1b0   : > { %p9620_p1 = pnand %p9618_p3, %p10153_p7  ;;  %p9627_p9 = por %p9626_p8, %p9625_p6 }
 0x1b2   : > { %p9621_p4 = pneg %p9620_p1 }
 0x1b4   : > { %p9628_p10 = pnand %p9627_p9, %p9621_p4 }
 0x1b6   : > { %9631 = shalt.err (!%p9628_p10)
}
 0x1b7   : > { %s11652_s8 = sld [smem:[#allocation63_spill]] }
 0x1b8   : > { %8729 = dma.hbm_to_vmem [thread:$0]  (!%p10141_p5), %s11651_s22, 3072, %s920_s15, [#allocation21], %s11649_s11, %s11649_s11, %s11648_s16  }
 0x1bd   : > { %s9632_s23 = scalar_lea.hbm %s11652_s8, 4096 }
 0x1be   : > { %p9633_p11 = scmp.ne.s32.totalorder %s11652_s8, %s9632_s23  ;;  %p9639_p13 = scmp.lt.u32.totalorder %s9632_s23, %s11652_s8 }
 0x1c0   : > { %p9635_p12 = pnand %p9633_p11, %p10153_p7 }
 0x1c2   : > { %p9636_p2 = pneg %p9635_p12 }
 0x1c4   : > { %p9641_p0 = pnand %p9639_p13, %p9636_p2 }
 0x1c6   : > { %9644 = shalt.err (!%p9641_p0)
}
 0x1c7   : > { %s9645_s4 = scalar_lea.vmem %s10384_s3, 4096  ;;  %p9653_p6 = scmp.lt.s32.totalorder %s10384_s3, %s10384_s3 }
 0x1c8   : > { %p9646_p3 = scmp.ne.s32.totalorder %s10384_s3, %s9645_s4  ;;  %p9654_p8 = scmp.lt.s32.totalorder %s9645_s4, %s9645_s4 }
 0x1ca   : > { %p9648_p1 = pnand %p9646_p3, %p10153_p7  ;;  %p9655_p9 = por %p9654_p8, %p9653_p6 }
 0x1cc   : > { %p9649_p4 = pneg %p9648_p1 }
 0x1ce   : > { %p9656_p10 = pnand %p9655_p9, %p9649_p4 }
 0x1d0   : > { %9659 = shalt.err (!%p9656_p10)
}
 0x1d1   : > { %s11653_s15 = sld [smem:[#allocation65_spill]]  ;;  %s9937_s10 = smov [#allocation28]  }
 0x1d2   : > { %8735 = dma.hbm_to_vmem [thread:$0]  (!%p10141_p5), %s11652_s8, 4096, %s10384_s3, [#allocation24], %s11649_s11, %s11649_s11, %s11648_s16  }
 0x1d3   : > { %s969_s1 = sshll.u32 %s9937_s10, 4  ;;  %s9938_s23 = smov [#allocation31]   ;;  %s970_s1 = int_to_ptr.vmem [resolvable:$true] %s969_s1 }
 0x1d4   : > { %s997_s5 = sshll.u32 %s9938_s23, 4  ;;  %s10417_s5 = int_to_ptr.vmem [resolvable:$true] %s997_s5 }
 0x1d7   : > { %s9660_s4 = scalar_lea.hbm %s11653_s15, 1024 }
 0x1d8   : > { %p9661_p11 = scmp.ne.s32.totalorder %s11653_s15, %s9660_s4  ;;  %p9667_p13 = scmp.lt.u32.totalorder %s9660_s4, %s11653_s15 }
 0x1da   : > { %p9663_p12 = pnand %p9661_p11, %p10153_p7 }
 0x1dc   : > { %p9664_p2 = pneg %p9663_p12 }
 0x1de   : > { %p9669_p0 = pnand %p9667_p13, %p9664_p2 }
 0x1e0   : > { %9672 = shalt.err (!%p9669_p0)
}
 0x1e1   : > { %s9673_s9 = scalar_lea.vmem %s970_s1, 1024  ;;  %p9681_p6 = scmp.lt.s32.totalorder %s970_s1, %s970_s1 }
 0x1e2   : > { %p9674_p3 = scmp.ne.s32.totalorder %s970_s1, %s9673_s9  ;;  %p9682_p8 = scmp.lt.s32.totalorder %s9673_s9, %s9673_s9 }
 0x1e4   : > { %p9676_p1 = pnand %p9674_p3, %p10153_p7  ;;  %p9683_p9 = por %p9682_p8, %p9681_p6 }
 0x1e6   : > { %p9677_p4 = pneg %p9676_p1 }
 0x1e8   : > { %p9684_p10 = pnand %p9683_p9, %p9677_p4 }
 0x1ea   : > { %9687 = shalt.err (!%p9684_p10)
}
 0x1eb   : > { %s11654_s3 = sld [smem:[#allocation67_spill]] }
 0x1ec   : > { %8741 = dma.hbm_to_vmem [thread:$0]  (!%p10141_p5), %s11653_s15, 1024, %s970_s1, [#allocation27], %s11649_s11, %s11649_s11, %s11648_s16  }
 0x1f1   : > { %s9688_s10 = scalar_lea.hbm %s11654_s3, 16 }
 0x1f2   : > { %p9689_p11 = scmp.ne.s32.totalorder %s11654_s3, %s9688_s10  ;;  %p9695_p13 = scmp.lt.u32.totalorder %s9688_s10, %s11654_s3 }
 0x1f4   : > { %p9691_p12 = pnand %p9689_p11, %p10153_p7 }
 0x1f6   : > { %p9692_p2 = pneg %p9691_p12 }
 0x1f8   : > { %p9697_p0 = pnand %p9695_p13, %p9692_p2 }
 0x1fa   : > { %9700 = shalt.err (!%p9697_p0)
}
 0x1fb   : > { %s9701_s9 = scalar_lea.vmem %s10417_s5, 16  ;;  %s9708_s23 = scalar_lea.vmem %s10417_s5, 32 }
 0x1fc   : > { %p9702_p3 = scmp.ne.s32.totalorder %s10417_s5, %s9701_s9  ;;  %p9709_p6 = scmp.lt.s32.totalorder %s10417_s5, %s10417_s5 }
 0x1fd   : > { %p9710_p8 = scmp.lt.s32.totalorder %s9708_s23, %s9701_s9 }
 0x1fe   : > { %p9704_p1 = pnand %p9702_p3, %p10153_p7 }
 0x1ff   : > { %p9711_p9 = por %p9710_p8, %p9709_p6 }
 0x200   : > { %p9705_p4 = pneg %p9704_p1 }
 0x202   : > { %p9712_p10 = pnand %p9711_p9, %p9705_p4 }
 0x204   : > { %9715 = shalt.err (!%p9712_p10)
}
 0x205   : > { %s11655_s1 = sld [smem:[#allocation69_spill]]  ;;  %s9939_s4 = smov [#allocation34]  }
 0x206   : > { %8747 = dma.hbm_to_vmem [thread:$0]  (!%p10141_p5), %s11654_s3, 16, %s10417_s5, [#allocation30]  }
 0x207   : > { %s1021_s10 = sshll.u32 %s9939_s4, 4  ;;  %s9940_s8 = smov [#allocation37]   ;;  %s1022_s10 = int_to_ptr.vmem [resolvable:$true] %s1021_s10 }
 0x208   : > { %s1045_s12 = sshll.u32 %s9940_s8, 4  ;;  %s10448_s12 = int_to_ptr.vmem [resolvable:$true] %s1045_s12 }
 0x20b   : > { %s9716_s9 = scalar_lea.hbm %s11655_s1, 16 }
 0x20c   : > { %p9717_p11 = scmp.ne.s32.totalorder %s11655_s1, %s9716_s9  ;;  %p9723_p13 = scmp.lt.u32.totalorder %s9716_s9, %s11655_s1 }
 0x20e   : > { %p9719_p12 = pnand %p9717_p11, %p10153_p7 }
 0x210   : > { %p9720_p2 = pneg %p9719_p12 }
 0x212   : > { %p9725_p0 = pnand %p9723_p13, %p9720_p2 }
 0x214   : > { %9728 = shalt.err (!%p9725_p0)
}
 0x215   : > { %s9729_s23 = scalar_lea.vmem %s1022_s10, 16  ;;  %s9736_s5 = scalar_lea.vmem %s1022_s10, 32 }
 0x216   : > { %p9730_p3 = scmp.ne.s32.totalorder %s1022_s10, %s9729_s23  ;;  %p9737_p6 = scmp.lt.s32.totalorder %s1022_s10, %s1022_s10 }
 0x217   : > { %p9738_p8 = scmp.lt.s32.totalorder %s9736_s5, %s9729_s23 }
 0x218   : > { %p9732_p1 = pnand %p9730_p3, %p10153_p7 }
 0x219   : > { %p9739_p9 = por %p9738_p8, %p9737_p6 }
 0x21a   : > { %p9733_p4 = pneg %p9732_p1 }
 0x21c   : > { %p9740_p10 = pnand %p9739_p9, %p9733_p4 }
 0x21e   : > { %9743 = shalt.err (!%p9740_p10)
}
 0x21f   : > { %s11656_s8 = sld [smem:[#allocation71_spill]] }
 0x220   : > { %8753 = dma.hbm_to_vmem [thread:$0]  (!%p10141_p5), %s11655_s1, 16, %s1022_s10, [#allocation33]  }
 0x225   : > { %s9744_s4 = scalar_lea.hbm %s11656_s8, 16 }
 0x226   : > { %p9745_p11 = scmp.ne.s32.totalorder %s11656_s8, %s9744_s4  ;;  %p9751_p13 = scmp.lt.u32.totalorder %s9744_s4, %s11656_s8 }
 0x228   : > { %p9747_p12 = pnand %p9745_p11, %p10153_p7 }
 0x22a   : > { %p9748_p2 = pneg %p9747_p12 }
 0x22c   : > { %p9753_p0 = pnand %p9751_p13, %p9748_p2 }
 0x22e   : > { %9756 = shalt.err (!%p9753_p0)
}
 0x22f   : > { %s9757_s9 = scalar_lea.vmem %s10448_s12, 16  ;;  %s9764_s23 = scalar_lea.vmem %s10448_s12, 32 }
 0x230   : > { %p9758_p3 = scmp.ne.s32.totalorder %s10448_s12, %s9757_s9  ;;  %p9765_p6 = scmp.lt.s32.totalorder %s10448_s12, %s10448_s12 }
 0x231   : > { %p9766_p8 = scmp.lt.s32.totalorder %s9764_s23, %s9757_s9 }
 0x232   : > { %p9760_p1 = pnand %p9758_p3, %p10153_p7 }
 0x233   : > { %p9767_p9 = por %p9766_p8, %p9765_p6 }
 0x234   : > { %p9761_p4 = pneg %p9760_p1 }
 0x236   : > { %p9768_p10 = pnand %p9767_p9, %p9761_p4 }
 0x238   : > { %9771 = shalt.err (!%p9768_p10)
}
 0x239   : > { %s11657_s10 = sld [smem:[#allocation72_spill]]  ;;  %s9941_s5 = smov [#allocation40]  }
 0x23a   : > { %8759 = dma.hbm_to_vmem [thread:$0]  (!%p10141_p5), %s11656_s8, 16, %s10448_s12, [#allocation36]  }
 0x23b   : > { %s1069_s4 = sshll.u32 %s9941_s5, 4  ;;  %s9942_s1 = smov [#allocation43]   ;;  %s1070_s4 = int_to_ptr.vmem [resolvable:$true] %s1069_s4 }
 0x23c   : > { %s1101_s3 = sshll.u32 %s9942_s1, 4  ;;  %s10476_s3 = int_to_ptr.vmem [resolvable:$true] %s1101_s3 }
 0x23f   : > { %s9772_s9 = scalar_lea.hbm %s11657_s10, 16 }
 0x240   : > { %p9773_p11 = scmp.ne.s32.totalorder %s11657_s10, %s9772_s9  ;;  %p9779_p13 = scmp.lt.u32.totalorder %s9772_s9, %s11657_s10 }
 0x242   : > { %p9775_p12 = pnand %p9773_p11, %p10153_p7 }
 0x244   : > { %p9776_p2 = pneg %p9775_p12 }
 0x246   : > { %p9781_p0 = pnand %p9779_p13, %p9776_p2 }
 0x248   : > { %9784 = shalt.err (!%p9781_p0)
}
 0x249   : > { %s9785_s23 = scalar_lea.vmem %s1070_s4, 16  ;;  %s9792_s12 = scalar_lea.vmem %s1070_s4, 32 }
 0x24a   : > { %p9786_p3 = scmp.ne.s32.totalorder %s1070_s4, %s9785_s23  ;;  %p9793_p6 = scmp.lt.s32.totalorder %s1070_s4, %s1070_s4 }
 0x24b   : > { %p9794_p8 = scmp.lt.s32.totalorder %s9792_s12, %s9785_s23 }
 0x24c   : > { %p9788_p1 = pnand %p9786_p3, %p10153_p7 }
 0x24d   : > { %p9795_p9 = por %p9794_p8, %p9793_p6 }
 0x24e   : > { %p9789_p4 = pneg %p9788_p1 }
 0x250   : > { %p9796_p10 = pnand %p9795_p9, %p9789_p4 }
 0x252   : > { %9799 = shalt.err (!%p9796_p10)
}
 0x253   : > { %8765 = dma.hbm_to_vmem [thread:$0]  (!%p10141_p5), %s11657_s10, 16, %s1070_s4, [#allocation39]  }
 0x254   : > { %s9800_s1 = scalar_lea.hbm %s10101_s6, 1024 }
 0x255   : > { %p9801_p11 = scmp.ne.s32.totalorder %s10101_s6, %s9800_s1  ;;  %p9807_p13 = scmp.lt.u32.totalorder %s9800_s1, %s10101_s6 }
 0x257   : > { %p9803_p12 = pnand %p9801_p11, %p10153_p7 }
 0x259   : > { %p9804_p2 = pneg %p9803_p12 }
 0x25b   : > { %p9809_p0 = pnand %p9807_p13, %p9804_p2 }
 0x25d   : > { %9812 = shalt.err (!%p9809_p0)
}
 0x25e   : > { %s9813_s5 = scalar_lea.vmem %s10476_s3, 1024  ;;  %p9821_p6 = scmp.lt.s32.totalorder %s10476_s3, %s10476_s3 }
 0x25f   : > { %p9814_p3 = scmp.ne.s32.totalorder %s10476_s3, %s9813_s5  ;;  %p9822_p8 = scmp.lt.s32.totalorder %s9813_s5, %s9813_s5 }
 0x261   : > { %p9816_p1 = pnand %p9814_p3, %p10153_p7  ;;  %p9823_p9 = por %p9822_p8, %p9821_p6 }
 0x263   : > { %p9817_p4 = pneg %p9816_p1 }
 0x265   : > { %p9824_p10 = pnand %p9823_p9, %p9817_p4 }
 0x267   : > { %9827 = shalt.err (!%p9824_p10)
}
 0x268   : > { %8771 = dma.hbm_to_vmem [thread:$0]  (!%p10141_p5), %s10101_s6, 1024, %s10476_s3, [#allocation42], %s11649_s11, %s11649_s11, %s11648_s16  }
 0x269   : > { %p11658_p11 = scmp.ne.s32.totalorder %s11643_s7, 0 }
 0x26a   : > { %p11659_p7 = scmp.eq.s32.totalorder (!%p11658_p11), %s10124_s2, 0 }
 0x26b   : > { %1141 = sbr.rel (%p11658_p11) target bundleno = 5773 (0x168d), region = 144 }
 0x272   : > { %9833 = dma.done.wait (%p11659_p7), [#allocation10], 576   ;;  %p11660_p12 = pmov %p11659_p7 }
 0x273   : > { %p11661_p2 = pmov %p11659_p7 }
 0x274   : > { %9835 = vsyncadd (%p11660_p12), [#allocation10], 4294966720 }
 0x275   : > { %9837 = dma.done.wait (%p11661_p2), [#allocation12], 3088   ;;  %p11662_p13 = pmov %p11661_p2 }
 0x276   : > { %p11663_p0 = pmov %p11661_p2 }
 0x277   : > { %9839 = vsyncadd (%p11662_p13), [#allocation12], 4294964208 }
 0x278   : > { %9841 = dma.done.wait (%p11663_p0), [#allocation15], 3088   ;;  %p11664_p5 = pmov %p11663_p0 }
 0x279   : > { %p11665_p3 = pmov %p11663_p0 }
 0x27a   : > { %9843 = vsyncadd (%p11664_p5), [#allocation15], 4294964208 }
 0x27b   : > { %9845 = dma.done.wait (%p11665_p3), [#allocation18], 3088   ;;  %p11666_p1 = pmov %p11663_p0 }
 0x27c   : > { %p11667_p4 = pmov %p11663_p0 }
 0x27d   : > { %9847 = vsyncadd (%p11666_p1), [#allocation18], 4294964208 }
 0x27e   : > { %9849 = dma.done.wait (%p11667_p4), [#allocation21], 3088   ;;  %p11668_p6 = pmov %p11663_p0 }
 0x27f   : > { %p11669_p8 = pmov %p11663_p0 }
 0x280   : > { %9851 = vsyncadd (%p11668_p6), [#allocation21], 4294964208 }
 0x281   : > { %9853 = dma.done.wait (%p11669_p8), [#allocation24], 4112   ;;  %p11670_p9 = pmov %p11663_p0 }
 0x282   : > { %p11671_p10 = pmov %p11663_p0 }
 0x283   : > { %9855 = vsyncadd (%p11670_p9), [#allocation24], 4294963184 }
 0x284   : > { %9857 = dma.done.wait (%p11671_p10), [#allocation27], 1088   ;;  %p11672_p11 = pmov %p11663_p0 }
 0x285   : > { %p11673_p7 = pmov %p11663_p0 }
 0x286   : > { %9859 = vsyncadd (%p11672_p11), [#allocation27], 4294966208 }
 0x287   : > { %9861 = dma.done.wait (%p11673_p7), [#allocation30], 32   ;;  %p11674_p12 = pmov %p11663_p0 }
 0x288   : > { %p11675_p2 = pmov %p11663_p0 }
 0x289   : > { %9863 = vsyncadd (%p11674_p12), [#allocation30], 4294967264 }
 0x28a   : > { %9865 = dma.done.wait (%p11675_p2), [#allocation33], 3088   ;;  %p11676_p13 = pmov %p11663_p0 }
 0x28c   : > { %9867 = vsyncadd (%p11676_p13), [#allocation33], 4294964208 }
 0x28d   : > { %9869 = dma.done.wait (%p11663_p0), [#allocation36], 3088   ;;  %p11677_p5 = pmov %p11663_p0 }
 0x28e   : > { %p11678_p3 = pmov %p11663_p0 }
 0x28f   : > { %9871 = vsyncadd (%p11677_p5), [#allocation36], 4294964208 }
 0x290   : > { %9873 = dma.done.wait (%p11678_p3), [#allocation39], 3088   ;;  %p11679_p1 = pmov %p11663_p0 }
 0x291   : > { %p11680_p4 = pmov %p11663_p0 }
 0x292   : > { %9875 = vsyncadd (%p11679_p1), [#allocation39], 4294964208 }
 0x293   : > { %9877 = dma.done.wait (%p11680_p4), [#allocation42], 1088   ;;  %p11681_p6 = pmov %p11663_p0 }
 0x294   : > { %s11682_s7 = sld [smem:[#allocation56_spill]]  ;;  %v9943_v0 = vmov 0.0   ;;  %p1321_p8 = scmp.lt.s32.totalorder %s10124_s2, 1  ;;  %vm1359_vm0 = vcmask 1040384   ;;  %vm9944_vm1 = vmmov 0   ;;  %vm1342_vm4 = vcmask 188416  }
 0x295   : > { %9879 = vsyncadd (%p11681_p6), [#allocation42], 4294966208  ;;  %7684 = vmatprep.subr.bf16.mxu0 %v9943_v0  ;;  %7708 = vmatprep.subr.bf16.mxu1 %v9943_v0  ;;  %vm1348_vm2 = vsmask.f32 7938  ;;  %s11685_s18 = sld [smem:[#allocation57_spill]]  ;;  %vm1460_vm5 = vcmask 1043456  }
 0x296   : > { %7688 = vmatprep.mubr.msk.bf16.mxu0 %vm9944_vm1, %v9943_v0  ;;  %7712 = vmatprep.mubr.msk.bf16.mxu1 %vm9944_vm1, %v9943_v0  ;;  %s11704_s2 = smov (!%p1321_p8, %s10124_s2), 1  ;;  %vm10566_vm3 = vmand %vm1359_vm0, %vm1348_vm2  ;;  %vm1343_vm6 = vsmask.f32 256  ;;  %v8890_v3 = vld [vmem:[#allocation9 + $0xc] sm:$0xff]   ;;  %vm1456_vm8 = vcmask 195584   ;;  %v8892_v27 = vld [vmem:[#allocation9] sm:$0xff]  }
 0x297   : > { %s10570_s0 = sshll.u32 %s11704_s2, 3  ;;  %vm10576_vm7 = vmand %vm1342_vm4, %vm1348_vm2  ;;  %v1365_v4 = vld [vmem:[#allocation4 + $0x4] sm:$0x1]  ;;  %v1371_v5 = vld [vmem:[#allocation5 + $0x4] sm:$0x1]  ;;  %7685 = vmatpush3.bf16.msra.mxu0 %v8890_v3  ;;  %7709 = vmatpush3.bf16.msra.mxu1 %v8890_v3  ;;  %vm1412_vm10 = vcmask 191488  }
 0x298   : > { %v1392_v6 = vld [vmem:[#allocation8 + $0x4] sm:$0x1]  ;;  %v1366_v7 = vsel %vm10566_vm3, 0, %v1365_v4  ;;  %v1372_v8 = vsel %vm10566_vm3, 0, %v1371_v5  ;;  %vm10590_vm9 = vmand %vm1342_vm4, %vm1343_vm6  ;;  %7686 = vmatprep.subr.bf16.mxu0 %v9943_v0  ;;  %v8891_v12 = vld [vmem:[#allocation9 + $0x14] ss:$0 sps:$4 sm:$0xff]   ;;  %7710 = vmatprep.subr.bf16.mxu1 %v9943_v0  ;;  %s1336_s12 = scalar_lea.vmem %s10111_s24, %s10570_s0 }
 0x299   : > { %v1393_v9 = vsel %vm10566_vm3, 0, %v1392_v6  ;;  %1373 = vst [vmem:[#allocation5 + $0x4] sm:$0x1] %v1372_v8  ;;  %1367 = vst [vmem:[#allocation4 + $0x4] sm:$0x1] %v1366_v7  ;;  %v1462_v20 = vsel %vm1460_vm5, %v8891_v12, 0 }
 0x29a   : > { %s1324_s16 = scalar_lea.vmem %s11682_s7, %s10570_s0  ;;  %1394 = vst [vmem:[#allocation8 + $0x4] sm:$0x1] %v1393_v9  ;;  %v1345_v13 = vld [vmem:[#allocation2] sm:$0x1]  ;;  %v1350_v14 = vld [vmem:[#allocation2 + $0x4] sm:$0x1]  ;;  %vm10618_vm11 = vmand %vm1412_vm10, %vm1348_vm2 }
 0x29b   : > { %s1328_s2 = scalar_lea.vmem %s11685_s18, %s10570_s0  ;;  %v1395_v11 = vld [vmem:[%s1324_s16] sm:$0xff]  ;;  %v1346_v16 = vsel %vm10590_vm9, 0, %v1345_v13  ;;  %v1351_v17 = vsel %vm10576_vm7, 0, %v1350_v14  ;;  %v1353_v18 = vld [vmem:[#allocation3] sm:$0x1]  ;;  %7687 = vmatpush3.bf16.msra.mxu0 %v1462_v20  ;;  %7711 = vmatpush3.bf16.msra.mxu1 %v1462_v20  ;;  %v8894_v34 = vld [vmem:[#allocation9 + $0x18] sm:$0xff]   ;;  %s1340_s16 = scalar_lea.vmem %s10116_s14, %s10570_s0 }
 0x29c   : > { %v10595_v15 = vpack.c.bf16 %v1395_v11, %v1395_v11  ;;  %v1356_v19 = vld [vmem:[#allocation3 + $0x4] sm:$0x1]  ;;  %1347 = vst [vmem:[#allocation2] sm:$0x1] %v1346_v16  ;;  %1352 = vst [vmem:[#allocation2 + $0x4] sm:$0x1] %v1351_v17  ;;  %7692 = vmatprep.subr.bf16.mxu0 %v9943_v0  ;;  %7724 = vmatprep.subr.bf16.mxu1 %v9943_v0 }
 0x29d   : > { %v1354_v21 = vsel %vm10590_vm9, 0, %v1353_v18  ;;  %v1357_v22 = vsel %vm10576_vm7, 0, %v1356_v19  ;;  %v1397_v23 = vld [vmem:[%s1328_s2] sm:$0xff]  ;;  %v8895_v35 = vld [vmem:[#allocation9 + $0x20] ss:$0 sps:$4 sm:$0xff]   ;;  %v10657_v55 = vld [vmem:[#allocation13 + $0x50] sm:$0xff]  }
 0x29e   : > { %v1403_v24 = vshrl.u32 %v10595_v15, 16  ;;  %1355 = vst [vmem:[#allocation3] sm:$0x1] %v1354_v21  ;;  %1358 = vst [vmem:[#allocation3 + $0x4] sm:$0x1] %v1357_v22  ;;  %v1398_v25 = vpack.c.bf16 %v1397_v23, %v1397_v23  ;;  %v1406_v26 = vshll.u32 %v10595_v15, 16  ;;  %7689 = vmatmul.mubr.msk.bf16.vlgmr.msra.gmra.mrb[0].mxu0 %vm1456_vm8, %v10595_v15 }
 0x29f   : > { %v8893_v29 = vld [vmem:[#allocation9 + $0x8] ss:$0 sps:$4 sm:$0xff]   ;;  %7693 = vmatpush3.bf16.msra.mxu0 %v8892_v27  ;;  %7696 = vmatprep.mubr.msk.bf16.mxu0 %vm9944_vm1, %v9943_v0  ;;  %v1576_v43 = vsel %vm1460_vm5, %v8895_v35, 0  ;;  %v8898_v54 = vld [vmem:[#allocation13 + $0x48] sm:$0xff]   ;;  %v10659_v56 = vld [vmem:[#allocation13 + $0x58] sm:$0xff]   ;;  %vm1374_vm14 = vcmask 122880  }
 0x2a0   : > { %v1405_v28 = vrot.slane %v1403_v24, 7  ;;  %v1424_v30 = vshrl.u32 %v1398_v25, 16  ;;  %v1427_v31 = vshll.u32 %v1398_v25, 16  ;;  %7713 = vmatmul.mubr.msk.bf16.vlgmr.msra.gmra.mrb[0].mxu1 %vm1456_vm8, %v1398_v25  ;;  %7694 = vmatprep.subr.bf16.mxu0 %v9943_v0  ;;  %v1517_v38 = vsel %vm1460_vm5, %v8893_v29, 0  ;;  %v8897_v53 = vld [vmem:[#allocation13 + $0x40] sm:$0xff]   ;;  %vm10665_vm12 = vmand %vm1359_vm0, %vm1343_vm6  ;;  %v10675_v59 = vld [vmem:[#allocation13 + $0x68] sm:$0xff]  }
 0x2a1   : > { %7725 = vmatpush3.bf16.msra.mxu1 %v8894_v34  ;;  %7728 = vmatprep.mubr.msk.bf16.mxu1 %vm9944_vm1, %v9943_v0  ;;  %v10671_v58 = vld [vmem:[#allocation13 + $0x60] sm:$0xff]   ;;  %v1361_v60 = vld [vmem:[#allocation4] sm:$0x1]  ;;  %v10688_v2 = vld [vmem:[#allocation13 + $0x78] sm:$0xff]   ;;  %s11696_s11 = sld [smem:[#allocation66_spill]]  ;;  %s9945_s4 = smov 112  }
 0x2a2   : > { %v1408_v32 = vor.u32 %v1406_v26, %v1405_v28  ;;  %v1409_v33 = vrot.slane %v1405_v28, 4  ;;  %v1426_v36 = vrot.slane %v1424_v30, 7  ;;  %7726 = vmatprep.subr.bf16.mxu1 %v9943_v0  ;;  %v1362_v61 = vsel %vm10665_vm12, 0, %v1361_v60  ;;  %v10681_v62 = vld [vmem:[#allocation13 + $0x70] sm:$0xff]   ;;  %v10683_v63 = vld [vmem:[#allocation13] sm:$0xff]   ;;  %v10691_v3 = vld [vmem:[#allocation13 + $0x8] sm:$0xff]  }
 0x2a3   : > { %v1414_v39 = vld [vmem:[#allocation2] sm:$0xf]  ;;  %v1417_v40 = vld [vmem:[#allocation2 + $0x4] sm:$0x1]  ;;  %7695 = vmatpush3.bf16.msra.mxu0 %v1517_v38  ;;  %1363 = vst [vmem:[#allocation4] sm:$0x1] %v1362_v61  ;;  %vm10742_vm13 = vmand %vm1460_vm5, %vm1348_vm2 }
 0x2a4   : > { %v1429_v41 = vor.u32 %v1427_v31, %v1426_v36  ;;  %v1430_v42 = vrot.slane %v1426_v36, 4  ;;  %v1415_v44 = vsel %vm10618_vm11, %v1408_v32, %v1414_v39  ;;  %v1418_v45 = vsel %vm10590_vm9, %v1409_v33, %v1417_v40  ;;  %7700 = vmatprep.subr.bf16.mxu0 %v9943_v0  ;;  %v10697_v4 = vld [vmem:[#allocation13 + $0x10] sm:$0xff]   ;;  %v10701_v5 = vld [vmem:[#allocation13 + $0x18] sm:$0xff]   ;;  %v10707_v8 = vld [vmem:[#allocation13 + $0x20] sm:$0xff]   ;;  %s11699_s3 = sld [smem:[#allocation58_spill]]  ;;  %s9946_s23 = smov 32  }
 0x2a5   : > { %v1433_v46 = vld [vmem:[#allocation3] sm:$0xf]  ;;  %v1436_v47 = vld [vmem:[#allocation3 + $0x4] sm:$0x1]  ;;  %1416 = vst [vmem:[#allocation2] sm:$0xf] %v1415_v44  ;;  %7727 = vmatpush3.bf16.msra.mxu1 %v1576_v43  ;;  %vm11000_vm15 = vmand %vm1374_vm14, %vm1343_vm6 }
 0x2a6   : > { %1419 = vst [vmem:[#allocation2 + $0x4] sm:$0x1] %v1418_v45  ;;  %v1434_v48 = vsel %vm10618_vm11, %v1429_v41, %v1433_v46  ;;  %v1437_v49 = vsel %vm10590_vm9, %v1430_v42, %v1436_v47  ;;  %7752 = vmatprep.subr.bf16.mxu1 %v9943_v0  ;;  %v1368_v6 = vld [vmem:[#allocation5] sm:$0x1]  ;;  %v10711_v9 = vld [vmem:[#allocation13 + $0x28] sm:$0xff]   ;;  %v10715_v10 = vld [vmem:[#allocation13 + $0x30] sm:$0xff]  }
 0x2a7   : > { %1435 = vst [vmem:[#allocation3] sm:$0xf] %v1434_v48  ;;  %1438 = vst [vmem:[#allocation3 + $0x4] sm:$0x1] %v1437_v49  ;;  %v1369_v7 = vsel %vm10665_vm12, 0, %v1368_v6  ;;  %v10719_v11 = vld [vmem:[#allocation13 + $0x38] sm:$0xff]  }
 0x2a8   : > { %1370 = vst [vmem:[#allocation5] sm:$0x1] %v1369_v7  ;;  %v6852_v30 = vld [vmem:[#allocation11] ss:$0 sm:$0xff]  ;;  %v10725_v37 = vld [vmem:[#allocation13 + $0x80] sm:$0xff]   ;;  %v10734_v44 = vld [vmem:[#allocation13 + $0x88] sm:$0xff]  }
 0x2a9   : > { %v10747_v60 = vld [vmem:[#allocation13 + $0x90] sm:$0xff]   ;;  %vm1379_vm0 = vmand %vm1374_vm14, %vm1348_vm2  ;;  %vm3909_vm4 = vcmask 130048   ;;  %vm3929_vm5 = vcmask 125952   ;;  %s11700_s1 = sld [smem:[#allocation73_spill]]  ;;  %s11701_s5 = sld [smem:[#allocation75_spill]]  ;;  %vm6418_vm7 = vcmask 785408  }
 0x2aa   : > { %s1332_s9 = scalar_lea.vmem %s11699_s3, %s10570_s0  ;;  %vm3930_vm6 = vmand %vm3929_vm5, %vm1348_vm2  ;;  %v9052_v1 = vld [vmem:[#allocation32 + $0x20] sm:$0xff]   ;;  %vm3911_vm2 = vcmask 261120   ;;  %s11702_s7 = sld [smem:[#allocation74_spill]] }
 0x2ab   : > { %s9947_s18 = smov 48  }
 0x2ad   : > { %v8896_v50 = vld [vmem:[#allocation2] sm:$0x1e]  }
 0x2ae   : > { %v1439_v51 = vld [vmem:[#allocation3] sm:$0xf]  ;;  %v1706_v52 = vrot.slane %v8896_v50, 1  ;;  %v1779_v50 = vld [vmem:[#allocation4] sm:$0xf] }
 0x2af   : > { %7697 = vmatmul.mubr.msk.bf16.vlgmr.msra.gmra.mrb[4].mxu0 %vm1456_vm8, %v1439_v51  ;;  %v1782_v51 = vld [vmem:[#allocation4 + $0x4] sm:$0x1] }
 0x2b0   : > { %7701 = vmatpush3.bf16.msra.mxu0 %v8894_v34  ;;  %7704 = vmatprep.mubr.msk.bf16.mxu0 %vm9944_vm1, %v9943_v0 }
 0x2b1   : > { %7702 = vmatprep.subr.bf16.mxu0 %v9943_v0  ;;  %7729 = vmatmul.mubr.msk.bf16.vlgmr.msra.gmra.mrb[4].mxu1 %vm1456_vm8, %v1706_v52 }
 0x2b2   : > { %7768 = vmatprep.mubr.msk.bf16.mxu1 %vm9944_vm1, %v9943_v0  ;;  %7753 = vmatpush3.bf16.msra.mxu1 %v10683_v63 }
 0x2b3   : > { %7754 = vmatprep.subr.bf16.mxu1 %v9943_v0 }
 0x2b4   : > { %7703 = vmatpush3.bf16.msra.mxu0 %v1576_v43 }
 0x2b5   : > { %7716 = vmatprep.subr.bf16.mxu0 %v9943_v0 }
 0x2b6   : > { %7755 = vmatpush3.bf16.msra.mxu1 %v10691_v3 }
 0x2b7   : > { %7705 = vmatmul.mubr.msk.bf16.vlgmr.msra.gmra.mrb[8].mxu0 %vm1456_vm8, %v1398_v25  ;;  %7756 = vmatprep.subr.bf16.mxu1 %v9943_v0 }
 0x2b8   : > { %7717 = vmatpush3.bf16.msra.mxu0 %v8892_v27  ;;  %7720 = vmatprep.mubr.msk.bf16.mxu0 %vm9944_vm1, %v9943_v0 }
 0x2b9   : > { %7718 = vmatprep.subr.bf16.mxu0 %v9943_v0 }
 0x2ba   : > { %7757 = vmatpush3.bf16.msra.mxu1 %v10697_v4 }
 0x2bb   : > { %7758 = vmatprep.subr.bf16.mxu1 %v9943_v0 }
 0x2bc   : > { %7719 = vmatpush3.bf16.msra.mxu0 %v1517_v38 }
 0x2bd   : > { %7732 = vmatprep.subr.bf16.mxu0 %v9943_v0 }
 0x2be   : > { %7759 = vmatpush3.bf16.msra.mxu1 %v10701_v5 }
 0x2bf   : > { %7721 = vmatmul.mubr.msk.bf16.vlgmr.msra.gmra.mrb[12].mxu0 %vm1456_vm8, %v10595_v15  ;;  %7760 = vmatprep.subr.bf16.mxu1 %v9943_v0 }
 0x2c0   : > { %7733 = vmatpush3.bf16.msra.mxu0 %v8897_v53  ;;  %7748 = vmatprep.mubr.msk.bf16.mxu0 %vm9944_vm1, %v9943_v0 }
 0x2c1   : > { %7734 = vmatprep.subr.bf16.mxu0 %v9943_v0 }
 0x2c2   : > { %7761 = vmatpush3.bf16.msra.mxu1 %v10707_v8 }
 0x2c3   : > { %7762 = vmatprep.subr.bf16.mxu1 %v9943_v0 }
 0x2c4   : > { %7735 = vmatpush3.bf16.msra.mxu0 %v8898_v54 }
 0x2c5   : > { %7736 = vmatprep.subr.bf16.mxu0 %v9943_v0 }
 0x2c6   : > { %7763 = vmatpush3.bf16.msra.mxu1 %v10711_v9 }
 0x2c7   : > { %7764 = vmatprep.subr.bf16.mxu1 %v9943_v0 }
 0x2c8   : > { %7737 = vmatpush3.bf16.msra.mxu0 %v10657_v55 }
 0x2c9   : > { %7738 = vmatprep.subr.bf16.mxu0 %v9943_v0 }
 0x2ca   : > { %7765 = vmatpush3.bf16.msra.mxu1 %v10715_v10 }
 0x2cb   : > { %7766 = vmatprep.subr.bf16.mxu1 %v9943_v0 }
 0x2cc   : > { %7739 = vmatpush3.bf16.msra.mxu0 %v10659_v56 }
 0x2cd   : > { %7740 = vmatprep.subr.bf16.mxu0 %v9943_v0 }
 0x2ce   : > { %7767 = vmatpush3.bf16.msra.mxu1 %v10719_v11 }
 0x2cf   : > { %7792 = vmatprep.subr.bf16.mxu1 %v9943_v0 }
 0x2d0   : > { %7741 = vmatpush3.bf16.msra.mxu0 %v10671_v58 }
 0x2d1   : > { %7742 = vmatprep.subr.bf16.mxu0 %v9943_v0 }
 0x2d4   : > { %7743 = vmatpush3.bf16.msra.mxu0 %v10675_v59 }
 0x2d5   : > { %7744 = vmatprep.subr.bf16.mxu0 %v9943_v0 }
 0x2d8   : > { %7745 = vmatpush3.bf16.msra.mxu0 %v10681_v62 }
 0x2d9   : > { %7746 = vmatprep.subr.bf16.mxu0 %v9943_v0 }
 0x2dc   : > { %7747 = vmatpush3.bf16.msra.mxu0 %v10688_v2 }
 0x2dd   : > { %7772 = vmatprep.subr.bf16.mxu0 %v9943_v0 }
 0x371   : > { %v1498_v12 = vpop.f32.mrb[0].mxu0 }
 0x372   : > { %v7690_v14 = vpop.f32.mrb[1].mxu0 }
 0x373   : > { %v1653_v13 = vpop.f32.mrb[0].mxu1  ;;  %v1501_v16 = vpop.f32.mrb[2].mxu0 }
 0x374   : > { %v7714_v15 = vpop.f32.mrb[1].mxu1  ;;  %v7691_v18 = vpop.f32.mrb[3].mxu0 }
 0x375   : > { %v1656_v17 = vpop.f32.mrb[2].mxu1  ;;  %v1801_v18 = vld [vmem:[#allocation5 + $0x4] sm:$0x1] }
 0x376   : > { %v7715_v19 = vpop.f32.mrb[3].mxu1  ;;  %v1798_v17 = vld [vmem:[#allocation5] sm:$0xf] }
 0x377   : > { %v10767_v19 = vld [vmem:[#allocation13 + $0xa0] sm:$0xff]  }
 0x382   : > { %v1553_v20 = vpop.f32.mrb[4].mxu0 }
 0x383   : > { %v1554_v21 = vadd.f32 %v1553_v20, %v1498_v12  ;;  %v7698_v22 = vpop.f32.mrb[5].mxu0 }
 0x384   : > { %v1556_v23 = vpop.f32.mrb[6].mxu0  ;;  %v1744_v24 = vpop.f32.mrb[4].mxu1 }
 0x385   : > { %v7699_v25 = vpop.f32.mrb[7].mxu0  ;;  %v7730_v26 = vpop.f32.mrb[5].mxu1 }
 0x386   : > { %v1747_v27 = vpop.f32.mrb[6].mxu1  ;;  %v8919_v25 = vld [vmem:[#allocation13 + $0xb0] sm:$0xff]  }
 0x387   : > { %v7731_v28 = vpop.f32.mrb[7].mxu1  ;;  %v8920_v27 = vld [vmem:[#allocation13 + $0xb8] sm:$0xff]  }
 0x388   : > { %v9182_v28 = vld [vmem:[#allocation13 + $0x40] sm:$0xff]  }
 0x38a   : > { %v1612_v29 = vpop.f32.mrb[8].mxu0 }
 0x38b   : > { %v1618_v31 = vadd.f32 %v1612_v29, %v1554_v21  ;;  %v7706_v32 = vpop.f32.mrb[9].mxu0  ;;  %v9183_v29 = vld [vmem:[#allocation13 + $0x48] sm:$0xff]  }
 0x38c   : > { %v1615_v33 = vpop.f32.mrb[10].mxu0  ;;  %v8944_v32 = vld [vmem:[#allocation16 + $0x30] sm:$0xff]  }
 0x38d   : > { %v1758_v34 = vadd.f32 %v6852_v30, %v1618_v31  ;;  %v7707_v35 = vpop.f32.mrb[11].mxu0  ;;  %v8943_v31 = vld [vmem:[#allocation16 + $0x28] sm:$0xff]   ;;  %v8945_v33 = vld [vmem:[#allocation16 + $0x38] sm:$0xff]  }
 0x38f   : > { %v10723_v36 = vmax.f32 %v1758_v34, 0.0 }
 0x391   : > { %v10729_v38 = vpack.c.bf16 %v10723_v36, %v10723_v36 }
 0x392   : > { %v1693_v39 = vpop.f32.mrb[12].mxu0 }
 0x393   : > { %v1768_v40 = vshrl.u32 %v10729_v38, 16  ;;  %v1694_v41 = vadd.f32 %v1693_v39, %v1653_v13  ;;  %v7722_v42 = vpop.f32.mrb[13].mxu0  ;;  %7749 = vmatmul.mubr.bf16.vlgmr.msra.gmra.mrb[16].mxu0 %v10729_v38  ;;  %v1771_v46 = vshll.u32 %v10729_v38, 16  ;;  %v10761_v13 = vld [vmem:[#allocation13 + $0x98] sm:$0xff]  }
 0x394   : > { %7773 = vmatpush3.bf16.msra.mxu0 %v10725_v37  ;;  %v1696_v43 = vpop.f32.mrb[14].mxu0  ;;  %7788 = vmatprep.mubr.msk.bf16.mxu0 %vm9944_vm1, %v9943_v0 }
 0x395   : > { %v1770_v45 = vrot.slane %v1768_v40, 7  ;;  %v1750_v47 = vadd.f32 %v1744_v24, %v1694_v41  ;;  %v7723_v48 = vpop.f32.mrb[15].mxu0  ;;  %7774 = vmatprep.subr.bf16.mxu0 %v9943_v0  ;;  %v8917_v24 = vld [vmem:[#allocation13 + $0xa8] sm:$0xff]  }
 0x397   : > { %v1773_v52 = vor.u32 %v1771_v46, %v1770_v45  ;;  %v1774_v53 = vrot.slane %v1770_v45, 4  ;;  %v1759_v54 = vadd.f32 %v6852_v30, %v1750_v47  ;;  %v8942_v30 = vld [vmem:[#allocation16 + $0x20] sm:$0xff]   ;;  %v6880_v45 = vld [vmem:[#allocation14] ss:$0 sm:$0xff] }
 0x398   : > { %7775 = vmatpush3.bf16.msra.mxu0 %v10734_v44 }
 0x399   : > { %v1780_v61 = vsel %vm10742_vm13, %v1773_v52, %v1779_v50  ;;  %v1783_v6 = vsel %vm10665_vm12, %v1774_v53, %v1782_v51  ;;  %v10753_v7 = vmax.f32 %v1759_v54, 0.0  ;;  %7776 = vmatprep.subr.bf16.mxu0 %v9943_v0  ;;  %v8930_v54 = vld [vmem:[#allocation16 + $0x80] sm:$0xff]  }
 0x39a   : > { %1781 = vst [vmem:[#allocation4] sm:$0xf] %v1780_v61  ;;  %1784 = vst [vmem:[#allocation4 + $0x4] sm:$0x1] %v1783_v6  ;;  %v8931_v61 = vld [vmem:[#allocation16 + $0x88] sm:$0xff]   ;;  %v8932_v6 = vld [vmem:[#allocation16 + $0x90] sm:$0xff]  }
 0x39b   : > { %v10758_v12 = vpack.c.bf16 %v10753_v7, %v10753_v7 }
 0x39c   : > { %7777 = vmatpush3.bf16.msra.mxu0 %v10747_v60 }
 0x39d   : > { %v1789_v14 = vshrl.u32 %v10758_v12, 16  ;;  %7778 = vmatprep.subr.bf16.mxu0 %v9943_v0  ;;  %v1792_v16 = vshll.u32 %v10758_v12, 16 }
 0x39f   : > { %v1791_v15 = vrot.slane %v1789_v14, 7 }
 0x3a0   : > { %7779 = vmatpush3.bf16.msra.mxu0 %v10761_v13 }
 0x3a1   : > { %v1794_v20 = vor.u32 %v1792_v16, %v1791_v15  ;;  %v1795_v21 = vrot.slane %v1791_v15, 4  ;;  %7780 = vmatprep.subr.bf16.mxu0 %v9943_v0 }
 0x3a3   : > { %v1799_v22 = vsel %vm10742_vm13, %v1794_v20, %v1798_v17  ;;  %v1802_v23 = vsel %vm10665_vm12, %v1795_v21, %v1801_v18  ;;  %v8937_v17 = vld [vmem:[#allocation16 + $0xa8] sm:$0xff]  }
 0x3a4   : > { %1800 = vst [vmem:[#allocation5] sm:$0xf] %v1799_v22  ;;  %1803 = vst [vmem:[#allocation5 + $0x4] sm:$0x1] %v1802_v23  ;;  %7781 = vmatpush3.bf16.msra.mxu0 %v10767_v19 }
 0x3a5   : > { %7782 = vmatprep.subr.bf16.mxu0 %v9943_v0 }
 0x3a8   : > { %7783 = vmatpush3.bf16.msra.mxu0 %v8917_v24 }
 0x3a9   : > { %7784 = vmatprep.subr.bf16.mxu0 %v9943_v0 }
 0x3ab   : > { %v1804_v26 = vld [vmem:[#allocation5] sm:$0xf] }
 0x3ac   : > { %7785 = vmatpush3.bf16.msra.mxu0 %v8919_v25  ;;  %7769 = vmatmul.mubr.bf16.vlgmr.msra.gmra.mrb[8].mxu1 %v1804_v26 }
 0x3ad   : > { %7793 = vmatpush3.bf16.msra.mxu1 %v9182_v28  ;;  %7786 = vmatprep.subr.bf16.mxu0 %v9943_v0 }
 0x3ae   : > { %7794 = vmatprep.subr.bf16.mxu1 %v9943_v0  ;;  %7808 = vmatprep.mubr.msk.bf16.mxu1 %vm9944_vm1, %v9943_v0 }
 0x3b0   : > { %7787 = vmatpush3.bf16.msra.mxu0 %v8920_v27 }
 0x3b1   : > { %7795 = vmatpush3.bf16.msra.mxu1 %v9183_v29  ;;  %7812 = vmatprep.subr.bf16.mxu0 %v9943_v0 }
 0x3b2   : > { %7796 = vmatprep.subr.bf16.mxu1 %v9943_v0 }
 0x3b3   : > { %7789 = vmatmul.mubr.bf16.vlgmr.msra.gmra.mrb[20].mxu0 %v10758_v12 }
 0x3b4   : > { %7813 = vmatpush3.bf16.msra.mxu0 %v10683_v63  ;;  %7828 = vmatprep.mubr.msk.bf16.mxu0 %vm9944_vm1, %v9943_v0  ;;  %v8925_v63 = vld [vmem:[#allocation16 + $0x58] sm:$0xff]  }
 0x3b5   : > { %7797 = vmatpush3.bf16.msra.mxu1 %v10657_v55  ;;  %7814 = vmatprep.subr.bf16.mxu0 %v9943_v0  ;;  %v8921_v55 = vld [vmem:[#allocation4] sm:$0x1e]  }
 0x3b6   : > { %7798 = vmatprep.subr.bf16.mxu1 %v9943_v0 }
 0x3b8   : > { %7815 = vmatpush3.bf16.msra.mxu0 %v10691_v3  ;;  %v8927_v3 = vld [vmem:[#allocation16 + $0x68] sm:$0xff]  }
 0x3b9   : > { %7799 = vmatpush3.bf16.msra.mxu1 %v10659_v56  ;;  %7816 = vmatprep.subr.bf16.mxu0 %v9943_v0  ;;  %v8922_v56 = vld [vmem:[#allocation16 + $0x40] sm:$0xff]  }
 0x3ba   : > { %7800 = vmatprep.subr.bf16.mxu1 %v9943_v0 }
 0x3bc   : > { %7817 = vmatpush3.bf16.msra.mxu0 %v10697_v4  ;;  %v8928_v4 = vld [vmem:[#allocation16 + $0x70] sm:$0xff]  }
 0x3bd   : > { %7801 = vmatpush3.bf16.msra.mxu1 %v10671_v58  ;;  %7818 = vmatprep.subr.bf16.mxu0 %v9943_v0  ;;  %v2207_v58 = vrot.slane %v8921_v55, 1 }
 0x3be   : > { %7802 = vmatprep.subr.bf16.mxu1 %v9943_v0 }
 0x3c0   : > { %7819 = vmatpush3.bf16.msra.mxu0 %v10701_v5  ;;  %v8929_v5 = vld [vmem:[#allocation16 + $0x78] sm:$0xff]  }
 0x3c1   : > { %7803 = vmatpush3.bf16.msra.mxu1 %v10675_v59  ;;  %7820 = vmatprep.subr.bf16.mxu0 %v9943_v0  ;;  %v8923_v59 = vld [vmem:[#allocation16 + $0x48] sm:$0xff]  }
 0x3c2   : > { %7804 = vmatprep.subr.bf16.mxu1 %v9943_v0 }
 0x3c4   : > { %7821 = vmatpush3.bf16.msra.mxu0 %v10707_v8  ;;  %v8934_v8 = vld [vmem:[#allocation16] sm:$0xff]  }
 0x3c5   : > { %7805 = vmatpush3.bf16.msra.mxu1 %v10681_v62  ;;  %7822 = vmatprep.subr.bf16.mxu0 %v9943_v0  ;;  %v8924_v62 = vld [vmem:[#allocation16 + $0x50] sm:$0xff]  }
 0x3c6   : > { %7806 = vmatprep.subr.bf16.mxu1 %v9943_v0 }
 0x3c8   : > { %7823 = vmatpush3.bf16.msra.mxu0 %v10711_v9  ;;  %v8936_v9 = vld [vmem:[#allocation16 + $0x8] sm:$0xff]  }
 0x3c9   : > { %7807 = vmatpush3.bf16.msra.mxu1 %v10688_v2  ;;  %7824 = vmatprep.subr.bf16.mxu0 %v9943_v0  ;;  %v8926_v2 = vld [vmem:[#allocation16 + $0x60] sm:$0xff]  }
 0x3ca   : > { %7832 = vmatprep.subr.bf16.mxu1 %v9943_v0 }
 0x3cc   : > { %7809 = vmatmul.mubr.bf16.vlgmr.msra.gmra.mrb[12].mxu1 %v10758_v12  ;;  %7825 = vmatpush3.bf16.msra.mxu0 %v10715_v10  ;;  %v8938_v10 = vld [vmem:[#allocation16 + $0x10] sm:$0xff]   ;;  %v8933_v12 = vld [vmem:[#allocation16 + $0x98] sm:$0xff]  }
 0x3cd   : > { %7833 = vmatpush3.bf16.msra.mxu1 %v10725_v37  ;;  %7826 = vmatprep.subr.bf16.mxu0 %v9943_v0 }
 0x3ce   : > { %7834 = vmatprep.subr.bf16.mxu1 %v9943_v0  ;;  %7848 = vmatprep.mubr.msk.bf16.mxu1 %vm9944_vm1, %v9943_v0 }
 0x3d0   : > { %7827 = vmatpush3.bf16.msra.mxu0 %v10719_v11  ;;  %v8940_v11 = vld [vmem:[#allocation16 + $0x18] sm:$0xff]  }
 0x3d1   : > { %7835 = vmatpush3.bf16.msra.mxu1 %v10734_v44  ;;  %7852 = vmatprep.subr.bf16.mxu0 %v9943_v0 }
 0x3d2   : > { %7836 = vmatprep.subr.bf16.mxu1 %v9943_v0 }
 0x3d3   : > { %7829 = vmatmul.mubr.bf16.vlgmr.msra.gmra.mrb[24].mxu0 %v10729_v38 }
 0x3d4   : > { %7868 = vmatprep.mubr.msk.bf16.mxu0 %vm9944_vm1, %v9943_v0  ;;  %7853 = vmatpush3.bf16.msra.mxu0 %v8922_v56 }
 0x3d5   : > { %7837 = vmatpush3.bf16.msra.mxu1 %v10747_v60  ;;  %7854 = vmatprep.subr.bf16.mxu0 %v9943_v0 }
 0x3d6   : > { %7838 = vmatprep.subr.bf16.mxu1 %v9943_v0 }
 0x3d8   : > { %7855 = vmatpush3.bf16.msra.mxu0 %v8923_v59 }
 0x3d9   : > { %7839 = vmatpush3.bf16.msra.mxu1 %v10761_v13  ;;  %7856 = vmatprep.subr.bf16.mxu0 %v9943_v0 }
 0x3da   : > { %7840 = vmatprep.subr.bf16.mxu1 %v9943_v0 }
 0x3dc   : > { %7857 = vmatpush3.bf16.msra.mxu0 %v8924_v62 }
 0x3dd   : > { %7841 = vmatpush3.bf16.msra.mxu1 %v10767_v19  ;;  %7858 = vmatprep.subr.bf16.mxu0 %v9943_v0  ;;  %v8939_v19 = vld [vmem:[#allocation16 + $0xb0] sm:$0xff]  }
 0x3de   : > { %7842 = vmatprep.subr.bf16.mxu1 %v9943_v0 }
 0x3e0   : > { %7859 = vmatpush3.bf16.msra.mxu0 %v8925_v63 }
 0x3e1   : > { %7843 = vmatpush3.bf16.msra.mxu1 %v8917_v24  ;;  %7860 = vmatprep.subr.bf16.mxu0 %v9943_v0  ;;  %v8941_v24 = vld [vmem:[#allocation16 + $0xb8] sm:$0xff]  }
 0x3e2   : > { %7844 = vmatprep.subr.bf16.mxu1 %v9943_v0 }
 0x3e4   : > { %7861 = vmatpush3.bf16.msra.mxu0 %v8926_v2 }
 0x3e5   : > { %7845 = vmatpush3.bf16.msra.mxu1 %v8919_v25  ;;  %7862 = vmatprep.subr.bf16.mxu0 %v9943_v0 }
 0x3e6   : > { %7846 = vmatprep.subr.bf16.mxu1 %v9943_v0 }
 0x3e8   : > { %7863 = vmatpush3.bf16.msra.mxu0 %v8927_v3 }
 0x3e9   : > { %7847 = vmatpush3.bf16.msra.mxu1 %v8920_v27  ;;  %7864 = vmatprep.subr.bf16.mxu0 %v9943_v0 }
 0x3ea   : > { %7872 = vmatprep.subr.bf16.mxu1 %v9943_v0 }
 0x3ec   : > { %7849 = vmatmul.mubr.bf16.vlgmr.msra.gmra.mrb[16].mxu1 %v2207_v58  ;;  %7865 = vmatpush3.bf16.msra.mxu0 %v8928_v4 }
 0x3ed   : > { %7888 = vmatprep.mubr.msk.bf16.mxu1 %vm9944_vm1, %v9943_v0  ;;  %7866 = vmatprep.subr.bf16.mxu0 %v9943_v0 }
 0x3ee   : > { %7873 = vmatpush3.bf16.msra.mxu1 %v8934_v8  ;;  %v2281_v8 = vld [vmem:[#allocation5 + $0x4] sm:$0x1] }
 0x3ef   : > { %7874 = vmatprep.subr.bf16.mxu1 %v9943_v0 }
 0x3f0   : > { %7867 = vmatpush3.bf16.msra.mxu0 %v8929_v5  ;;  %v2278_v5 = vld [vmem:[#allocation5] sm:$0xf] }
 0x3f1   : > { %7892 = vmatprep.subr.bf16.mxu0 %v9943_v0 }
 0x3f2   : > { %7875 = vmatpush3.bf16.msra.mxu1 %v8936_v9 }
 0x3f3   : > { %7876 = vmatprep.subr.bf16.mxu1 %v9943_v0 }
 0x3f6   : > { %7877 = vmatpush3.bf16.msra.mxu1 %v8938_v10 }
 0x3f7   : > { %7878 = vmatprep.subr.bf16.mxu1 %v9943_v0 }
 0x3fa   : > { %7879 = vmatpush3.bf16.msra.mxu1 %v8940_v11  ;;  %v8946_v11 = vld [vmem:[#allocation19 + $0x40] sm:$0xff]  }
 0x3fb   : > { %7880 = vmatprep.subr.bf16.mxu1 %v9943_v0 }
 0x3fe   : > { %7881 = vmatpush3.bf16.msra.mxu1 %v8942_v30  ;;  %v8947_v30 = vld [vmem:[#allocation19 + $0x48] sm:$0xff]  }
 0x3ff   : > { %7882 = vmatprep.subr.bf16.mxu1 %v9943_v0 }
 0x402   : > { %7883 = vmatpush3.bf16.msra.mxu1 %v8943_v31  ;;  %v8948_v31 = vld [vmem:[#allocation19 + $0x50] sm:$0xff]  }
 0x403   : > { %7884 = vmatprep.subr.bf16.mxu1 %v9943_v0 }
 0x406   : > { %7885 = vmatpush3.bf16.msra.mxu1 %v8944_v32  ;;  %v8949_v32 = vld [vmem:[#allocation19 + $0x58] sm:$0xff]  }
 0x407   : > { %7886 = vmatprep.subr.bf16.mxu1 %v9943_v0 }
 0x40a   : > { %7887 = vmatpush3.bf16.msra.mxu1 %v8945_v33  ;;  %v8951_v33 = vld [vmem:[#allocation19] sm:$0xff]  }
 0x40b   : > { %7912 = vmatprep.subr.bf16.mxu1 %v9943_v0 }
 0x466   : > { %v1920_v34 = vpop.f32.mrb[16].mxu0 }
 0x467   : > { %v7750_v35 = vpop.f32.mrb[17].mxu0 }
 0x468   : > { %v1923_v37 = vpop.f32.mrb[18].mxu0  ;;  %v8950_v35 = vld [vmem:[#allocation19 + $0x60] sm:$0xff]  }
 0x469   : > { %v7751_v38 = vpop.f32.mrb[19].mxu0  ;;  %v8952_v37 = vld [vmem:[#allocation19 + $0x68] sm:$0xff]  }
 0x46a   : > { %v8954_v38 = vld [vmem:[#allocation19 + $0x70] sm:$0xff]  }
 0x47f   : > { %v2008_v39 = vpop.f32.mrb[8].mxu1 }
 0x480   : > { %v2009_v40 = vadd.f32 %v2008_v39, %v1920_v34  ;;  %v7770_v41 = vpop.f32.mrb[9].mxu1  ;;  %v8953_v34 = vld [vmem:[#allocation19 + $0x8] sm:$0xff]   ;;  %v8955_v39 = vld [vmem:[#allocation19 + $0x10] sm:$0xff]  }
 0x481   : > { %v2011_v42 = vpop.f32.mrb[10].mxu1  ;;  %v8957_v41 = vld [vmem:[#allocation19 + $0x18] sm:$0xff]  }
 0x482   : > { %v7771_v43 = vpop.f32.mrb[11].mxu1  ;;  %v8958_v42 = vld [vmem:[#allocation19 + $0x20] sm:$0xff]  }
 0x483   : > { %v8960_v43 = vld [vmem:[#allocation19 + $0x28] sm:$0xff]  }
 0x486   : > { %v2113_v44 = vpop.f32.mrb[20].mxu0 }
 0x487   : > { %v2119_v46 = vadd.f32 %v2113_v44, %v2009_v40  ;;  %v7790_v47 = vpop.f32.mrb[21].mxu0  ;;  %v8956_v40 = vld [vmem:[#allocation19 + $0x78] sm:$0xff]   ;;  %v8962_v44 = vld [vmem:[#allocation19 + $0x30] sm:$0xff]  }
 0x488   : > { %v2116_v48 = vpop.f32.mrb[22].mxu0 }
 0x489   : > { %v2257_v50 = vadd.f32 %v6880_v45, %v2119_v46  ;;  %v7791_v51 = vpop.f32.mrb[23].mxu0 }
 0x48b   : > { %v2259_v52 = vmax.f32 %v2257_v50, 0.0 }
 0x48d   : > { %v2260_v53 = vadd.f32 %v2259_v52, %v10723_v36  ;;  %v8935_v36 = vld [vmem:[#allocation16 + $0xa0] sm:$0xff]  }
 0x48f   : > { %v2263_v60 = vpack.c.bf16 %v2260_v53, %v2260_v53 }
 0x491   : > { %7869 = vmatmul.mubr.bf16.vlgmr.msra.gmra.mrb[28].mxu0 %v2263_v60 }
 0x492   : > { %7893 = vmatpush3.bf16.msra.mxu0 %v8930_v54  ;;  %7908 = vmatprep.mubr.msk.bf16.mxu0 %vm9944_vm1, %v9943_v0 }
 0x493   : > { %7894 = vmatprep.subr.bf16.mxu0 %v9943_v0 }
 0x496   : > { %7895 = vmatpush3.bf16.msra.mxu0 %v8931_v61 }
 0x497   : > { %7896 = vmatprep.subr.bf16.mxu0 %v9943_v0 }
 0x49a   : > { %7897 = vmatpush3.bf16.msra.mxu0 %v8932_v6 }
 0x49b   : > { %7898 = vmatprep.subr.bf16.mxu0 %v9943_v0 }
 0x49e   : > { %7899 = vmatpush3.bf16.msra.mxu0 %v8933_v12  ;;  %v6906_v12 = vld [vmem:[#allocation17] ss:$0 sm:$0xff] }
 0x49f   : > { %v2154_v13 = vpop.f32.mrb[12].mxu1  ;;  %7900 = vmatprep.subr.bf16.mxu0 %v9943_v0 }
 0x4a0   : > { %v7810_v14 = vpop.f32.mrb[13].mxu1 }
 0x4a1   : > { %v2157_v15 = vpop.f32.mrb[14].mxu1 }
 0x4a2   : > { %v7811_v16 = vpop.f32.mrb[15].mxu1  ;;  %7901 = vmatpush3.bf16.msra.mxu0 %v8935_v36 }
 0x4a3   : > { %7902 = vmatprep.subr.bf16.mxu0 %v9943_v0 }
 0x4a6   : > { %v2194_v18 = vpop.f32.mrb[24].mxu0  ;;  %7903 = vmatpush3.bf16.msra.mxu0 %v8937_v17  ;;  %v8959_v17 = vld [vmem:[#allocation19 + $0x80] sm:$0xff]  }
 0x4a7   : > { %v2195_v20 = vadd.f32 %v2194_v18, %v2154_v13  ;;  %v7830_v21 = vpop.f32.mrb[25].mxu0  ;;  %7904 = vmatprep.subr.bf16.mxu0 %v9943_v0 }
 0x4a8   : > { %v2197_v22 = vpop.f32.mrb[26].mxu0 }
 0x4a9   : > { %v7831_v23 = vpop.f32.mrb[27].mxu0 }
 0x4aa   : > { %7905 = vmatpush3.bf16.msra.mxu0 %v8939_v19 }
 0x4ab   : > { %7906 = vmatprep.subr.bf16.mxu0 %v9943_v0 }
 0x4ae   : > { %7907 = vmatpush3.bf16.msra.mxu0 %v8941_v24 }
 0x4af   : > { %7932 = vmatprep.subr.bf16.mxu0 %v9943_v0 }
 0x4bf   : > { %v2243_v25 = vpop.f32.mrb[16].mxu1 }
 0x4c0   : > { %v2249_v26 = vadd.f32 %v2243_v25, %v2195_v20  ;;  %v7850_v27 = vpop.f32.mrb[17].mxu1  ;;  %v8961_v20 = vld [vmem:[#allocation19 + $0x88] sm:$0xff]  }
 0x4c1   : > { %v2246_v28 = vpop.f32.mrb[18].mxu1  ;;  %v2623_v25 = vld [vmem:[#allocation4] sm:$0xf] }
 0x4c2   : > { %v2258_v29 = vadd.f32 %v6880_v45, %v2249_v26  ;;  %v7851_v55 = vpop.f32.mrb[19].mxu1  ;;  %v8964_v45 = vld [vmem:[#allocation19 + $0x38] sm:$0xff]   ;;  %v2626_v26 = vld [vmem:[#allocation4 + $0x4] sm:$0x1] }
 0x4c3   : > { %v8963_v27 = vld [vmem:[#allocation19 + $0x90] sm:$0xff]   ;;  %v8965_v55 = vld [vmem:[#allocation19 + $0x98] sm:$0xff]  }
 0x4c4   : > { %v2261_v56 = vmax.f32 %v2258_v29, 0.0 }
 0x4c6   : > { %v2262_v58 = vadd.f32 %v2261_v56, %v10753_v7  ;;  %v8966_v56 = vld [vmem:[#allocation19 + $0xa0] sm:$0xff]  }
 0x4c8   : > { %v2264_v59 = vpack.c.bf16 %v2262_v58, %v2262_v58 }
 0x4ca   : > { %v2269_v62 = vshrl.u32 %v2264_v59, 16  ;;  %7909 = vmatmul.mubr.bf16.vlgmr.msra.gmra.mrb[32].mxu0 %v2264_v59  ;;  %v2272_v2 = vshll.u32 %v2264_v59, 16  ;;  %v8967_v59 = vld [vmem:[#allocation19 + $0xa8] sm:$0xff]  }
 0x4cb   : > { %7948 = vmatprep.mubr.msk.bf16.mxu0 %vm9944_vm1, %v9943_v0  ;;  %7933 = vmatpush3.bf16.msra.mxu0 %v8951_v33  ;;  %v8981_v33 = vld [vmem:[#allocation22 + $0x78] sm:$0xff]  }
 0x4cc   : > { %v2271_v63 = vrot.slane %v2269_v62, 7  ;;  %7934 = vmatprep.subr.bf16.mxu0 %v9943_v0  ;;  %v8968_v62 = vld [vmem:[#allocation19 + $0xb0] sm:$0xff]  }
 0x4ce   : > { %v2274_v3 = vor.u32 %v2272_v2, %v2271_v63  ;;  %v2275_v4 = vrot.slane %v2271_v63, 4  ;;  %v8969_v63 = vld [vmem:[#allocation19 + $0xb8] sm:$0xff]  }
 0x4cf   : > { %7935 = vmatpush3.bf16.msra.mxu0 %v8953_v34  ;;  %v8982_v34 = vld [vmem:[#allocation22 + $0x18] sm:$0xff]  }
 0x4d0   : > { %v2279_v9 = vsel %vm10742_vm13, %v2274_v3, %v2278_v5  ;;  %v2282_v10 = vsel %vm10665_vm12, %v2275_v4, %v2281_v8  ;;  %7936 = vmatprep.subr.bf16.mxu0 %v9943_v0  ;;  %v8971_v4 = vld [vmem:[#allocation22 + $0x40] sm:$0xff]   ;;  %v8972_v5 = vld [vmem:[#allocation22 + $0x48] sm:$0xff]   ;;  %v8973_v8 = vld [vmem:[#allocation22 + $0x50] sm:$0xff]  }
 0x4d1   : > { %2280 = vst [vmem:[#allocation5] sm:$0xf] %v2279_v9  ;;  %2283 = vst [vmem:[#allocation5 + $0x4] sm:$0x1] %v2282_v10  ;;  %v8976_v9 = vld [vmem:[#allocation22] sm:$0xff]   ;;  %v8974_v10 = vld [vmem:[#allocation22 + $0x58] sm:$0xff]  }
 0x4d3   : > { %7937 = vmatpush3.bf16.msra.mxu0 %v8955_v39  ;;  %v8989_v39 = vld [vmem:[#allocation22 + $0x38] sm:$0xff]  }
 0x4d4   : > { %7938 = vmatprep.subr.bf16.mxu0 %v9943_v0 }
 0x4d7   : > { %7939 = vmatpush3.bf16.msra.mxu0 %v8957_v41 }
 0x4d8   : > { %v2284_v7 = vld [vmem:[#allocation5] sm:$0xf]  ;;  %7940 = vmatprep.subr.bf16.mxu0 %v9943_v0 }
 0x4d9   : > { %7889 = vmatmul.mubr.bf16.vlgmr.msra.gmra.mrb[20].mxu1 %v2284_v7  ;;  %v8978_v7 = vld [vmem:[#allocation22 + $0x8] sm:$0xff]  }
 0x4da   : > { %7928 = vmatprep.mubr.msk.bf16.mxu1 %vm9944_vm1, %v9943_v0  ;;  %7913 = vmatpush3.bf16.msra.mxu1 %v8946_v11  ;;  %v8975_v11 = vld [vmem:[#allocation22 + $0x60] sm:$0xff]  }
 0x4db   : > { %7914 = vmatprep.subr.bf16.mxu1 %v9943_v0  ;;  %7941 = vmatpush3.bf16.msra.mxu0 %v8958_v42 }
 0x4dc   : > { %7942 = vmatprep.subr.bf16.mxu0 %v9943_v0 }
 0x4de   : > { %7915 = vmatpush3.bf16.msra.mxu1 %v8947_v30  ;;  %v8977_v30 = vld [vmem:[#allocation22 + $0x68] sm:$0xff]  }
 0x4df   : > { %7916 = vmatprep.subr.bf16.mxu1 %v9943_v0  ;;  %7943 = vmatpush3.bf16.msra.mxu0 %v8960_v43 }
 0x4e0   : > { %7944 = vmatprep.subr.bf16.mxu0 %v9943_v0 }
 0x4e2   : > { %7917 = vmatpush3.bf16.msra.mxu1 %v8948_v31  ;;  %v8979_v31 = vld [vmem:[#allocation22 + $0x70] sm:$0xff]  }
 0x4e3   : > { %7918 = vmatprep.subr.bf16.mxu1 %v9943_v0  ;;  %7945 = vmatpush3.bf16.msra.mxu0 %v8962_v44 }
 0x4e4   : > { %7946 = vmatprep.subr.bf16.mxu0 %v9943_v0 }
 0x4e6   : > { %7919 = vmatpush3.bf16.msra.mxu1 %v8949_v32  ;;  %v8980_v32 = vld [vmem:[#allocation22 + $0x10] sm:$0xff]  }
 0x4e7   : > { %7920 = vmatprep.subr.bf16.mxu1 %v9943_v0  ;;  %7947 = vmatpush3.bf16.msra.mxu0 %v8964_v45 }
 0x4e8   : > { %7972 = vmatprep.subr.bf16.mxu0 %v9943_v0 }
 0x4ea   : > { %7921 = vmatpush3.bf16.msra.mxu1 %v8950_v35  ;;  %v8983_v35 = vld [vmem:[#allocation22 + $0x20] sm:$0xff]  }
 0x4eb   : > { %7922 = vmatprep.subr.bf16.mxu1 %v9943_v0 }
 0x4ee   : > { %7923 = vmatpush3.bf16.msra.mxu1 %v8952_v37  ;;  %v8985_v37 = vld [vmem:[#allocation22 + $0x28] sm:$0xff]  }
 0x4ef   : > { %7924 = vmatprep.subr.bf16.mxu1 %v9943_v0 }
 0x4f2   : > { %7925 = vmatpush3.bf16.msra.mxu1 %v8954_v38  ;;  %v8987_v38 = vld [vmem:[#allocation22 + $0x30] sm:$0xff]  }
 0x4f3   : > { %7926 = vmatprep.subr.bf16.mxu1 %v9943_v0 }
 0x4f6   : > { %7927 = vmatpush3.bf16.msra.mxu1 %v8956_v40 }
 0x4f7   : > { %7952 = vmatprep.subr.bf16.mxu1 %v9943_v0 }
 0x564   : > { %v2400_v46 = vpop.f32.mrb[28].mxu0 }
 0x565   : > { %v7870_v47 = vpop.f32.mrb[29].mxu0 }
 0x566   : > { %v2403_v48 = vpop.f32.mrb[30].mxu0 }
 0x567   : > { %v7871_v50 = vpop.f32.mrb[31].mxu0 }
 0x59d   : > { %v2593_v51 = vpop.f32.mrb[32].mxu0 }
 0x59e   : > { %v7910_v52 = vpop.f32.mrb[33].mxu0 }
 0x59f   : > { %v2596_v53 = vpop.f32.mrb[34].mxu0 }
 0x5a0   : > { %v7911_v54 = vpop.f32.mrb[35].mxu0 }
 0x5ac   : > { %v2488_v60 = vpop.f32.mrb[20].mxu1 }
 0x5ad   : > { %v2489_v61 = vadd.f32 %v2488_v60, %v2400_v46  ;;  %v7890_v6 = vpop.f32.mrb[21].mxu1 }
 0x5ae   : > { %v2491_v36 = vpop.f32.mrb[22].mxu1 }
 0x5af   : > { %v2599_v13 = vadd.f32 %v2593_v51, %v2489_v61  ;;  %v7891_v14 = vpop.f32.mrb[23].mxu1  ;;  %v6933_v51 = vld [vmem:[#allocation20] ss:$0 sm:$0xff]  ;;  %v8984_v36 = vld [vmem:[#allocation22 + $0x80] sm:$0xff]  }
 0x5b1   : > { %v2607_v15 = vadd.f32 %v6906_v12, %v2599_v13 }
 0x5b3   : > { %v10887_v16 = vmax.f32 %v2607_v15, 0.0  ;;  %v8986_v15 = vld [vmem:[#allocation22 + $0x88] sm:$0xff]  }
 0x5b5   : > { %v2609_v18 = vpack.c.bf16 %v10887_v16, %v10887_v16 }
 0x5b7   : > { %v2614_v19 = vshrl.u32 %v2609_v18, 16  ;;  %7929 = vmatmul.mubr.bf16.vlgmr.msra.gmra.mrb[24].mxu1 %v2609_v18  ;;  %v2617_v22 = vshll.u32 %v2609_v18, 16 }
 0x5b8   : > { %7953 = vmatpush3.bf16.msra.mxu1 %v8959_v17  ;;  %7968 = vmatprep.mubr.msk.bf16.mxu1 %vm9944_vm1, %v9943_v0 }
 0x5b9   : > { %v2616_v21 = vrot.slane %v2614_v19, 7  ;;  %7954 = vmatprep.subr.bf16.mxu1 %v9943_v0 }
 0x5bb   : > { %v2619_v23 = vor.u32 %v2617_v22, %v2616_v21  ;;  %v2620_v24 = vrot.slane %v2616_v21, 4  ;;  %v8988_v22 = vld [vmem:[#allocation22 + $0x90] sm:$0xff]  }
 0x5bc   : > { %7955 = vmatpush3.bf16.msra.mxu1 %v8961_v20 }
 0x5bd   : > { %v2624_v28 = vsel %vm10742_vm13, %v2619_v23, %v2623_v25  ;;  %v2627_v29 = vsel %vm10665_vm12, %v2620_v24, %v2626_v26  ;;  %7956 = vmatprep.subr.bf16.mxu1 %v9943_v0  ;;  %v8990_v25 = vld [vmem:[#allocation22 + $0x98] sm:$0xff]   ;;  %v8991_v26 = vld [vmem:[#allocation22 + $0xa0] sm:$0xff]  }
 0x5be   : > { %2625 = vst [vmem:[#allocation4] sm:$0xf] %v2624_v28  ;;  %2628 = vst [vmem:[#allocation4 + $0x4] sm:$0x1] %v2627_v29  ;;  %v8992_v28 = vld [vmem:[#allocation22 + $0xa8] sm:$0xff]   ;;  %v8993_v29 = vld [vmem:[#allocation22 + $0xb0] sm:$0xff]  }
 0x5c0   : > { %7957 = vmatpush3.bf16.msra.mxu1 %v8963_v27 }
 0x5c1   : > { %7958 = vmatprep.subr.bf16.mxu1 %v9943_v0 }
 0x5c4   : > { %7959 = vmatpush3.bf16.msra.mxu1 %v8965_v55  ;;  %v8994_v55 = vld [vmem:[#allocation22 + $0xb8] sm:$0xff]  }
 0x5c5   : > { %v2629_v58 = vld [vmem:[#allocation4] sm:$0xf]  ;;  %7960 = vmatprep.subr.bf16.mxu1 %v9943_v0 }
 0x5c6   : > { %7949 = vmatmul.mubr.bf16.vlgmr.msra.gmra.mrb[36].mxu0 %v2629_v58  ;;  %v8970_v2 = vld [vmem:[#allocation4] sm:$0x1e]  }
 0x5c7   : > { %7988 = vmatprep.mubr.msk.bf16.mxu0 %vm9944_vm1, %v9943_v0  ;;  %v2863_v3 = vrot.slane %v8970_v2, 1  ;;  %7973 = vmatpush3.bf16.msra.mxu0 %v8971_v4  ;;  %v2978_v21 = vld [vmem:[#allocation4] sm:$0xf]  ;;  %v8999_v2 = vld [vmem:[#allocation25 + $0x18] sm:$0xff]  }
 0x5c8   : > { %7961 = vmatpush3.bf16.msra.mxu1 %v8966_v56  ;;  %7974 = vmatprep.subr.bf16.mxu0 %v9943_v0  ;;  %v9001_v4 = vld [vmem:[#allocation25 + $0x28] sm:$0xff]  }
 0x5c9   : > { %7962 = vmatprep.subr.bf16.mxu1 %v9943_v0 }
 0x5cb   : > { %7975 = vmatpush3.bf16.msra.mxu0 %v8972_v5  ;;  %v9002_v5 = vld [vmem:[#allocation25 + $0x30] sm:$0xff]  }
 0x5cc   : > { %7963 = vmatpush3.bf16.msra.mxu1 %v8967_v59  ;;  %7976 = vmatprep.subr.bf16.mxu0 %v9943_v0  ;;  %v8996_v59 = vld [vmem:[#allocation25] sm:$0xff]  }
 0x5cd   : > { %7964 = vmatprep.subr.bf16.mxu1 %v9943_v0 }
 0x5cf   : > { %7977 = vmatpush3.bf16.msra.mxu0 %v8973_v8  ;;  %v9003_v8 = vld [vmem:[#allocation25 + $0x38] sm:$0xff]  }
 0x5d0   : > { %7965 = vmatpush3.bf16.msra.mxu1 %v8968_v62  ;;  %7978 = vmatprep.subr.bf16.mxu0 %v9943_v0  ;;  %v8997_v62 = vld [vmem:[#allocation25 + $0x8] sm:$0xff]  }
 0x5d1   : > { %7966 = vmatprep.subr.bf16.mxu1 %v9943_v0 }
 0x5d3   : > { %7979 = vmatpush3.bf16.msra.mxu0 %v8974_v10  ;;  %v9005_v10 = vld [vmem:[#allocation25 + $0x48] sm:$0xff]  }
 0x5d4   : > { %7967 = vmatpush3.bf16.msra.mxu1 %v8969_v63  ;;  %7980 = vmatprep.subr.bf16.mxu0 %v9943_v0  ;;  %v8998_v63 = vld [vmem:[#allocation25 + $0x10] sm:$0xff]  }
 0x5d5   : > { %7992 = vmatprep.subr.bf16.mxu1 %v9943_v0 }
 0x5d7   : > { %7969 = vmatmul.mubr.bf16.vlgmr.msra.gmra.mrb[28].mxu1 %v2863_v3  ;;  %7981 = vmatpush3.bf16.msra.mxu0 %v8975_v11  ;;  %v9000_v3 = vld [vmem:[#allocation25 + $0x20] sm:$0xff]   ;;  %v9007_v11 = vld [vmem:[#allocation25 + $0x58] sm:$0xff]  }
 0x5d8   : > { %8008 = vmatprep.mubr.msk.bf16.mxu1 %vm9944_vm1, %v9943_v0  ;;  %7993 = vmatpush3.bf16.msra.mxu1 %v8976_v9  ;;  %v9004_v9 = vld [vmem:[#allocation25 + $0x40] sm:$0xff]  }
 0x5d9   : > { %7994 = vmatprep.subr.bf16.mxu1 %v9943_v0  ;;  %7982 = vmatprep.subr.bf16.mxu0 %v9943_v0 }
 0x5db   : > { %7983 = vmatpush3.bf16.msra.mxu0 %v8977_v30  ;;  %v9008_v30 = vld [vmem:[#allocation25 + $0x60] sm:$0xff]  }
 0x5dc   : > { %7995 = vmatpush3.bf16.msra.mxu1 %v8978_v7  ;;  %7984 = vmatprep.subr.bf16.mxu0 %v9943_v0  ;;  %v9006_v7 = vld [vmem:[#allocation25 + $0x50] sm:$0xff]  }
 0x5dd   : > { %7996 = vmatprep.subr.bf16.mxu1 %v9943_v0 }
 0x5df   : > { %7985 = vmatpush3.bf16.msra.mxu0 %v8979_v31  ;;  %v9009_v31 = vld [vmem:[#allocation25 + $0x68] sm:$0xff]  }
 0x5e0   : > { %7997 = vmatpush3.bf16.msra.mxu1 %v8980_v32  ;;  %7986 = vmatprep.subr.bf16.mxu0 %v9943_v0 }
 0x5e1   : > { %7998 = vmatprep.subr.bf16.mxu1 %v9943_v0 }
 0x5e3   : > { %7987 = vmatpush3.bf16.msra.mxu0 %v8981_v33 }
 0x5e4   : > { %7999 = vmatpush3.bf16.msra.mxu1 %v8982_v34  ;;  %8012 = vmatprep.subr.bf16.mxu0 %v9943_v0 }
 0x5e5   : > { %8000 = vmatprep.subr.bf16.mxu1 %v9943_v0 }
 0x5e8   : > { %8001 = vmatpush3.bf16.msra.mxu1 %v8983_v35 }
 0x5e9   : > { %8002 = vmatprep.subr.bf16.mxu1 %v9943_v0 }
 0x5ec   : > { %8003 = vmatpush3.bf16.msra.mxu1 %v8985_v37 }
 0x5ed   : > { %8004 = vmatprep.subr.bf16.mxu1 %v9943_v0 }
 0x5f0   : > { %8005 = vmatpush3.bf16.msra.mxu1 %v8987_v38 }
 0x5f1   : > { %8006 = vmatprep.subr.bf16.mxu1 %v9943_v0 }
 0x5f4   : > { %8007 = vmatpush3.bf16.msra.mxu1 %v8989_v39 }
 0x5f5   : > { %8032 = vmatprep.subr.bf16.mxu1 %v9943_v0 }
 0x68a   : > { %v2745_v40 = vpop.f32.mrb[24].mxu1 }
 0x68b   : > { %v7930_v41 = vpop.f32.mrb[25].mxu1 }
 0x68c   : > { %v2748_v42 = vpop.f32.mrb[26].mxu1 }
 0x68d   : > { %v7931_v43 = vpop.f32.mrb[27].mxu1 }
 0x68e   : > { %v6960_v43 = vld [vmem:[#allocation23] ss:$0 sm:$0xff] }
 0x699   : > { %v2833_v44 = vpop.f32.mrb[36].mxu0 }
 0x69a   : > { %v2834_v45 = vadd.f32 %v2833_v44, %v2745_v40  ;;  %v7950_v46 = vpop.f32.mrb[37].mxu0 }
 0x69b   : > { %v2836_v47 = vpop.f32.mrb[38].mxu0 }
 0x69c   : > { %v7951_v48 = vpop.f32.mrb[39].mxu0 }
 0x6aa   : > { %v2947_v50 = vpop.f32.mrb[28].mxu1 }
 0x6ab   : > { %v2953_v52 = vadd.f32 %v2947_v50, %v2834_v45  ;;  %v7970_v53 = vpop.f32.mrb[29].mxu1 }
 0x6ac   : > { %v2950_v54 = vpop.f32.mrb[30].mxu1  ;;  %v9010_v53 = vld [vmem:[#allocation25 + $0x70] sm:$0xff]  }
 0x6ad   : > { %v2961_v60 = vadd.f32 %v6933_v51, %v2953_v52  ;;  %v7971_v61 = vpop.f32.mrb[31].mxu1  ;;  %v9011_v54 = vld [vmem:[#allocation25 + $0x78] sm:$0xff]  }
 0x6ae   : > { %v9013_v61 = vld [vmem:[#allocation25 + $0x88] sm:$0xff]  }
 0x6af   : > { %v2962_v6 = vmax.f32 %v2961_v60, 0.0  ;;  %v9012_v60 = vld [vmem:[#allocation25 + $0x80] sm:$0xff]  }
 0x6b1   : > { %v10926_v12 = vadd.f32 %v2962_v6, %v10887_v16  ;;  %v2981_v16 = vld [vmem:[#allocation4 + $0x4] sm:$0x1]  ;;  %v9014_v6 = vld [vmem:[#allocation25 + $0x90] sm:$0xff]  }
 0x6b3   : > { %v2964_v13 = vpack.c.bf16 %v10926_v12, %v10926_v12 }
 0x6b5   : > { %v2969_v14 = vshrl.u32 %v2964_v13, 16  ;;  %7989 = vmatmul.mubr.bf16.vlgmr.msra.gmra.mrb[40].mxu0 %v2964_v13  ;;  %v2972_v18 = vshll.u32 %v2964_v13, 16  ;;  %v9017_v13 = vld [vmem:[#allocation25 + $0xa8] sm:$0xff]  }
 0x6b6   : > { %8013 = vmatpush3.bf16.msra.mxu0 %v8984_v36  ;;  %8028 = vmatprep.mubr.msk.bf16.mxu0 %vm9944_vm1, %v9943_v0  ;;  %v9016_v36 = vld [vmem:[#allocation25 + $0xa0] sm:$0xff]  }
 0x6b7   : > { %v2971_v17 = vrot.slane %v2969_v14, 7  ;;  %8014 = vmatprep.subr.bf16.mxu0 %v9943_v0  ;;  %v6961_v14 = vld [vmem:[#allocation26] ss:$0 sm:$0xff] }
 0x6b9   : > { %v2974_v19 = vor.u32 %v2972_v18, %v2971_v17  ;;  %v2975_v20 = vrot.slane %v2971_v17, 4 }
 0x6ba   : > { %8015 = vmatpush3.bf16.msra.mxu0 %v8986_v15 }
 0x6bb   : > { %v2979_v23 = vsel %vm10742_vm13, %v2974_v19, %v2978_v21  ;;  %v2982_v24 = vsel %vm10665_vm12, %v2975_v20, %v2981_v16  ;;  %8016 = vmatprep.subr.bf16.mxu0 %v9943_v0 }
 0x6bc   : > { %2983 = vst [vmem:[#allocation4 + $0x4] sm:$0x1] %v2982_v24  ;;  %2980 = vst [vmem:[#allocation4] sm:$0xf] %v2979_v23  ;;  %v9018_v23 = vld [vmem:[#allocation25 + $0xb0] sm:$0xff]   ;;  %v9019_v24 = vld [vmem:[#allocation25 + $0xb8] sm:$0xff]  }
 0x6be   : > { %8017 = vmatpush3.bf16.msra.mxu0 %v8988_v22 }
 0x6bf   : > { %8018 = vmatprep.subr.bf16.mxu0 %v9943_v0 }
 0x6c2   : > { %8019 = vmatpush3.bf16.msra.mxu0 %v8990_v25  ;;  %v9020_v25 = vld [vmem:[#allocation25 + $0xc0] sm:$0xff]  }
 0x6c3   : > { %v2984_v27 = vld [vmem:[#allocation4] sm:$0xf]  ;;  %8020 = vmatprep.subr.bf16.mxu0 %v9943_v0 }
 0x6c4   : > { %8009 = vmatmul.mubr.bf16.vlgmr.msra.gmra.mrb[32].mxu1 %v2984_v27  ;;  %v8995_v56 = vld [vmem:[#allocation4] sm:$0x1e]   ;;  %v9022_v27 = vld [vmem:[#allocation25 + $0xd0] sm:$0xff]  }
 0x6c5   : > { %8048 = vmatprep.mubr.msk.bf16.mxu1 %vm9944_vm1, %v9943_v0  ;;  %v3218_v58 = vrot.slane %v8995_v56, 1  ;;  %8033 = vmatpush3.bf16.msra.mxu1 %v8996_v59  ;;  %v6970_v56 = vld [vmem:[#allocation26 + $0x1] ss:$0 sm:$0xff] }
 0x6c6   : > { %8021 = vmatpush3.bf16.msra.mxu0 %v8991_v26  ;;  %8034 = vmatprep.subr.bf16.mxu1 %v9943_v0  ;;  %v9021_v26 = vld [vmem:[#allocation25 + $0xc8] sm:$0xff]  }
 0x6c7   : > { %8022 = vmatprep.subr.bf16.mxu0 %v9943_v0 }
 0x6c9   : > { %8035 = vmatpush3.bf16.msra.mxu1 %v8997_v62 }
 0x6ca   : > { %8023 = vmatpush3.bf16.msra.mxu0 %v8992_v28  ;;  %8036 = vmatprep.subr.bf16.mxu1 %v9943_v0  ;;  %v9023_v28 = vld [vmem:[#allocation25 + $0xd8] sm:$0xff]  }
 0x6cb   : > { %8024 = vmatprep.subr.bf16.mxu0 %v9943_v0 }
 0x6cd   : > { %8037 = vmatpush3.bf16.msra.mxu1 %v8998_v63 }
 0x6ce   : > { %8025 = vmatpush3.bf16.msra.mxu0 %v8993_v29  ;;  %8038 = vmatprep.subr.bf16.mxu1 %v9943_v0  ;;  %v9024_v29 = vld [vmem:[#allocation25 + $0xe0] sm:$0xff]  }
 0x6cf   : > { %8026 = vmatprep.subr.bf16.mxu0 %v9943_v0 }
 0x6d1   : > { %8039 = vmatpush3.bf16.msra.mxu1 %v8999_v2 }
 0x6d2   : > { %8027 = vmatpush3.bf16.msra.mxu0 %v8994_v55  ;;  %8040 = vmatprep.subr.bf16.mxu1 %v9943_v0  ;;  %v9025_v55 = vld [vmem:[#allocation25 + $0xe8] sm:$0xff]  }
 0x6d3   : > { %8052 = vmatprep.subr.bf16.mxu0 %v9943_v0 }
 0x6d5   : > { %8029 = vmatmul.mubr.bf16.vlgmr.msra.gmra.mrb[44].mxu0 %v3218_v58  ;;  %8041 = vmatpush3.bf16.msra.mxu1 %v9000_v3 }
 0x6d6   : > { %8068 = vmatprep.mubr.msk.bf16.mxu0 %vm9944_vm1, %v9943_v0  ;;  %8042 = vmatprep.subr.bf16.mxu1 %v9943_v0 }
 0x6d7   : > { %8053 = vmatpush3.bf16.msra.mxu0 %v9004_v9  ;;  %v9027_v9 = vld [vmem:[#allocation25 + $0xf8] sm:$0xff]  }
 0x6d8   : > { %8054 = vmatprep.subr.bf16.mxu0 %v9943_v0 }
 0x6d9   : > { %8043 = vmatpush3.bf16.msra.mxu1 %v9001_v4 }
 0x6da   : > { %8044 = vmatprep.subr.bf16.mxu1 %v9943_v0 }
 0x6db   : > { %8055 = vmatpush3.bf16.msra.mxu0 %v9005_v10  ;;  %v9028_v10 = vld [vmem:[#allocation28] sm:$0xff]  }
 0x6dc   : > { %8056 = vmatprep.subr.bf16.mxu0 %v9943_v0 }
 0x6dd   : > { %8045 = vmatpush3.bf16.msra.mxu1 %v9002_v5 }
 0x6de   : > { %8046 = vmatprep.subr.bf16.mxu1 %v9943_v0 }
 0x6df   : > { %8057 = vmatpush3.bf16.msra.mxu0 %v9006_v7  ;;  %v9029_v7 = vld [vmem:[#allocation28 + $0x8] sm:$0xff]  }
 0x6e0   : > { %8058 = vmatprep.subr.bf16.mxu0 %v9943_v0 }
 0x6e1   : > { %8047 = vmatpush3.bf16.msra.mxu1 %v9003_v8  ;;  %v9026_v8 = vld [vmem:[#allocation25 + $0xf0] sm:$0xff]  }
 0x6e2   : > { %8072 = vmatprep.subr.bf16.mxu1 %v9943_v0 }
 0x6e3   : > { %8059 = vmatpush3.bf16.msra.mxu0 %v9007_v11  ;;  %v9030_v11 = vld [vmem:[#allocation28 + $0x10] sm:$0xff]  }
 0x6e4   : > { %8060 = vmatprep.subr.bf16.mxu0 %v9943_v0 }
 0x6e7   : > { %8061 = vmatpush3.bf16.msra.mxu0 %v9008_v30  ;;  %v9031_v30 = vld [vmem:[#allocation28 + $0x18] sm:$0xff]  }
 0x6e8   : > { %8062 = vmatprep.subr.bf16.mxu0 %v9943_v0 }
 0x6eb   : > { %8063 = vmatpush3.bf16.msra.mxu0 %v9009_v31  ;;  %v9032_v31 = vld [vmem:[#allocation28 + $0x20] sm:$0xff]  }
 0x6ec   : > { %8064 = vmatprep.subr.bf16.mxu0 %v9943_v0 }
 0x6ef   : > { %8065 = vmatpush3.bf16.msra.mxu0 %v9010_v53 }
 0x6f0   : > { %8066 = vmatprep.subr.bf16.mxu0 %v9943_v0 }
 0x6f3   : > { %8067 = vmatpush3.bf16.msra.mxu0 %v9011_v54 }
 0x6f4   : > { %8092 = vmatprep.subr.bf16.mxu0 %v9943_v0 }
 0x788   : > { %v3100_v32 = vpop.f32.mrb[40].mxu0 }
 0x789   : > { %v7990_v33 = vpop.f32.mrb[41].mxu0 }
 0x78a   : > { %v3103_v34 = vpop.f32.mrb[42].mxu0  ;;  %v6979_v33 = vld [vmem:[#allocation26 + $0x2] ss:$0 sm:$0xff] }
 0x78b   : > { %v7991_v35 = vpop.f32.mrb[43].mxu0 }
 0x797   : > { %v3188_v37 = vpop.f32.mrb[32].mxu1 }
 0x798   : > { %v3189_v38 = vadd.f32 %v3188_v37, %v3100_v32  ;;  %v8010_v39 = vpop.f32.mrb[33].mxu1  ;;  %v9033_v32 = vld [vmem:[#allocation28 + $0x28] sm:$0xff]  }
 0x799   : > { %v3191_v40 = vpop.f32.mrb[34].mxu1 }
 0x79a   : > { %v8011_v41 = vpop.f32.mrb[35].mxu1 }
 0x7a8   : > { %v3302_v42 = vpop.f32.mrb[44].mxu0 }
 0x7a9   : > { %v3308_v44 = vadd.f32 %v3302_v42, %v3189_v38  ;;  %v8030_v45 = vpop.f32.mrb[45].mxu0 }
 0x7aa   : > { %v3305_v46 = vpop.f32.mrb[46].mxu0  ;;  %v6988_v45 = vld [vmem:[#allocation26 + $0x3] ss:$0 sm:$0xff] }
 0x7ab   : > { %v3316_v47 = vadd.f32 %v6960_v43, %v3308_v44  ;;  %v8031_v48 = vpop.f32.mrb[47].mxu0  ;;  %v9034_v43 = vld [vmem:[#allocation28 + $0x30] sm:$0xff]   ;;  %v9035_v44 = vld [vmem:[#allocation28 + $0x38] sm:$0xff]  }
 0x7ad   : > { %v3317_v50 = vmax.f32 %v3316_v47, 0.0 }
 0x7af   : > { %v3318_v51 = vadd.f32 %v3317_v50, %v10926_v12  ;;  %v9015_v12 = vld [vmem:[#allocation25 + $0x98] sm:$0xff]  }
 0x7b1   : > { %v3319_v52 = vpack.c.bf16 %v3318_v51, %v3318_v51 }
 0x7b3   : > { %8049 = vmatmul.mubr.bf16.vlgmr.msra.gmra.mrb[36].mxu1 %v3319_v52 }
 0x7b4   : > { %8088 = vmatprep.mubr.msk.bf16.mxu1 %vm9944_vm1, %v9943_v0  ;;  %8073 = vmatpush3.bf16.msra.mxu1 %v9012_v60  ;;  %v1376_v60 = vld [vmem:[#allocation6] sm:$0x1] }
 0x7b5   : > { %8074 = vmatprep.subr.bf16.mxu1 %v9943_v0 }
 0x7b8   : > { %8075 = vmatpush3.bf16.msra.mxu1 %v9013_v61  ;;  %v1380_v61 = vld [vmem:[#allocation6 + $0x4] sm:$0x1] }
 0x7b9   : > { %8076 = vmatprep.subr.bf16.mxu1 %v9943_v0 }
 0x7bc   : > { %8077 = vmatpush3.bf16.msra.mxu1 %v9014_v6 }
 0x7bd   : > { %8078 = vmatprep.subr.bf16.mxu1 %v9943_v0 }
 0x7c0   : > { %8079 = vmatpush3.bf16.msra.mxu1 %v9015_v12  ;;  %v1377_v12 = vsel %vm11000_vm15, 0, %v1376_v60 }
 0x7c1   : > { %8080 = vmatprep.subr.bf16.mxu1 %v9943_v0  ;;  %1378 = vst [vmem:[#allocation6] sm:$0x1] %v1377_v12 }
 0x7c4   : > { %8081 = vmatpush3.bf16.msra.mxu1 %v9016_v36  ;;  %v1381_v36 = vsel %vm1379_vm0, 0, %v1380_v61 }
 0x7c5   : > { %8082 = vmatprep.subr.bf16.mxu1 %v9943_v0  ;;  %1382 = vst [vmem:[#allocation6 + $0x4] sm:$0x1] %v1381_v36 }
 0x7c8   : > { %8083 = vmatpush3.bf16.msra.mxu1 %v9017_v13  ;;  %v6997_v13 = vld [vmem:[#allocation29] ss:$0 sm:$0xff] }
 0x7c9   : > { %8084 = vmatprep.subr.bf16.mxu1 %v9943_v0 }
 0x7cc   : > { %8085 = vmatpush3.bf16.msra.mxu1 %v9018_v23 }
 0x7cd   : > { %8086 = vmatprep.subr.bf16.mxu1 %v9943_v0 }
 0x7d0   : > { %8087 = vmatpush3.bf16.msra.mxu1 %v9019_v24  ;;  %v9037_v24 = vld [vmem:[%s11696_s11] sm:$0xff]  }
 0x7d1   : > { %8112 = vmatprep.subr.bf16.mxu1 %v9943_v0 }
 0x886   : > { %v3425_v15 = vpop.f32.mrb[36].mxu1 }
 0x887   : > { %v3426_v17 = vadd.f32 %v6961_v14, %v3425_v15  ;;  %v8050_v18 = vpop.f32.mrb[37].mxu1 }
 0x888   : > { %v3428_v19 = vpop.f32.mrb[38].mxu1 }
 0x889   : > { %v3431_v20 = vmax.f32 %v3426_v17, 0.0  ;;  %v8051_v21 = vpop.f32.mrb[39].mxu1 }
 0x88b   : > { %v3432_v16 = vadd.f32 %v3431_v20, %v3318_v51 }
 0x88d   : > { %v3433_v22 = vpack.c.bf16 %v3432_v16, %v3432_v16 }
 0x88f   : > { %8069 = vmatmul.mubr.bf16.vlgmr.msra.gmra.mrb[48].mxu0 %v3433_v22  ;;  %v9036_v22 = vld [vmem:[%s11696_s11 + $0x8] sm:$0xff]  }
 0x890   : > { %8108 = vmatprep.mubr.msk.bf16.mxu0 %vm9944_vm1, %v9943_v0  ;;  %8093 = vmatpush3.bf16.msra.mxu0 %v9020_v25  ;;  %v3895_v25 = vld [vmem:[%s1332_s9] sm:$0xff] }
 0x891   : > { %8094 = vmatprep.subr.bf16.mxu0 %v9943_v0 }
 0x894   : > { %8095 = vmatpush3.bf16.msra.mxu0 %v9021_v26 }
 0x895   : > { %8096 = vmatprep.subr.bf16.mxu0 %v9943_v0 }
 0x898   : > { %8097 = vmatpush3.bf16.msra.mxu0 %v9022_v27 }
 0x899   : > { %8098 = vmatprep.subr.bf16.mxu0 %v9943_v0 }
 0x89c   : > { %8099 = vmatpush3.bf16.msra.mxu0 %v9023_v28 }
 0x89d   : > { %8100 = vmatprep.subr.bf16.mxu0 %v9943_v0 }
 0x8a0   : > { %8101 = vmatpush3.bf16.msra.mxu0 %v9024_v29  ;;  %v9038_v29 = vld [vmem:[%s11696_s11 + $0x10] sm:$0xff]  }
 0x8a1   : > { %8102 = vmatprep.subr.bf16.mxu0 %v9943_v0 }
 0x8a4   : > { %8103 = vmatpush3.bf16.msra.mxu0 %v9025_v55 }
 0x8a5   : > { %8104 = vmatprep.subr.bf16.mxu0 %v9943_v0 }
 0x8a8   : > { %8105 = vmatpush3.bf16.msra.mxu0 %v9026_v8  ;;  %v9040_v8 = vld [vmem:[#allocation32 + $0x40] sm:$0xff]  }
 0x8a9   : > { %8106 = vmatprep.subr.bf16.mxu0 %v9943_v0 }
 0x8ac   : > { %8107 = vmatpush3.bf16.msra.mxu0 %v9027_v9 }
 0x8ad   : > { %8132 = vmatprep.subr.bf16.mxu0 %v9943_v0 }
 0x962   : > { %v3541_v58 = vpop.f32.mrb[48].mxu0 }
 0x963   : > { %v3542_v59 = vadd.f32 %v6970_v56, %v3541_v58  ;;  %v8070_v62 = vpop.f32.mrb[49].mxu0 }
 0x964   : > { %v3544_v63 = vpop.f32.mrb[50].mxu0  ;;  %v3931_v62 = vld [vmem:[#allocation6] sm:$0xf] }
 0x965   : > { %v3547_v2 = vmax.f32 %v3542_v59, 0.0  ;;  %v8071_v3 = vpop.f32.mrb[51].mxu0  ;;  %v3934_v63 = vld [vmem:[#allocation6 + $0x4] sm:$0x1] }
 0x967   : > { %v3548_v4 = vadd.f32 %v3547_v2, %v3432_v16 }
 0x969   : > { %v3549_v5 = vpack.c.bf16 %v3548_v4, %v3548_v4 }
 0x96b   : > { %8089 = vmatmul.mubr.bf16.vlgmr.msra.gmra.mrb[40].mxu1 %v3549_v5 }
 0x96c   : > { %8128 = vmatprep.mubr.msk.bf16.mxu1 %vm9944_vm1, %v9943_v0  ;;  %8113 = vmatpush3.bf16.msra.mxu1 %v9028_v10 }
 0x96d   : > { %8114 = vmatprep.subr.bf16.mxu1 %v9943_v0 }
 0x970   : > { %8115 = vmatpush3.bf16.msra.mxu1 %v9029_v7 }
 0x971   : > { %8116 = vmatprep.subr.bf16.mxu1 %v9943_v0 }
 0x974   : > { %8117 = vmatpush3.bf16.msra.mxu1 %v9030_v11  ;;  %v9041_v11 = vld [vmem:[#allocation32 + $0x48] sm:$0xff]  }
 0x975   : > { %8118 = vmatprep.subr.bf16.mxu1 %v9943_v0 }
 0x978   : > { %8119 = vmatpush3.bf16.msra.mxu1 %v9031_v30  ;;  %v9042_v30 = vld [vmem:[#allocation32 + $0x50] sm:$0xff]  }
 0x979   : > { %8120 = vmatprep.subr.bf16.mxu1 %v9943_v0 }
 0x97c   : > { %8121 = vmatpush3.bf16.msra.mxu1 %v9032_v31  ;;  %v9045_v31 = vld [vmem:[#allocation32] sm:$0xff]  }
 0x97d   : > { %8122 = vmatprep.subr.bf16.mxu1 %v9943_v0 }
 0x980   : > { %8123 = vmatpush3.bf16.msra.mxu1 %v9033_v32  ;;  %v9043_v32 = vld [vmem:[#allocation32 + $0x58] sm:$0xff]  }
 0x981   : > { %8124 = vmatprep.subr.bf16.mxu1 %v9943_v0 }
 0x984   : > { %8125 = vmatpush3.bf16.msra.mxu1 %v9034_v43  ;;  %v9050_v43 = vld [vmem:[#allocation32 + $0x78] sm:$0xff]  }
 0x985   : > { %8126 = vmatprep.subr.bf16.mxu1 %v9943_v0 }
 0x988   : > { %8127 = vmatpush3.bf16.msra.mxu1 %v9035_v44  ;;  %v9051_v44 = vld [vmem:[#allocation32 + $0x18] sm:$0xff]  }
 0x989   : > { %8138 = vmatprep.subr.bf16.mxu1 %v9943_v0 }
 0xa3e   : > { %v3657_v34 = vpop.f32.mrb[40].mxu1 }
 0xa3f   : > { %v3658_v35 = vadd.f32 %v6979_v33, %v3657_v34  ;;  %v8090_v37 = vpop.f32.mrb[41].mxu1  ;;  %v9044_v33 = vld [vmem:[#allocation32 + $0x60] sm:$0xff]   ;;  %v9046_v34 = vld [vmem:[#allocation32 + $0x68] sm:$0xff]  }
 0xa40   : > { %v3660_v38 = vpop.f32.mrb[42].mxu1  ;;  %v1383_v37 = vld [vmem:[#allocation7] sm:$0x1] }
 0xa41   : > { %v3663_v39 = vmax.f32 %v3658_v35, 0.0  ;;  %v8091_v40 = vpop.f32.mrb[43].mxu1  ;;  %v9047_v35 = vld [vmem:[#allocation32 + $0x8] sm:$0xff]   ;;  %v1386_v38 = vld [vmem:[#allocation7 + $0x4] sm:$0x1] }
 0xa42   : > { %v1384_v40 = vsel %vm10665_vm12, 0, %v1383_v37  ;;  %v9072_v37 = vld [vmem:[#allocation35 + $0x70] sm:$0xff]  }
 0xa43   : > { %v3664_v41 = vadd.f32 %v3663_v39, %v3548_v4  ;;  %v9048_v39 = vld [vmem:[#allocation32 + $0x70] sm:$0xff]   ;;  %1385 = vst [vmem:[#allocation7] sm:$0x1] %v1384_v40  ;;  %v9076_v40 = vld [vmem:[#allocation35 + $0x18] sm:$0xff]  }
 0xa45   : > { %v3665_v42 = vpack.c.bf16 %v3664_v41, %v3664_v41 }
 0xa47   : > { %8109 = vmatmul.mubr.bf16.vlgmr.msra.gmra.mrb[52].mxu0 %v3665_v42  ;;  %v9049_v42 = vld [vmem:[#allocation32 + $0x10] sm:$0xff]  }
 0xa48   : > { %8134 = vmatprep.mubr.msk.bf16.mxu0 %vm9944_vm1, %v9943_v0  ;;  %8133 = vmatpush3.bf16.msra.mxu0 %v9036_v22  ;;  %v9053_v22 = vld [vmem:[#allocation32 + $0x80] sm:$0xff]  }
 0xa49   : > { %8144 = vmatprep.subr.bf16.mxu0 %v9943_v0 }
 0xb1a   : > { %v3773_v46 = vpop.f32.mrb[52].mxu0 }
 0xb1b   : > { %v3774_v47 = vadd.f32 %v6988_v45, %v3773_v46  ;;  %v8110_v48 = vpop.f32.mrb[53].mxu0 }
 0xb1c   : > { %v3776_v50 = vpop.f32.mrb[54].mxu0  ;;  %v9054_v48 = vld [vmem:[#allocation32 + $0x28] sm:$0xff]  }
 0xb1d   : > { %v3779_v51 = vmax.f32 %v3774_v47, 0.0  ;;  %v8111_v52 = vpop.f32.mrb[55].mxu0  ;;  %v9056_v50 = vld [vmem:[#allocation32 + $0x30] sm:$0xff]  }
 0xb1f   : > { %v3780_v53 = vadd.f32 %v3779_v51, %v3664_v41  ;;  %v1387_v41 = vsel %vm10566_vm3, 0, %v1386_v38  ;;  %vm3913_vm3 = vcmask 392192   ;;  %v9058_v51 = vld [vmem:[#allocation32 + $0x38] sm:$0xff]  }
 0xb20   : > { %1388 = vst [vmem:[#allocation7 + $0x4] sm:$0x1] %v1387_v41  ;;  %v9075_v38 = vld [vmem:[#allocation35 + $0x10] sm:$0xff]   ;;  %v9078_v41 = vld [vmem:[#allocation35 + $0x20] sm:$0xff]  }
 0xb21   : > { %v3781_v54 = vpack.c.bf16 %v3780_v53, %v3780_v53 }
 0xb23   : > { %8129 = vmatmul.mubr.bf16.vlgmr.msra.gmra.mrb[44].mxu1 %v3781_v54 }
 0xb24   : > { %8140 = vmatprep.mubr.msk.bf16.mxu1 %vm9944_vm1, %v9943_v0  ;;  %8139 = vmatpush3.bf16.msra.mxu1 %v9037_v24 }
 0xb25   : > { %8150 = vmatprep.subr.bf16.mxu1 %v9943_v0 }
 0xbf6   : > { %v3887_v14 = vpop.f32.mrb[44].mxu1 }
 0xbf7   : > { %v11007_v15 = vadd.f32 %v6997_v13, %v3887_v14  ;;  %v8130_v17 = vpop.f32.mrb[45].mxu1 }
 0xbf8   : > { %v3890_v18 = vpop.f32.mrb[46].mxu1 }
 0xbf9   : > { %v7006_v19 = vclamps-f32 %v11007_v15, 5.0  ;;  %v8131_v20 = vpop.f32.mrb[47].mxu1 }
 0xbfb   : > { %v3896_v21 = vmul.f32 0.5, %v7006_v19  ;;  %v3910_v45 = vsel %vm3909_vm4, %v11007_v15, %v7006_v19 }
 0xbfd   : > { %v3897_v16 = vmul.f32 1.442695, %v3896_v21 }
 0xbff   : > { %9180 = vpow2.f32 %v3897_v16 }
 0xc09   : > { %v9181_v23 = vpop.eup %9180 }
 0xc0a   : > { %3900 = vrot.lane.b32.xlu0 %v9181_v23, %s9945_s4 }
 0xc7c   : > { %v3901_v26 = vpop.permute.xlu0 %3900 }
 0xc7d   : > { %v3903_v27 = vmul.f32 %v3901_v26, %v3895_v25  ;;  %v9055_v25 = vld [vmem:[#allocation32 + $0x88] sm:$0xff]  }
 0xc7f   : > { %v3904_v28 = vadd.f32 %v3903_v27, %v11007_v15  ;;  %v7019_v15 = vld [vmem:[#allocation31] ss:$0 sm:$0xff] }
 0xc81   : > { %v3915_v55 = vpack.c.bf16 %v3904_v28, %v3904_v28  ;;  %3906 = vrot.lane.b32.xlu0 %v3904_v28, %s9946_s23  ;;  %v4125_v28 = vld [vmem:[#allocation7] sm:$0xf] }
 0xc83   : > { %v3920_v56 = vshrl.u32 %v3915_v55, 16  ;;  %8135 = vmatmul.mubr.msk.bf16.vlgmr.msra.gmra.mrb[56].mxu0 %vm3909_vm4, %v3915_v55  ;;  %v3923_v59 = vshll.u32 %v3915_v55, 16 }
 0xc84   : > { %8145 = vmatpush3.bf16.msra.mxu0 %v9038_v29  ;;  %8146 = vmatprep.mubr.msk.bf16.mxu0 %vm9944_vm1, %v9943_v0  ;;  %v4128_v29 = vld [vmem:[#allocation7 + $0x4] sm:$0x1] }
 0xc85   : > { %v3922_v58 = vrot.slane %v3920_v56, 7  ;;  %8170 = vmatprep.subr.bf16.mxu0 %v9943_v0 }
 0xc87   : > { %v3925_v2 = vor.u32 %v3923_v59, %v3922_v58  ;;  %v3926_v3 = vrot.slane %v3922_v58, 4  ;;  %v9057_v58 = vld [vmem:[#allocation32 + $0x90] sm:$0xff]  }
 0xc89   : > { %v3932_v4 = vsel %vm3930_vm6, %v3925_v2, %v3931_v62  ;;  %v3935_v5 = vsel %vm11000_vm15, %v3926_v3, %v3934_v63  ;;  %v9059_v63 = vld [vmem:[#allocation32 + $0x98] sm:$0xff]   ;;  %v9060_v2 = vld [vmem:[#allocation32 + $0xa0] sm:$0xff]  }
 0xc8a   : > { %3933 = vst [vmem:[#allocation6] sm:$0xf] %v3932_v4  ;;  %3936 = vst [vmem:[#allocation6 + $0x4] sm:$0x1] %v3935_v5  ;;  %v9061_v4 = vld [vmem:[#allocation32 + $0xa8] sm:$0xff]   ;;  %v9062_v5 = vld [vmem:[#allocation32 + $0xb0] sm:$0xff]  }
 0xc91   : > { %v3937_v9 = vld [vmem:[#allocation6] sm:$0xf] }
 0xc92   : > { %8141 = vmatmul.mubr.msk.bf16.vlgmr.msra.gmra.mrb[48].mxu1 %vm3909_vm4, %v3937_v9  ;;  %v9039_v10 = vld [vmem:[#allocation6] sm:$0x1e]  }
 0xc93   : > { %8151 = vmatpush3.bf16.msra.mxu1 %v9040_v8  ;;  %8166 = vmatprep.mubr.msk.bf16.mxu1 %vm9944_vm1, %v9943_v0  ;;  %v4051_v7 = vrot.slane %v9039_v10, 1  ;;  %v9063_v8 = vld [vmem:[#allocation32 + $0xb8] sm:$0xff]  }
 0xc94   : > { %8152 = vmatprep.subr.bf16.mxu1 %v9943_v0 }
 0xc95   : > { %8147 = vmatmul.mubr.msk.bf16.vlgmr.msra.gmra.mrb[60].mxu0 %vm3909_vm4, %v4051_v7  ;;  %v9065_v7 = vld [vmem:[#allocation35 + $0x40] sm:$0xff]  }
 0xc96   : > { %8186 = vmatprep.mubr.msk.bf16.mxu0 %vm9944_vm1, %v9943_v0  ;;  %8171 = vmatpush3.bf16.msra.mxu0 %v9045_v31  ;;  %v9068_v31 = vld [vmem:[#allocation35 + $0x58] sm:$0xff]  }
 0xc97   : > { %8153 = vmatpush3.bf16.msra.mxu1 %v9041_v11  ;;  %8172 = vmatprep.subr.bf16.mxu0 %v9943_v0  ;;  %v9066_v11 = vld [vmem:[#allocation35 + $0x48] sm:$0xff]  }
 0xc98   : > { %8154 = vmatprep.subr.bf16.mxu1 %v9943_v0 }
 0xc9a   : > { %8173 = vmatpush3.bf16.msra.mxu0 %v9047_v35  ;;  %v9073_v35 = vld [vmem:[#allocation35 + $0x8] sm:$0xff]  }
 0xc9b   : > { %8155 = vmatpush3.bf16.msra.mxu1 %v9042_v30  ;;  %8174 = vmatprep.subr.bf16.mxu0 %v9943_v0  ;;  %v9067_v30 = vld [vmem:[#allocation35 + $0x50] sm:$0xff]  }
 0xc9c   : > { %8156 = vmatprep.subr.bf16.mxu1 %v9943_v0 }
 0xc9e   : > { %8175 = vmatpush3.bf16.msra.mxu0 %v9049_v42  ;;  %v9080_v42 = vld [vmem:[#allocation35 + $0x28] sm:$0xff]  }
 0xc9f   : > { %8157 = vmatpush3.bf16.msra.mxu1 %v9043_v32  ;;  %8176 = vmatprep.subr.bf16.mxu0 %v9943_v0  ;;  %v9071_v32 = vld [vmem:[#allocation35] sm:$0xff]  }
 0xca0   : > { %8158 = vmatprep.subr.bf16.mxu1 %v9943_v0 }
 0xca2   : > { %8177 = vmatpush3.bf16.msra.mxu0 %v9051_v44  ;;  %v9084_v44 = vld [vmem:[#allocation35 + $0x38] sm:$0xff]  }
 0xca3   : > { %8159 = vmatpush3.bf16.msra.mxu1 %v9044_v33  ;;  %8178 = vmatprep.subr.bf16.mxu0 %v9943_v0  ;;  %v9069_v33 = vld [vmem:[#allocation35 + $0x60] sm:$0xff]  }
 0xca4   : > { %8160 = vmatprep.subr.bf16.mxu1 %v9943_v0 }
 0xca6   : > { %8179 = vmatpush3.bf16.msra.mxu0 %v9052_v1 }
 0xca7   : > { %8161 = vmatpush3.bf16.msra.mxu1 %v9046_v34  ;;  %8180 = vmatprep.subr.bf16.mxu0 %v9943_v0  ;;  %v9070_v34 = vld [vmem:[#allocation35 + $0x68] sm:$0xff]  }
 0xca8   : > { %8162 = vmatprep.subr.bf16.mxu1 %v9943_v0 }
 0xcaa   : > { %8181 = vmatpush3.bf16.msra.mxu0 %v9054_v48 }
 0xcab   : > { %8163 = vmatpush3.bf16.msra.mxu1 %v9048_v39  ;;  %8182 = vmatprep.subr.bf16.mxu0 %v9943_v0  ;;  %v9074_v39 = vld [vmem:[#allocation35 + $0x78] sm:$0xff]  }
 0xcac   : > { %8164 = vmatprep.subr.bf16.mxu1 %v9943_v0 }
 0xcae   : > { %8183 = vmatpush3.bf16.msra.mxu0 %v9056_v50 }
 0xcaf   : > { %8165 = vmatpush3.bf16.msra.mxu1 %v9050_v43  ;;  %8184 = vmatprep.subr.bf16.mxu0 %v9943_v0  ;;  %v9082_v43 = vld [vmem:[#allocation35 + $0x30] sm:$0xff]  }
 0xcb0   : > { %8190 = vmatprep.subr.bf16.mxu1 %v9943_v0 }
 0xcb2   : > { %8185 = vmatpush3.bf16.msra.mxu0 %v9058_v51 }
 0xcb3   : > { %8210 = vmatprep.subr.bf16.mxu0 %v9943_v0 }
 0xcf3   : > { %v3907_v46 = vpop.permute.xlu0 %3906 }
 0xcf4   : > { %v3912_v47 = vsel %vm3911_vm2, %v3910_v45, %v3907_v46 }
 0xcf5   : > { %3914 = vst.msk [vmem:[%s1336_s12] sm:$0xff] %vm3913_vm3, %v3912_v47 }
 0xd56   : > { %v3986_v52 = vpop.f32.mrb[56].mxu0 }
 0xd57   : > { %v8136_v53 = vpop.f32.mrb[57].mxu0 }
 0xd58   : > { %v3989_v54 = vpop.f32.mrb[58].mxu0 }
 0xd59   : > { %v8137_v60 = vpop.f32.mrb[59].mxu0 }
 0xd5a   : > { %v7046_v60 = vld [vmem:[#allocation34] ss:$0 sm:$0xff] }
 0xd65   : > { %v4035_v61 = vpop.f32.mrb[48].mxu1 }
 0xd66   : > { %v4036_v6 = vadd.f32 %v4035_v61, %v3986_v52  ;;  %v8142_v12 = vpop.f32.mrb[49].mxu1 }
 0xd67   : > { %v4038_v36 = vpop.f32.mrb[50].mxu1 }
 0xd68   : > { %v8143_v13 = vpop.f32.mrb[51].mxu1  ;;  %v4095_v14 = vpop.f32.mrb[60].mxu0 }
 0xd69   : > { %v4101_v17 = vadd.f32 %v4095_v14, %v4036_v6  ;;  %v8148_v18 = vpop.f32.mrb[61].mxu0 }
 0xd6a   : > { %v4098_v19 = vpop.f32.mrb[62].mxu0 }
 0xd6b   : > { %v4109_v20 = vadd.f32 %v7019_v15, %v4101_v17  ;;  %v8149_v21 = vpop.f32.mrb[63].mxu0  ;;  %v9077_v17 = vld [vmem:[#allocation35 + $0x80] sm:$0xff]  }
 0xd6d   : > { %v11060_v16 = vmax.f32 %v4109_v20, 0.0  ;;  %v9079_v20 = vld [vmem:[#allocation35 + $0x88] sm:$0xff]  }
 0xd6f   : > { %v4111_v23 = vpack.c.bf16 %v11060_v16, %v11060_v16 }
 0xd71   : > { %v4116_v24 = vshrl.u32 %v4111_v23, 16  ;;  %8167 = vmatmul.mubr.bf16.vlgmr.msra.gmra.mrb[52].mxu1 %v4111_v23  ;;  %v4119_v27 = vshll.u32 %v4111_v23, 16 }
 0xd72   : > { %8191 = vmatpush3.bf16.msra.mxu1 %v9053_v22  ;;  %8206 = vmatprep.mubr.msk.bf16.mxu1 %vm9944_vm1, %v9943_v0 }
 0xd73   : > { %v4118_v26 = vrot.slane %v4116_v24, 7  ;;  %8192 = vmatprep.subr.bf16.mxu1 %v9943_v0 }
 0xd75   : > { %v4121_v55 = vor.u32 %v4119_v27, %v4118_v26  ;;  %v4122_v56 = vrot.slane %v4118_v26, 4  ;;  %v9081_v27 = vld [vmem:[#allocation35 + $0x90] sm:$0xff]  }
 0xd76   : > { %8193 = vmatpush3.bf16.msra.mxu1 %v9055_v25 }
 0xd77   : > { %v4126_v59 = vsel %vm10742_vm13, %v4121_v55, %v4125_v28  ;;  %v4129_v62 = vsel %vm10665_vm12, %v4122_v56, %v4128_v29  ;;  %8194 = vmatprep.subr.bf16.mxu1 %v9943_v0  ;;  %v9083_v29 = vld [vmem:[#allocation35 + $0x98] sm:$0xff]   ;;  %v9085_v55 = vld [vmem:[#allocation35 + $0xa0] sm:$0xff]  }
 0xd78   : > { %4127 = vst [vmem:[#allocation7] sm:$0xf] %v4126_v59  ;;  %4130 = vst [vmem:[#allocation7 + $0x4] sm:$0x1] %v4129_v62  ;;  %v9087_v62 = vld [vmem:[#allocation35 + $0xa8] sm:$0xff]  }
 0xd7a   : > { %8195 = vmatpush3.bf16.msra.mxu1 %v9057_v58  ;;  %v11109_v58 = vld [vmem:[#allocation38 + $0x40] sm:$0xff]  }
 0xd7b   : > { %8196 = vmatprep.subr.bf16.mxu1 %v9943_v0 }
 0xd7e   : > { %8197 = vmatpush3.bf16.msra.mxu1 %v9059_v63  ;;  %v11113_v63 = vld [vmem:[#allocation38 + $0x48] sm:$0xff]  }
 0xd7f   : > { %v4131_v3 = vld [vmem:[#allocation7] sm:$0xf]  ;;  %8198 = vmatprep.subr.bf16.mxu1 %v9943_v0  ;;  %v4483_v26 = vld [vmem:[#allocation7 + $0x4] sm:$0x1] }
 0xd80   : > { %8187 = vmatmul.mubr.bf16.vlgmr.msra.gmra.mrb[64].mxu0 %v4131_v3  ;;  %v9064_v9 = vld [vmem:[#allocation7] sm:$0x1e]  }
 0xd81   : > { %8226 = vmatprep.mubr.msk.bf16.mxu0 %vm9944_vm1, %v9943_v0  ;;  %v4365_v10 = vrot.slane %v9064_v9, 1  ;;  %8211 = vmatpush3.bf16.msra.mxu0 %v9065_v7  ;;  %v4480_v25 = vld [vmem:[#allocation7] sm:$0xf]  ;;  %v11136_v9 = vld [vmem:[#allocation38 + $0x68] sm:$0xff]  }
 0xd82   : > { %8199 = vmatpush3.bf16.msra.mxu1 %v9060_v2  ;;  %8212 = vmatprep.subr.bf16.mxu0 %v9943_v0  ;;  %v9088_v2 = vld [vmem:[#allocation35 + $0xb0] sm:$0xff]   ;;  %v11145_v7 = vld [vmem:[#allocation38 + $0x78] sm:$0xff]  }
 0xd83   : > { %8200 = vmatprep.subr.bf16.mxu1 %v9943_v0  ;;  %v11120_v3 = vld [vmem:[#allocation38 + $0x50] sm:$0xff]  }
 0xd85   : > { %8213 = vmatpush3.bf16.msra.mxu0 %v9066_v11  ;;  %v11149_v11 = vld [vmem:[#allocation38] sm:$0xff]  }
 0xd86   : > { %8201 = vmatpush3.bf16.msra.mxu1 %v9061_v4  ;;  %8214 = vmatprep.subr.bf16.mxu0 %v9943_v0  ;;  %v9089_v4 = vld [vmem:[#allocation35 + $0xb8] sm:$0xff]  }
 0xd87   : > { %8202 = vmatprep.subr.bf16.mxu1 %v9943_v0 }
 0xd89   : > { %8215 = vmatpush3.bf16.msra.mxu0 %v9067_v30  ;;  %v11153_v30 = vld [vmem:[#allocation38 + $0x8] sm:$0xff]  }
 0xd8a   : > { %8203 = vmatpush3.bf16.msra.mxu1 %v9062_v5  ;;  %8216 = vmatprep.subr.bf16.mxu0 %v9943_v0  ;;  %v11125_v5 = vld [vmem:[#allocation38 + $0x58] sm:$0xff]  }
 0xd8b   : > { %8204 = vmatprep.subr.bf16.mxu1 %v9943_v0 }
 0xd8d   : > { %8217 = vmatpush3.bf16.msra.mxu0 %v9068_v31  ;;  %v1389_v31 = vld [vmem:[#allocation8] sm:$0x1] }
 0xd8e   : > { %8205 = vmatpush3.bf16.msra.mxu1 %v9063_v8  ;;  %8218 = vmatprep.subr.bf16.mxu0 %v9943_v0  ;;  %v11130_v8 = vld [vmem:[#allocation38 + $0x60] sm:$0xff]  }
 0xd8f   : > { %8230 = vmatprep.subr.bf16.mxu1 %v9943_v0 }
 0xd91   : > { %8207 = vmatmul.mubr.bf16.vlgmr.msra.gmra.mrb[56].mxu1 %v4365_v10  ;;  %8219 = vmatpush3.bf16.msra.mxu0 %v9069_v33  ;;  %v11141_v10 = vld [vmem:[#allocation38 + $0x70] sm:$0xff]  }
 0xd92   : > { %8246 = vmatprep.mubr.msk.bf16.mxu1 %vm9944_vm1, %v9943_v0  ;;  %8231 = vmatpush3.bf16.msra.mxu1 %v9071_v32  ;;  %v1390_v32 = vsel %vm10665_vm12, 0, %v1389_v31  ;;  %v11159_v33 = vld [vmem:[#allocation38 + $0x10] sm:$0xff]  }
 0xd93   : > { %8232 = vmatprep.subr.bf16.mxu1 %v9943_v0  ;;  %8220 = vmatprep.subr.bf16.mxu0 %v9943_v0  ;;  %1391 = vst [vmem:[#allocation8] sm:$0x1] %v1390_v32 }
 0xd95   : > { %8221 = vmatpush3.bf16.msra.mxu0 %v9070_v34  ;;  %v11163_v34 = vld [vmem:[#allocation38 + $0x18] sm:$0xff]  }
 0xd96   : > { %8222 = vmatprep.subr.bf16.mxu0 %v9943_v0  ;;  %8233 = vmatpush3.bf16.msra.mxu1 %v9073_v35  ;;  %v11167_v35 = vld [vmem:[#allocation38 + $0x20] sm:$0xff]  }
 0xd97   : > { %8234 = vmatprep.subr.bf16.mxu1 %v9943_v0 }
 0xd99   : > { %8223 = vmatpush3.bf16.msra.mxu0 %v9072_v37  ;;  %v11171_v37 = vld [vmem:[#allocation38 + $0x28] sm:$0xff]  }
 0xd9a   : > { %8224 = vmatprep.subr.bf16.mxu0 %v9943_v0  ;;  %8235 = vmatpush3.bf16.msra.mxu1 %v9075_v38  ;;  %v11175_v38 = vld [vmem:[#allocation38 + $0x30] sm:$0xff]  }
 0xd9b   : > { %8236 = vmatprep.subr.bf16.mxu1 %v9943_v0 }
 0xd9d   : > { %8225 = vmatpush3.bf16.msra.mxu0 %v9074_v39  ;;  %v11179_v39 = vld [vmem:[#allocation38 + $0x38] sm:$0xff]  }
 0xd9e   : > { %8250 = vmatprep.subr.bf16.mxu0 %v9943_v0  ;;  %8237 = vmatpush3.bf16.msra.mxu1 %v9076_v40  ;;  %v7048_v40 = vld [vmem:[#allocation37] ss:$0 sm:$0xff] }
 0xd9f   : > { %8238 = vmatprep.subr.bf16.mxu1 %v9943_v0 }
 0xda2   : > { %8239 = vmatpush3.bf16.msra.mxu1 %v9078_v41 }
 0xda3   : > { %8240 = vmatprep.subr.bf16.mxu1 %v9943_v0 }
 0xda6   : > { %8241 = vmatpush3.bf16.msra.mxu1 %v9080_v42 }
 0xda7   : > { %8242 = vmatprep.subr.bf16.mxu1 %v9943_v0 }
 0xdaa   : > { %8243 = vmatpush3.bf16.msra.mxu1 %v9082_v43 }
 0xdab   : > { %8244 = vmatprep.subr.bf16.mxu1 %v9943_v0 }
 0xdae   : > { %8245 = vmatpush3.bf16.msra.mxu1 %v9084_v44 }
 0xdaf   : > { %8270 = vmatprep.subr.bf16.mxu1 %v9943_v0 }
 0xe44   : > { %v4247_v1 = vpop.f32.mrb[52].mxu1 }
 0xe45   : > { %v8168_v45 = vpop.f32.mrb[53].mxu1 }
 0xe46   : > { %v4250_v46 = vpop.f32.mrb[54].mxu1 }
 0xe47   : > { %v8169_v47 = vpop.f32.mrb[55].mxu1  ;;  %v11185_v46 = vld [vmem:[#allocation38 + $0x80] sm:$0xff]  }
 0xe53   : > { %v4335_v48 = vpop.f32.mrb[64].mxu0 }
 0xe54   : > { %v4336_v50 = vadd.f32 %v4335_v48, %v4247_v1  ;;  %v8188_v51 = vpop.f32.mrb[65].mxu0 }
 0xe55   : > { %v4338_v52 = vpop.f32.mrb[66].mxu0 }
 0xe56   : > { %v8189_v53 = vpop.f32.mrb[67].mxu0 }
 0xe64   : > { %v4449_v54 = vpop.f32.mrb[56].mxu1 }
 0xe65   : > { %v4455_v61 = vadd.f32 %v4449_v54, %v4336_v50  ;;  %v8208_v6 = vpop.f32.mrb[57].mxu1  ;;  %v11194_v50 = vld [vmem:[#allocation38 + $0x88] sm:$0xff]  }
 0xe66   : > { %v4452_v12 = vpop.f32.mrb[58].mxu1  ;;  %v11201_v6 = vld [vmem:[#allocation38 + $0x90] sm:$0xff]  }
 0xe67   : > { %v4463_v36 = vadd.f32 %v7046_v60, %v4455_v61  ;;  %v8209_v13 = vpop.f32.mrb[59].mxu1 }
 0xe68   : > { %v11209_v13 = vld [vmem:[#allocation38 + $0x98] sm:$0xff]  }
 0xe69   : > { %v4464_v14 = vmax.f32 %v4463_v36, 0.0 }
 0xe6b   : > { %v4465_v15 = vadd.f32 %v4464_v14, %v11060_v16 }
 0xe6d   : > { %v4466_v18 = vpack.c.bf16 %v4465_v15, %v4465_v15 }
 0xe6f   : > { %v4471_v19 = vshrl.u32 %v4466_v18, 16  ;;  %8227 = vmatmul.mubr.bf16.vlgmr.msra.gmra.mrb[68].mxu0 %v4466_v18  ;;  %v4474_v22 = vshll.u32 %v4466_v18, 16 }
 0xe70   : > { %8251 = vmatpush3.bf16.msra.mxu0 %v9077_v17  ;;  %8266 = vmatprep.mubr.msk.bf16.mxu0 %vm9944_vm1, %v9943_v0 }
 0xe71   : > { %v4473_v21 = vrot.slane %v4471_v19, 7  ;;  %8252 = vmatprep.subr.bf16.mxu0 %v9943_v0 }
 0xe73   : > { %v4476_v23 = vor.u32 %v4474_v22, %v4473_v21  ;;  %v4477_v24 = vrot.slane %v4473_v21, 4  ;;  %v11221_v21 = vld [vmem:[#allocation38 + $0xb0] sm:$0xff]  }
 0xe74   : > { %8253 = vmatpush3.bf16.msra.mxu0 %v9079_v20  ;;  %v11217_v20 = vld [vmem:[#allocation38 + $0xa8] sm:$0xff]  }
 0xe75   : > { %v4481_v16 = vsel %vm10742_vm13, %v4476_v23, %v4480_v25  ;;  %v4484_v28 = vsel %vm10665_vm12, %v4477_v24, %v4483_v26  ;;  %8254 = vmatprep.subr.bf16.mxu0 %v9943_v0  ;;  %v11225_v23 = vld [vmem:[#allocation38 + $0xb8] sm:$0xff]  }
 0xe76   : > { %4482 = vst [vmem:[#allocation7] sm:$0xf] %v4481_v16  ;;  %4485 = vst [vmem:[#allocation7 + $0x4] sm:$0x1] %v4484_v28 }
 0xe78   : > { %8255 = vmatpush3.bf16.msra.mxu0 %v9081_v27 }
 0xe79   : > { %8256 = vmatprep.subr.bf16.mxu0 %v9943_v0 }
 0xe7c   : > { %8257 = vmatpush3.bf16.msra.mxu0 %v9083_v29 }
 0xe7d   : > { %8258 = vmatprep.subr.bf16.mxu0 %v9943_v0  ;;  %v9086_v56 = vld [vmem:[#allocation7] sm:$0x1e]  }
 0xe7e   : > { %v4638_v59 = vrot.slane %v9086_v56, 1  ;;  %v4834_v60 = vld [vmem:[#allocation7] sm:$0xf]  ;;  %v4837_v61 = vld [vmem:[#allocation7 + $0x4] sm:$0x1] }
 0xe80   : > { %8259 = vmatpush3.bf16.msra.mxu0 %v9085_v55  ;;  %8247 = vmatmul.mubr.bf16.vlgmr.msra.gmra.mrb[60].mxu1 %v4638_v59 }
 0xe81   : > { %8260 = vmatprep.subr.bf16.mxu0 %v9943_v0  ;;  %8271 = vmatpush3.bf16.msra.mxu1 %v11109_v58 }
 0xe82   : > { %8286 = vmatprep.mubr.msk.bf16.mxu1 %vm9944_vm1, %v9943_v0  ;;  %8272 = vmatprep.subr.bf16.mxu1 %v9943_v0 }
 0xe84   : > { %8261 = vmatpush3.bf16.msra.mxu0 %v9087_v62  ;;  %v4853_v62 = vld [vmem:[#allocation8] sm:$0xf] }
 0xe85   : > { %8262 = vmatprep.subr.bf16.mxu0 %v9943_v0  ;;  %8273 = vmatpush3.bf16.msra.mxu1 %v11113_v63 }
 0xe86   : > { %8274 = vmatprep.subr.bf16.mxu1 %v9943_v0 }
 0xe88   : > { %8263 = vmatpush3.bf16.msra.mxu0 %v9088_v2  ;;  %v4856_v2 = vld [vmem:[#allocation8 + $0x4] sm:$0x1] }
 0xe89   : > { %8264 = vmatprep.subr.bf16.mxu0 %v9943_v0  ;;  %8275 = vmatpush3.bf16.msra.mxu1 %v11120_v3 }
 0xe8a   : > { %8276 = vmatprep.subr.bf16.mxu1 %v9943_v0 }
 0xe8c   : > { %8265 = vmatpush3.bf16.msra.mxu0 %v9089_v4 }
 0xe8d   : > { %8290 = vmatprep.subr.bf16.mxu0 %v9943_v0  ;;  %8277 = vmatpush3.bf16.msra.mxu1 %v11125_v5 }
 0xe8e   : > { %8278 = vmatprep.subr.bf16.mxu1 %v9943_v0 }
 0xe8f   : > { %8267 = vmatmul.mubr.bf16.vlgmr.msra.gmra.mrb[72].mxu0 %v4466_v18  ;;  %v11213_v18 = vld [vmem:[#allocation38 + $0xa0] sm:$0xff]  }
 0xe90   : > { %8306 = vmatprep.mubr.msk.bf16.mxu0 %vm9944_vm1, %v9943_v0  ;;  %8291 = vmatpush3.bf16.msra.mxu0 %v11149_v11 }
 0xe91   : > { %8279 = vmatpush3.bf16.msra.mxu1 %v11130_v8  ;;  %8292 = vmatprep.subr.bf16.mxu0 %v9943_v0 }
 0xe92   : > { %8280 = vmatprep.subr.bf16.mxu1 %v9943_v0 }
 0xe94   : > { %8293 = vmatpush3.bf16.msra.mxu0 %v11153_v30 }
 0xe95   : > { %8281 = vmatpush3.bf16.msra.mxu1 %v11136_v9  ;;  %8294 = vmatprep.subr.bf16.mxu0 %v9943_v0 }
 0xe96   : > { %8282 = vmatprep.subr.bf16.mxu1 %v9943_v0 }
 0xe98   : > { %8295 = vmatpush3.bf16.msra.mxu0 %v11159_v33 }
 0xe99   : > { %8283 = vmatpush3.bf16.msra.mxu1 %v11141_v10  ;;  %8296 = vmatprep.subr.bf16.mxu0 %v9943_v0 }
 0xe9a   : > { %8284 = vmatprep.subr.bf16.mxu1 %v9943_v0 }
 0xe9c   : > { %8297 = vmatpush3.bf16.msra.mxu0 %v11163_v34 }
 0xe9d   : > { %8285 = vmatpush3.bf16.msra.mxu1 %v11145_v7  ;;  %8298 = vmatprep.subr.bf16.mxu0 %v9943_v0 }
 0xe9e   : > { %8310 = vmatprep.subr.bf16.mxu1 %v9943_v0 }
 0xea0   : > { %8299 = vmatpush3.bf16.msra.mxu0 %v11167_v35 }
 0xea1   : > { %8300 = vmatprep.subr.bf16.mxu0 %v9943_v0 }
 0xea4   : > { %8301 = vmatpush3.bf16.msra.mxu0 %v11171_v37 }
 0xea5   : > { %8302 = vmatprep.subr.bf16.mxu0 %v9943_v0 }
 0xea8   : > { %8303 = vmatpush3.bf16.msra.mxu0 %v11175_v38 }
 0xea9   : > { %8304 = vmatprep.subr.bf16.mxu0 %v9943_v0 }
 0xeac   : > { %8305 = vmatpush3.bf16.msra.mxu0 %v11179_v39 }
 0xead   : > { %8330 = vmatprep.subr.bf16.mxu0 %v9943_v0 }
 0xf42   : > { %v4592_v41 = vpop.f32.mrb[68].mxu0 }
 0xf43   : > { %v4593_v42 = vadd.f32 %v7048_v40, %v4592_v41  ;;  %v8228_v43 = vpop.f32.mrb[69].mxu0  ;;  %v11363_v41 = vld [vmem:[%s11700_s1 + $0x28] sm:$0xff]  }
 0xf44   : > { %v4595_v44 = vpop.f32.mrb[70].mxu0 }
 0xf45   : > { %v11183_v1 = vmax.f32 %v4593_v42, 0.0  ;;  %v8229_v45 = vpop.f32.mrb[71].mxu0 }
 0xf46   : > { %v11368_v45 = vld [vmem:[%s11700_s1 + $0x30] sm:$0xff]  }
 0xf47   : > { %v11189_v47 = vpack.c.bf16 %v11183_v1, %v11183_v1 }
 0xf49   : > { %v4825_v48 = vshrl.u32 %v11189_v47, 16  ;;  %8287 = vmatmul.mubr.bf16.vlgmr.msra.gmra.mrb[64].mxu1 %v11189_v47  ;;  %v4828_v52 = vshll.u32 %v11189_v47, 16 }
 0xf4a   : > { %8311 = vmatpush3.bf16.msra.mxu1 %v11185_v46  ;;  %8326 = vmatprep.mubr.msk.bf16.mxu1 %vm9944_vm1, %v9943_v0 }
 0xf4b   : > { %v4827_v51 = vrot.slane %v4825_v48, 7  ;;  %8312 = vmatprep.subr.bf16.mxu1 %v9943_v0 }
 0xf4d   : > { %v4830_v53 = vor.u32 %v4828_v52, %v4827_v51  ;;  %v4831_v54 = vrot.slane %v4827_v51, 4 }
 0xf4e   : > { %8313 = vmatpush3.bf16.msra.mxu1 %v11194_v50 }
 0xf4f   : > { %v4835_v12 = vsel %vm10742_vm13, %v4830_v53, %v4834_v60  ;;  %v4838_v36 = vsel %vm10665_vm12, %v4831_v54, %v4837_v61  ;;  %8314 = vmatprep.subr.bf16.mxu1 %v9943_v0  ;;  %v7101_v61 = vld [vmem:[#allocation40] ss:$0 sm:$0xff] }
 0xf50   : > { %4839 = vst [vmem:[#allocation7 + $0x4] sm:$0x1] %v4838_v36  ;;  %4836 = vst [vmem:[#allocation7] sm:$0xf] %v4835_v12 }
 0xf52   : > { %8315 = vmatpush3.bf16.msra.mxu1 %v11201_v6 }
 0xf53   : > { %8316 = vmatprep.subr.bf16.mxu1 %v9943_v0  ;;  %v4722_v14 = vpop.f32.mrb[60].mxu1 }
 0xf54   : > { %v8248_v15 = vpop.f32.mrb[61].mxu1 }
 0xf55   : > { %v4725_v17 = vpop.f32.mrb[62].mxu1 }
 0xf56   : > { %8317 = vmatpush3.bf16.msra.mxu1 %v11209_v13  ;;  %v8249_v19 = vpop.f32.mrb[63].mxu1  ;;  %v11381_v17 = vld [vmem:[%s11700_s1 + $0x80] sm:$0xff]  }
 0xf57   : > { %8318 = vmatprep.subr.bf16.mxu1 %v9943_v0 }
 0xf5a   : > { %8319 = vmatpush3.bf16.msra.mxu1 %v11213_v18 }
 0xf5b   : > { %8320 = vmatprep.subr.bf16.mxu1 %v9943_v0 }
 0xf5e   : > { %8321 = vmatpush3.bf16.msra.mxu1 %v11217_v20 }
 0xf5f   : > { %8322 = vmatprep.subr.bf16.mxu1 %v9943_v0 }
 0xf62   : > { %v4810_v22 = vpop.f32.mrb[72].mxu0  ;;  %8323 = vmatpush3.bf16.msra.mxu1 %v11221_v21 }
 0xf63   : > { %v4811_v24 = vadd.f32 %v4810_v22, %v4722_v14  ;;  %v8268_v25 = vpop.f32.mrb[73].mxu0  ;;  %8324 = vmatprep.subr.bf16.mxu1 %v9943_v0 }
 0xf64   : > { %v4813_v26 = vpop.f32.mrb[74].mxu0  ;;  %v5333_v25 = vld [vmem:[#allocation7] sm:$0xf] }
 0xf65   : > { %v4816_v27 = vadd.f32 %v7048_v40, %v4811_v24  ;;  %v8269_v16 = vpop.f32.mrb[75].mxu0  ;;  %v5336_v26 = vld [vmem:[#allocation7 + $0x4] sm:$0x1] }
 0xf66   : > { %8325 = vmatpush3.bf16.msra.mxu1 %v11225_v23  ;;  %v11399_v16 = vld [vmem:[%s11700_s1 + $0x90] sm:$0xff]  }
 0xf67   : > { %v11229_v28 = vmax.f32 %v4816_v27, 0.0  ;;  %8350 = vmatprep.subr.bf16.mxu1 %v9943_v0 }
 0xf69   : > { %v4820_v29 = vpack.c.bf16 %v11229_v28, %v11229_v28 }
 0xf6b   : > { %v4844_v55 = vshrl.u32 %v4820_v29, 16  ;;  %8327 = vmatmul.mubr.bf16.vlgmr.msra.gmra.mrb[68].mxu1 %v4820_v29  ;;  %v4847_v59 = vshll.u32 %v4820_v29, 16 }
 0xf6c   : > { %8351 = vmatpush3.bf16.msra.mxu1 %v11149_v11  ;;  %8366 = vmatprep.mubr.msk.bf16.mxu1 %vm9944_vm1, %v9943_v0 }
 0xf6d   : > { %v4846_v56 = vrot.slane %v4844_v55, 7  ;;  %8352 = vmatprep.subr.bf16.mxu1 %v9943_v0 }
 0xf6f   : > { %v4849_v4 = vor.u32 %v4847_v59, %v4846_v56  ;;  %v4850_v31 = vrot.slane %v4846_v56, 4 }
 0xf70   : > { %8353 = vmatpush3.bf16.msra.mxu1 %v11153_v30  ;;  %v11328_v30 = vld [vmem:[%s11700_s1 + $0x70] sm:$0xff]  }
 0xf71   : > { %v4854_v32 = vsel %vm10742_vm13, %v4849_v4, %v4853_v62  ;;  %v4857_v40 = vsel %vm10665_vm12, %v4850_v31, %v4856_v2  ;;  %8354 = vmatprep.subr.bf16.mxu1 %v9943_v0  ;;  %v11408_v62 = vld [vmem:[%s11700_s1 + $0x98] sm:$0xff]   ;;  %v11413_v2 = vld [vmem:[%s11700_s1 + $0xa0] sm:$0xff]   ;;  %v11418_v4 = vld [vmem:[%s11700_s1 + $0xa8] sm:$0xff]  }
 0xf72   : > { %4855 = vst [vmem:[#allocation8] sm:$0xf] %v4854_v32  ;;  %4858 = vst [vmem:[#allocation8 + $0x4] sm:$0x1] %v4857_v40 }
 0xf74   : > { %8355 = vmatpush3.bf16.msra.mxu1 %v11159_v33  ;;  %v11333_v33 = vld [vmem:[%s11700_s1 + $0x78] sm:$0xff]  }
 0xf75   : > { %8356 = vmatprep.subr.bf16.mxu1 %v9943_v0 }
 0xf78   : > { %8357 = vmatpush3.bf16.msra.mxu1 %v11163_v34  ;;  %v11338_v34 = vld [vmem:[%s11700_s1] sm:$0xff]  }
 0xf79   : > { %v4859_v11 = vld [vmem:[#allocation8] sm:$0xf]  ;;  %8358 = vmatprep.subr.bf16.mxu1 %v9943_v0 }
 0xf7a   : > { %8307 = vmatmul.mubr.bf16.vlgmr.msra.gmra.mrb[76].mxu0 %v4859_v11 }
 0xf7b   : > { %8331 = vmatpush3.bf16.msra.mxu0 %v11109_v58  ;;  %8346 = vmatprep.mubr.msk.bf16.mxu0 %vm9944_vm1, %v9943_v0  ;;  %v11283_v58 = vld [vmem:[%s11700_s1 + $0x40] sm:$0xff]  }
 0xf7c   : > { %8359 = vmatpush3.bf16.msra.mxu1 %v11167_v35  ;;  %8332 = vmatprep.subr.bf16.mxu0 %v9943_v0  ;;  %v11342_v35 = vld [vmem:[%s11700_s1 + $0x8] sm:$0xff]  }
 0xf7d   : > { %8360 = vmatprep.subr.bf16.mxu1 %v9943_v0 }
 0xf7f   : > { %8333 = vmatpush3.bf16.msra.mxu0 %v11113_v63  ;;  %v9114_v63 = vld [vmem:[#allocation7] sm:$0x1e]  }
 0xf80   : > { %8361 = vmatpush3.bf16.msra.mxu1 %v11171_v37  ;;  %8334 = vmatprep.subr.bf16.mxu0 %v9943_v0  ;;  %v11348_v37 = vld [vmem:[%s11700_s1 + $0x10] sm:$0xff]  }
 0xf81   : > { %8362 = vmatprep.subr.bf16.mxu1 %v9943_v0 }
 0xf83   : > { %8335 = vmatpush3.bf16.msra.mxu0 %v11120_v3  ;;  %v5262_v3 = vrot.slane %v9114_v63, 1  ;;  %v11423_v63 = vld [vmem:[%s11700_s1 + $0xb0] sm:$0xff]  }
 0xf84   : > { %8363 = vmatpush3.bf16.msra.mxu1 %v11175_v38  ;;  %8336 = vmatprep.subr.bf16.mxu0 %v9943_v0  ;;  %v11353_v38 = vld [vmem:[%s11700_s1 + $0x18] sm:$0xff]  }
 0xf85   : > { %8364 = vmatprep.subr.bf16.mxu1 %v9943_v0 }
 0xf87   : > { %8337 = vmatpush3.bf16.msra.mxu0 %v11125_v5  ;;  %v11303_v5 = vld [vmem:[%s11700_s1 + $0x48] sm:$0xff]  }
 0xf88   : > { %8365 = vmatpush3.bf16.msra.mxu1 %v11179_v39  ;;  %8338 = vmatprep.subr.bf16.mxu0 %v9943_v0  ;;  %v11358_v39 = vld [vmem:[%s11700_s1 + $0x20] sm:$0xff]  }
 0xf89   : > { %8390 = vmatprep.subr.bf16.mxu1 %v9943_v0 }
 0xf8b   : > { %8339 = vmatpush3.bf16.msra.mxu0 %v11130_v8  ;;  %8367 = vmatmul.mubr.bf16.vlgmr.msra.gmra.mrb[72].mxu1 %v11189_v47  ;;  %v11308_v8 = vld [vmem:[%s11700_s1 + $0x50] sm:$0xff]   ;;  %v11373_v47 = vld [vmem:[%s11700_s1 + $0x38] sm:$0xff]  }
 0xf8c   : > { %8340 = vmatprep.subr.bf16.mxu0 %v9943_v0  ;;  %8406 = vmatprep.mubr.msk.bf16.mxu1 %vm9944_vm1, %v9943_v0 }
 0xf8d   : > { %8391 = vmatpush3.bf16.msra.mxu1 %v11283_v58 }
 0xf8e   : > { %8392 = vmatprep.subr.bf16.mxu1 %v9943_v0 }
 0xf8f   : > { %8341 = vmatpush3.bf16.msra.mxu0 %v11136_v9  ;;  %v11312_v9 = vld [vmem:[%s11700_s1 + $0x58] sm:$0xff]  }
 0xf90   : > { %8342 = vmatprep.subr.bf16.mxu0 %v9943_v0 }
 0xf91   : > { %8393 = vmatpush3.bf16.msra.mxu1 %v11303_v5 }
 0xf92   : > { %8394 = vmatprep.subr.bf16.mxu1 %v9943_v0 }
 0xf93   : > { %8343 = vmatpush3.bf16.msra.mxu0 %v11141_v10  ;;  %v11317_v10 = vld [vmem:[%s11700_s1 + $0x60] sm:$0xff]  }
 0xf94   : > { %8344 = vmatprep.subr.bf16.mxu0 %v9943_v0 }
 0xf95   : > { %8395 = vmatpush3.bf16.msra.mxu1 %v11308_v8 }
 0xf96   : > { %8396 = vmatprep.subr.bf16.mxu1 %v9943_v0 }
 0xf97   : > { %8345 = vmatpush3.bf16.msra.mxu0 %v11145_v7  ;;  %v11323_v7 = vld [vmem:[%s11700_s1 + $0x68] sm:$0xff]  }
 0xf98   : > { %8370 = vmatprep.subr.bf16.mxu0 %v9943_v0 }
 0xf99   : > { %8397 = vmatpush3.bf16.msra.mxu1 %v11312_v9 }
 0xf9a   : > { %8347 = vmatmul.mubr.bf16.vlgmr.msra.gmra.mrb[80].mxu0 %v4820_v29  ;;  %8398 = vmatprep.subr.bf16.mxu1 %v9943_v0 }
 0xf9b   : > { %8371 = vmatpush3.bf16.msra.mxu0 %v11185_v46  ;;  %8386 = vmatprep.mubr.msk.bf16.mxu0 %vm9944_vm1, %v9943_v0 }
 0xf9c   : > { %8372 = vmatprep.subr.bf16.mxu0 %v9943_v0 }
 0xf9d   : > { %8399 = vmatpush3.bf16.msra.mxu1 %v11317_v10 }
 0xf9e   : > { %8400 = vmatprep.subr.bf16.mxu1 %v9943_v0 }
 0xf9f   : > { %8373 = vmatpush3.bf16.msra.mxu0 %v11194_v50 }
 0xfa0   : > { %8374 = vmatprep.subr.bf16.mxu0 %v9943_v0 }
 0xfa1   : > { %8401 = vmatpush3.bf16.msra.mxu1 %v11323_v7 }
 0xfa2   : > { %8402 = vmatprep.subr.bf16.mxu1 %v9943_v0 }
 0xfa3   : > { %8375 = vmatpush3.bf16.msra.mxu0 %v11201_v6 }
 0xfa4   : > { %8376 = vmatprep.subr.bf16.mxu0 %v9943_v0 }
 0xfa5   : > { %8403 = vmatpush3.bf16.msra.mxu1 %v11328_v30 }
 0xfa6   : > { %8404 = vmatprep.subr.bf16.mxu1 %v9943_v0 }
 0xfa7   : > { %8377 = vmatpush3.bf16.msra.mxu0 %v11209_v13 }
 0xfa8   : > { %8378 = vmatprep.subr.bf16.mxu0 %v9943_v0 }
 0xfa9   : > { %8405 = vmatpush3.bf16.msra.mxu1 %v11333_v33 }
 0xfaa   : > { %8430 = vmatprep.subr.bf16.mxu1 %v9943_v0 }
 0xfab   : > { %8379 = vmatpush3.bf16.msra.mxu0 %v11213_v18 }
 0xfac   : > { %8380 = vmatprep.subr.bf16.mxu0 %v9943_v0 }
 0xfaf   : > { %8381 = vmatpush3.bf16.msra.mxu0 %v11217_v20  ;;  %v11391_v20 = vld [vmem:[%s11700_s1 + $0x88] sm:$0xff]  }
 0xfb0   : > { %8382 = vmatprep.subr.bf16.mxu0 %v9943_v0 }
 0xfb3   : > { %8383 = vmatpush3.bf16.msra.mxu0 %v11221_v21 }
 0xfb4   : > { %8384 = vmatprep.subr.bf16.mxu0 %v9943_v0 }
 0xfb7   : > { %8385 = vmatpush3.bf16.msra.mxu0 %v11225_v23 }
 0xfb8   : > { %8410 = vmatprep.subr.bf16.mxu0 %v9943_v0 }
 0xfba   : > { %8387 = vmatmul.mubr.bf16.vlgmr.msra.gmra.mrb[84].mxu0 %v5262_v3 }
 0xfbb   : > { %8426 = vmatprep.mubr.msk.bf16.mxu0 %vm9944_vm1, %v9943_v0  ;;  %8411 = vmatpush3.bf16.msra.mxu0 %v11338_v34 }
 0xfbc   : > { %8412 = vmatprep.subr.bf16.mxu0 %v9943_v0 }
 0xfbf   : > { %8413 = vmatpush3.bf16.msra.mxu0 %v11342_v35 }
 0xfc0   : > { %8414 = vmatprep.subr.bf16.mxu0 %v9943_v0 }
 0xfc3   : > { %8415 = vmatpush3.bf16.msra.mxu0 %v11348_v37 }
 0xfc4   : > { %8416 = vmatprep.subr.bf16.mxu0 %v9943_v0 }
 0xfc7   : > { %8417 = vmatpush3.bf16.msra.mxu0 %v11353_v38 }
 0xfc8   : > { %8418 = vmatprep.subr.bf16.mxu0 %v9943_v0 }
 0xfcb   : > { %8419 = vmatpush3.bf16.msra.mxu0 %v11358_v39 }
 0xfcc   : > { %8420 = vmatprep.subr.bf16.mxu0 %v9943_v0 }
 0xfcf   : > { %8421 = vmatpush3.bf16.msra.mxu0 %v11363_v41 }
 0xfd0   : > { %8422 = vmatprep.subr.bf16.mxu0 %v9943_v0 }
 0xfd3   : > { %8423 = vmatpush3.bf16.msra.mxu0 %v11368_v45 }
 0xfd4   : > { %8424 = vmatprep.subr.bf16.mxu0 %v9943_v0 }
 0xfd7   : > { %8425 = vmatpush3.bf16.msra.mxu0 %v11373_v47 }
 0xfd8   : > { %8450 = vmatprep.subr.bf16.mxu0 %v9943_v0 }
0x101c   : > { %v4975_v42 = vpop.f32.mrb[64].mxu1 }
0x101d   : > { %v8288_v43 = vpop.f32.mrb[65].mxu1 }
0x101e   : > { %v4978_v44 = vpop.f32.mrb[66].mxu1 }
0x101f   : > { %v8289_v46 = vpop.f32.mrb[67].mxu1 }
0x103e   : > { %v5168_v48 = vpop.f32.mrb[68].mxu1 }
0x103f   : > { %v8328_v50 = vpop.f32.mrb[69].mxu1 }
0x1040   : > { %v5171_v51 = vpop.f32.mrb[70].mxu1 }
0x1041   : > { %v8329_v52 = vpop.f32.mrb[71].mxu1 }
0x104d   : > { %v5063_v53 = vpop.f32.mrb[76].mxu0 }
0x104e   : > { %v5064_v54 = vadd.f32 %v5063_v53, %v4975_v42  ;;  %v8308_v60 = vpop.f32.mrb[77].mxu0  ;;  %v11428_v42 = vld [vmem:[%s11700_s1 + $0xb8] sm:$0xff]  }
0x104f   : > { %v5066_v6 = vpop.f32.mrb[78].mxu0 }
0x1050   : > { %v5174_v12 = vadd.f32 %v5168_v48, %v5064_v54  ;;  %v8309_v36 = vpop.f32.mrb[79].mxu0 }
0x1052   : > { %v5312_v13 = vadd.f32 %v7101_v61, %v5174_v12 }
0x1054   : > { %v5314_v14 = vmax.f32 %v5312_v13, 0.0  ;;  %v5352_v13 = vld [vmem:[#allocation8] sm:$0xf] }
0x1056   : > { %v11378_v15 = vadd.f32 %v5314_v14, %v11183_v1  ;;  %v5355_v14 = vld [vmem:[#allocation8 + $0x4] sm:$0x1] }
0x1058   : > { %v11385_v18 = vpack.c.bf16 %v11378_v15, %v11378_v15 }
0x105a   : > { %v5324_v19 = vshrl.u32 %v11385_v18, 16  ;;  %8407 = vmatmul.mubr.bf16.vlgmr.msra.gmra.mrb[76].mxu1 %v11385_v18  ;;  %v5327_v21 = vshll.u32 %v11385_v18, 16 }
0x105b   : > { %8431 = vmatpush3.bf16.msra.mxu1 %v11381_v17  ;;  %8446 = vmatprep.mubr.msk.bf16.mxu1 %vm9944_vm1, %v9943_v0 }
0x105c   : > { %v5326_v1 = vrot.slane %v5324_v19, 7  ;;  %8432 = vmatprep.subr.bf16.mxu1 %v9943_v0 }
0x105e   : > { %v5329_v22 = vor.u32 %v5327_v21, %v5326_v1  ;;  %v5330_v23 = vrot.slane %v5326_v1, 4  ;;  %v5249_v24 = vpop.f32.mrb[72].mxu1 }
0x105f   : > { %v8368_v27 = vpop.f32.mrb[73].mxu1  ;;  %8433 = vmatpush3.bf16.msra.mxu1 %v11391_v20 }
0x1060   : > { %v5334_v29 = vsel %vm10742_vm13, %v5329_v22, %v5333_v25  ;;  %v5337_v55 = vsel %vm10665_vm12, %v5330_v23, %v5336_v26  ;;  %v5252_v56 = vpop.f32.mrb[74].mxu1  ;;  %8434 = vmatprep.subr.bf16.mxu1 %v9943_v0 }
0x1061   : > { %5335 = vst [vmem:[#allocation7] sm:$0xf] %v5334_v29  ;;  %5338 = vst [vmem:[#allocation7 + $0x4] sm:$0x1] %v5337_v55  ;;  %v8369_v59 = vpop.f32.mrb[75].mxu1 }
0x1063   : > { %8435 = vmatpush3.bf16.msra.mxu1 %v11399_v16 }
0x1064   : > { %8436 = vmatprep.subr.bf16.mxu1 %v9943_v0 }
0x1067   : > { %8437 = vmatpush3.bf16.msra.mxu1 %v11408_v62 }
0x1068   : > { %8438 = vmatprep.subr.bf16.mxu1 %v9943_v0  ;;  %v9139_v57 = vld [vmem:[#allocation7] sm:$0x1e]  }
0x1069   : > { %v5761_v49 = vrot.slane %v9139_v57, 1 }
0x106b   : > { %8439 = vmatpush3.bf16.msra.mxu1 %v11413_v2 }
0x106c   : > { %8440 = vmatprep.subr.bf16.mxu1 %v9943_v0 }
0x106d   : > { %v5209_v31 = vpop.f32.mrb[80].mxu0 }
0x106e   : > { %v5250_v32 = vadd.f32 %v5249_v24, %v5209_v31  ;;  %v8348_v40 = vpop.f32.mrb[81].mxu0 }
0x106f   : > { %v5212_v11 = vpop.f32.mrb[82].mxu0  ;;  %8441 = vmatpush3.bf16.msra.mxu1 %v11418_v4  ;;  %v7161_v40 = vld [vmem:[%s11702_s7] ss:$0 sm:$0xff] }
0x1070   : > { %v8349_v3 = vpop.f32.mrb[83].mxu0  ;;  %8442 = vmatprep.subr.bf16.mxu1 %v9943_v0 }
0x1073   : > { %8443 = vmatpush3.bf16.msra.mxu1 %v11423_v63 }
0x1074   : > { %8444 = vmatprep.subr.bf16.mxu1 %v9943_v0 }
0x1077   : > { %8445 = vmatpush3.bf16.msra.mxu1 %v11428_v42 }
0x1078   : > { %8470 = vmatprep.subr.bf16.mxu1 %v9943_v0 }
0x108d   : > { %v5298_v43 = vpop.f32.mrb[84].mxu0 }
0x108e   : > { %v5304_v44 = vadd.f32 %v5298_v43, %v5250_v32  ;;  %v8388_v46 = vpop.f32.mrb[85].mxu0 }
0x108f   : > { %v5301_v48 = vpop.f32.mrb[86].mxu0 }
0x1090   : > { %v5313_v50 = vadd.f32 %v7101_v61, %v5304_v44  ;;  %v8389_v51 = vpop.f32.mrb[87].mxu0 }
0x1092   : > { %v5316_v52 = vmax.f32 %v5313_v50, 0.0 }
0x1094   : > { %v11434_v53 = vadd.f32 %v5316_v52, %v11229_v28 }
0x1096   : > { %v5319_v54 = vpack.c.bf16 %v11434_v53, %v11434_v53 }
0x1098   : > { %v5343_v60 = vshrl.u32 %v5319_v54, 16  ;;  %8447 = vmatmul.mubr.bf16.vlgmr.msra.gmra.mrb[80].mxu1 %v5319_v54  ;;  %v5346_v12 = vshll.u32 %v5319_v54, 16 }
0x1099   : > { %8471 = vmatpush3.bf16.msra.mxu1 %v11338_v34  ;;  %8486 = vmatprep.mubr.msk.bf16.mxu1 %vm9944_vm1, %v9943_v0 }
0x109a   : > { %v5345_v6 = vrot.slane %v5343_v60, 7  ;;  %8472 = vmatprep.subr.bf16.mxu1 %v9943_v0  ;;  %v9153_v60 = vld [vmem:[%s11701_s5 + $0x68] sm:$0xff]  }
0x109c   : > { %v5348_v61 = vor.u32 %v5346_v12, %v5345_v6  ;;  %v5349_v36 = vrot.slane %v5345_v6, 4  ;;  %v9154_v6 = vld [vmem:[%s11701_s5 + $0x70] sm:$0xff]   ;;  %v9157_v12 = vld [vmem:[%s11701_s5 + $0x88] sm:$0xff]  }
0x109d   : > { %8473 = vmatpush3.bf16.msra.mxu1 %v11342_v35 }
0x109e   : > { %v5353_v28 = vsel %vm10742_vm13, %v5348_v61, %v5352_v13  ;;  %v5356_v19 = vsel %vm10665_vm12, %v5349_v36, %v5355_v14  ;;  %8474 = vmatprep.subr.bf16.mxu1 %v9943_v0  ;;  %v9158_v61 = vld [vmem:[%s11701_s5 + $0x90] sm:$0xff]   ;;  %v9159_v36 = vld [vmem:[%s11701_s5 + $0x98] sm:$0xff]   ;;  %v9160_v13 = vld [vmem:[%s11701_s5 + $0xa0] sm:$0xff]  }
0x109f   : > { %5354 = vst [vmem:[#allocation8] sm:$0xf] %v5353_v28  ;;  %5357 = vst [vmem:[#allocation8 + $0x4] sm:$0x1] %v5356_v19  ;;  %v7162_v14 = vld [vmem:[#allocation41] ss:$0 sm:$0xff] }
0x10a1   : > { %8475 = vmatpush3.bf16.msra.mxu1 %v11348_v37  ;;  %v9145_v37 = vld [vmem:[%s11701_s5 + $0x28] sm:$0xff]  }
0x10a2   : > { %8476 = vmatprep.subr.bf16.mxu1 %v9943_v0 }
0x10a5   : > { %8477 = vmatpush3.bf16.msra.mxu1 %v11353_v38  ;;  %v9146_v38 = vld [vmem:[%s11701_s5 + $0x30] sm:$0xff]  }
0x10a6   : > { %v5358_v34 = vld [vmem:[#allocation8] sm:$0xf]  ;;  %8478 = vmatprep.subr.bf16.mxu1 %v9943_v0 }
0x10a7   : > { %8427 = vmatmul.mubr.bf16.vlgmr.msra.gmra.mrb[88].mxu0 %v5358_v34 }
0x10a8   : > { %8451 = vmatpush3.bf16.msra.mxu0 %v11283_v58  ;;  %8466 = vmatprep.mubr.msk.bf16.mxu0 %vm9944_vm1, %v9943_v0  ;;  %v9140_v58 = vld [vmem:[%s11701_s5] sm:$0xff]  }
0x10a9   : > { %8479 = vmatpush3.bf16.msra.mxu1 %v11358_v39  ;;  %8452 = vmatprep.subr.bf16.mxu0 %v9943_v0  ;;  %v9147_v39 = vld [vmem:[%s11701_s5 + $0x38] sm:$0xff]  }
0x10aa   : > { %8480 = vmatprep.subr.bf16.mxu1 %v9943_v0 }
0x10ac   : > { %8453 = vmatpush3.bf16.msra.mxu0 %v11303_v5  ;;  %v9141_v5 = vld [vmem:[%s11701_s5 + $0x8] sm:$0xff]  }
0x10ad   : > { %8481 = vmatpush3.bf16.msra.mxu1 %v11363_v41  ;;  %8454 = vmatprep.subr.bf16.mxu0 %v9943_v0  ;;  %v9148_v41 = vld [vmem:[%s11701_s5 + $0x40] sm:$0xff]  }
0x10ae   : > { %8482 = vmatprep.subr.bf16.mxu1 %v9943_v0 }
0x10b0   : > { %8455 = vmatpush3.bf16.msra.mxu0 %v11308_v8  ;;  %v9142_v8 = vld [vmem:[%s11701_s5 + $0x10] sm:$0xff]  }
0x10b1   : > { %8483 = vmatpush3.bf16.msra.mxu1 %v11368_v45  ;;  %8456 = vmatprep.subr.bf16.mxu0 %v9943_v0  ;;  %v9149_v45 = vld [vmem:[%s11701_s5 + $0x48] sm:$0xff]  }
0x10b2   : > { %8484 = vmatprep.subr.bf16.mxu1 %v9943_v0 }
0x10b4   : > { %8457 = vmatpush3.bf16.msra.mxu0 %v11312_v9  ;;  %v9143_v9 = vld [vmem:[%s11701_s5 + $0x18] sm:$0xff]  }
0x10b5   : > { %8485 = vmatpush3.bf16.msra.mxu1 %v11373_v47  ;;  %8458 = vmatprep.subr.bf16.mxu0 %v9943_v0  ;;  %v9150_v47 = vld [vmem:[%s11701_s5 + $0x50] sm:$0xff]  }
0x10b6   : > { %8510 = vmatprep.subr.bf16.mxu1 %v9943_v0 }
0x10b8   : > { %8459 = vmatpush3.bf16.msra.mxu0 %v11317_v10  ;;  %8487 = vmatmul.mubr.bf16.vlgmr.msra.gmra.mrb[84].mxu1 %v11385_v18  ;;  %v9144_v10 = vld [vmem:[%s11701_s5 + $0x20] sm:$0xff]  }
0x10b9   : > { %8460 = vmatprep.subr.bf16.mxu0 %v9943_v0  ;;  %8526 = vmatprep.mubr.msk.bf16.mxu1 %vm9944_vm1, %v9943_v0  ;;  %v9152_v18 = vld [vmem:[%s11701_s5 + $0x60] sm:$0xff]  }
0x10ba   : > { %8511 = vmatpush3.bf16.msra.mxu1 %v9140_v58 }
0x10bb   : > { %8512 = vmatprep.subr.bf16.mxu1 %v9943_v0 }
0x10bc   : > { %8461 = vmatpush3.bf16.msra.mxu0 %v11323_v7 }
0x10bd   : > { %8462 = vmatprep.subr.bf16.mxu0 %v9943_v0 }
0x10be   : > { %8513 = vmatpush3.bf16.msra.mxu1 %v9141_v5 }
0x10bf   : > { %8514 = vmatprep.subr.bf16.mxu1 %v9943_v0 }
0x10c0   : > { %8463 = vmatpush3.bf16.msra.mxu0 %v11328_v30 }
0x10c1   : > { %8464 = vmatprep.subr.bf16.mxu0 %v9943_v0 }
0x10c2   : > { %8515 = vmatpush3.bf16.msra.mxu1 %v9142_v8 }
0x10c3   : > { %8516 = vmatprep.subr.bf16.mxu1 %v9943_v0 }
0x10c4   : > { %8465 = vmatpush3.bf16.msra.mxu0 %v11333_v33 }
0x10c5   : > { %8490 = vmatprep.subr.bf16.mxu0 %v9943_v0 }
0x10c6   : > { %8517 = vmatpush3.bf16.msra.mxu1 %v9143_v9 }
0x10c7   : > { %8467 = vmatmul.mubr.bf16.vlgmr.msra.gmra.mrb[92].mxu0 %v5319_v54  ;;  %8518 = vmatprep.subr.bf16.mxu1 %v9943_v0 }
0x10c8   : > { %8491 = vmatpush3.bf16.msra.mxu0 %v11381_v17  ;;  %8506 = vmatprep.mubr.msk.bf16.mxu0 %vm9944_vm1, %v9943_v0  ;;  %v9151_v17 = vld [vmem:[%s11701_s5 + $0x58] sm:$0xff]  }
0x10c9   : > { %8492 = vmatprep.subr.bf16.mxu0 %v9943_v0 }
0x10ca   : > { %8519 = vmatpush3.bf16.msra.mxu1 %v9144_v10 }
0x10cb   : > { %8520 = vmatprep.subr.bf16.mxu1 %v9943_v0 }
0x10cc   : > { %8493 = vmatpush3.bf16.msra.mxu0 %v11391_v20 }
0x10cd   : > { %8494 = vmatprep.subr.bf16.mxu0 %v9943_v0 }
0x10ce   : > { %8521 = vmatpush3.bf16.msra.mxu1 %v9145_v37  ;;  %v9164_v37 = vld [vmem:[%s11701_s5 + $0xc0] sm:$0xff]  }
0x10cf   : > { %8522 = vmatprep.subr.bf16.mxu1 %v9943_v0 }
0x10d0   : > { %8495 = vmatpush3.bf16.msra.mxu0 %v11399_v16 }
0x10d1   : > { %8496 = vmatprep.subr.bf16.mxu0 %v9943_v0 }
0x10d2   : > { %8523 = vmatpush3.bf16.msra.mxu1 %v9146_v38  ;;  %v9165_v38 = vld [vmem:[%s11701_s5 + $0xc8] sm:$0xff]  }
0x10d3   : > { %8524 = vmatprep.subr.bf16.mxu1 %v9943_v0 }
0x10d4   : > { %8497 = vmatpush3.bf16.msra.mxu0 %v11408_v62 }
0x10d5   : > { %8498 = vmatprep.subr.bf16.mxu0 %v9943_v0 }
0x10d6   : > { %8525 = vmatpush3.bf16.msra.mxu1 %v9147_v39  ;;  %v9166_v39 = vld [vmem:[%s11701_s5 + $0xd0] sm:$0xff]  }
0x10d7   : > { %8550 = vmatprep.subr.bf16.mxu1 %v9943_v0 }
0x10d8   : > { %8499 = vmatpush3.bf16.msra.mxu0 %v11413_v2 }
0x10d9   : > { %8500 = vmatprep.subr.bf16.mxu0 %v9943_v0 }
0x10dc   : > { %8501 = vmatpush3.bf16.msra.mxu0 %v11418_v4 }
0x10dd   : > { %8502 = vmatprep.subr.bf16.mxu0 %v9943_v0 }
0x10e0   : > { %8503 = vmatpush3.bf16.msra.mxu0 %v11423_v63 }
0x10e1   : > { %8504 = vmatprep.subr.bf16.mxu0 %v9943_v0 }
0x10e4   : > { %8505 = vmatpush3.bf16.msra.mxu0 %v11428_v42 }
0x10e5   : > { %8530 = vmatprep.subr.bf16.mxu0 %v9943_v0 }
0x10e7   : > { %8507 = vmatmul.mubr.bf16.vlgmr.msra.gmra.mrb[96].mxu0 %v5761_v49 }
0x10e8   : > { %8546 = vmatprep.mubr.msk.bf16.mxu0 %vm9944_vm1, %v9943_v0  ;;  %8531 = vmatpush3.bf16.msra.mxu0 %v9148_v41  ;;  %v9167_v41 = vld [vmem:[%s11701_s5 + $0xd8] sm:$0xff]  }
0x10e9   : > { %8532 = vmatprep.subr.bf16.mxu0 %v9943_v0 }
0x10ec   : > { %8533 = vmatpush3.bf16.msra.mxu0 %v9149_v45  ;;  %v9168_v45 = vld [vmem:[%s11701_s5 + $0xe0] sm:$0xff]  }
0x10ed   : > { %8534 = vmatprep.subr.bf16.mxu0 %v9943_v0 }
0x10f0   : > { %8535 = vmatpush3.bf16.msra.mxu0 %v9150_v47  ;;  %v7187_v47 = vld [vmem:[#allocation41 + $0x1] ss:$0 sm:$0xff] }
0x10f1   : > { %8536 = vmatprep.subr.bf16.mxu0 %v9943_v0 }
0x10f4   : > { %8537 = vmatpush3.bf16.msra.mxu0 %v9151_v17 }
0x10f5   : > { %8538 = vmatprep.subr.bf16.mxu0 %v9943_v0 }
0x10f8   : > { %8539 = vmatpush3.bf16.msra.mxu0 %v9152_v18 }
0x10f9   : > { %8540 = vmatprep.subr.bf16.mxu0 %v9943_v0 }
0x10fc   : > { %8541 = vmatpush3.bf16.msra.mxu0 %v9153_v60  ;;  %v7237_v60 = vld [vmem:[#allocation41 + $0x3] ss:$0 sm:$0xff] }
0x10fd   : > { %8542 = vmatprep.subr.bf16.mxu0 %v9943_v0 }
0x1100   : > { %8543 = vmatpush3.bf16.msra.mxu0 %v9154_v6 }
0x1101   : > { %8544 = vmatprep.subr.bf16.mxu0 %v9943_v0 }
0x112d   : > { %v5474_v7 = vpop.f32.mrb[76].mxu1 }
0x112e   : > { %v8408_v30 = vpop.f32.mrb[77].mxu1 }
0x112f   : > { %v5477_v33 = vpop.f32.mrb[78].mxu1  ;;  %v9161_v30 = vld [vmem:[%s11701_s5 + $0xa8] sm:$0xff]  }
0x1130   : > { %v8409_v35 = vpop.f32.mrb[79].mxu1  ;;  %v9162_v33 = vld [vmem:[%s11701_s5 + $0xb0] sm:$0xff]  }
0x1131   : > { %v9163_v35 = vld [vmem:[%s11701_s5 + $0xb8] sm:$0xff]  }
0x116b   : > { %v5667_v20 = vpop.f32.mrb[80].mxu1 }
0x116c   : > { %v8448_v1 = vpop.f32.mrb[81].mxu1 }
0x116d   : > { %v5670_v21 = vpop.f32.mrb[82].mxu1 }
0x116e   : > { %v8449_v22 = vpop.f32.mrb[83].mxu1 }
0x117a   : > { %v5562_v23 = vpop.f32.mrb[88].mxu0 }
0x117b   : > { %v5563_v24 = vadd.f32 %v5562_v23, %v5474_v7  ;;  %v8428_v25 = vpop.f32.mrb[89].mxu0 }
0x117c   : > { %v5565_v26 = vpop.f32.mrb[90].mxu0 }
0x117d   : > { %v5673_v27 = vadd.f32 %v5667_v20, %v5563_v24  ;;  %v8429_v16 = vpop.f32.mrb[91].mxu0 }
0x117e   : > { %v9169_v16 = vld [vmem:[%s11701_s5 + $0xe8] sm:$0xff]  }
0x117f   : > { %v5811_v11 = vadd.f32 %v7161_v40, %v5673_v27 }
0x1181   : > { %v5813_v46 = vmax.f32 %v5811_v11, 0.0 }
0x1183   : > { %v5814_v51 = vadd.f32 %v5813_v46, %v11378_v15  ;;  %v9155_v15 = vld [vmem:[%s11701_s5 + $0x78] sm:$0xff]  }
0x1184   : > { %8545 = vmatpush3.bf16.msra.mxu0 %v9155_v15 }
0x1185   : > { %8570 = vmatprep.subr.bf16.mxu0 %v9943_v0 }
0x118b   : > { %v5748_v29 = vpop.f32.mrb[84].mxu1 }
0x118c   : > { %v8488_v55 = vpop.f32.mrb[85].mxu1 }
0x118d   : > { %v5751_v56 = vpop.f32.mrb[86].mxu1  ;;  %v9171_v55 = vld [vmem:[%s11701_s5 + $0xf8] sm:$0xff]  }
0x118e   : > { %v8489_v59 = vpop.f32.mrb[87].mxu1  ;;  %v9172_v56 = vld [vmem:[#allocation43] sm:$0xff]  }
0x118f   : > { %v9173_v59 = vld [vmem:[#allocation43 + $0x8] sm:$0xff]  }
0x119a   : > { %v5708_v62 = vpop.f32.mrb[92].mxu0 }
0x119b   : > { %v5749_v2 = vadd.f32 %v5748_v29, %v5708_v62  ;;  %v8468_v4 = vpop.f32.mrb[93].mxu0  ;;  %v9170_v29 = vld [vmem:[%s11701_s5 + $0xf0] sm:$0xff]   ;;  %v9174_v62 = vld [vmem:[#allocation43 + $0x10] sm:$0xff]  }
0x119c   : > { %v5711_v31 = vpop.f32.mrb[94].mxu0  ;;  %v9176_v4 = vld [vmem:[#allocation43 + $0x20] sm:$0xff]  }
0x119d   : > { %v8469_v32 = vpop.f32.mrb[95].mxu0  ;;  %v7212_v31 = vld [vmem:[#allocation41 + $0x2] ss:$0 sm:$0xff] }
0x11ba   : > { %v5797_v63 = vpop.f32.mrb[96].mxu0 }
0x11bb   : > { %v5803_v3 = vadd.f32 %v5797_v63, %v5749_v2  ;;  %v8508_v42 = vpop.f32.mrb[97].mxu0  ;;  %v9175_v2 = vld [vmem:[#allocation43 + $0x18] sm:$0xff]  }
0x11bc   : > { %v5800_v43 = vpop.f32.mrb[98].mxu0 }
0x11bd   : > { %v5812_v44 = vadd.f32 %v7161_v40, %v5803_v3  ;;  %v8509_v48 = vpop.f32.mrb[99].mxu0 }
0x11bf   : > { %v5815_v50 = vmax.f32 %v5812_v44, 0.0 }
0x11c1   : > { %v5816_v52 = vadd.f32 %v5815_v50, %v11434_v53  ;;  %v9156_v53 = vld [vmem:[%s11701_s5 + $0x80] sm:$0xff]  }
0x11c3   : > { %v5817_v54 = vpack.c.bf16 %v5816_v52, %v5814_v51 }
0x11c5   : > { %8527 = vmatmul.mubr.bf16.vlgmr.msra.gmra.mrb[88].mxu1 %v5817_v54  ;;  %v9179_v54 = vld [vmem:[#allocation43 + $0x38] sm:$0xff]  }
0x11c6   : > { %8566 = vmatprep.mubr.msk.bf16.mxu1 %vm9944_vm1, %v9943_v0  ;;  %8551 = vmatpush3.bf16.msra.mxu1 %v9156_v53 }
0x11c7   : > { %8552 = vmatprep.subr.bf16.mxu1 %v9943_v0 }
0x11ca   : > { %8553 = vmatpush3.bf16.msra.mxu1 %v9157_v12 }
0x11cb   : > { %8554 = vmatprep.subr.bf16.mxu1 %v9943_v0 }
0x11ce   : > { %8555 = vmatpush3.bf16.msra.mxu1 %v9158_v61 }
0x11cf   : > { %8556 = vmatprep.subr.bf16.mxu1 %v9943_v0 }
0x11d2   : > { %8557 = vmatpush3.bf16.msra.mxu1 %v9159_v36 }
0x11d3   : > { %8558 = vmatprep.subr.bf16.mxu1 %v9943_v0 }
0x11d6   : > { %8559 = vmatpush3.bf16.msra.mxu1 %v9160_v13 }
0x11d7   : > { %8560 = vmatprep.subr.bf16.mxu1 %v9943_v0 }
0x11da   : > { %8561 = vmatpush3.bf16.msra.mxu1 %v9161_v30 }
0x11db   : > { %8562 = vmatprep.subr.bf16.mxu1 %v9943_v0 }
0x11de   : > { %8563 = vmatpush3.bf16.msra.mxu1 %v9162_v33 }
0x11df   : > { %8564 = vmatprep.subr.bf16.mxu1 %v9943_v0 }
0x11e2   : > { %8565 = vmatpush3.bf16.msra.mxu1 %v9163_v35 }
0x11e3   : > { %8590 = vmatprep.subr.bf16.mxu1 %v9943_v0 }
0x1298   : > { %v5923_v28 = vpop.f32.mrb[88].mxu1 }
0x1299   : > { %v5924_v19 = vadd.f32 %v7162_v14, %v5923_v28  ;;  %v8528_v34 = vpop.f32.mrb[89].mxu1 }
0x129a   : > { %v5926_v57 = vpop.f32.mrb[90].mxu1 }
0x129b   : > { %v5930_v49 = vmax.f32 %v5924_v19, 0.0  ;;  %v5927_v58 = vadd.f32 %v7162_v14, %v5926_v57  ;;  %v8529_v5 = vpop.f32.mrb[91].mxu1  ;;  %v6404_v57 = vlaneseq }
0x129d   : > { %v5931_v8 = vmax.f32 %v5927_v58, 0.0  ;;  %v5932_v9 = vadd.f32 %v5930_v49, %v5814_v51  ;;  %v9177_v51 = vld [vmem:[#allocation43 + $0x28] sm:$0xff]   ;;  %v6405_v49 = vand.u32 127, %v6404_v57 }
0x129f   : > { %v5933_v10 = vadd.f32 %v5931_v8, %v5816_v52  ;;  %v9178_v52 = vld [vmem:[#allocation43 + $0x30] sm:$0xff]  }
0x12a1   : > { %v5934_v7 = vpack.c.bf16 %v5933_v10, %v5932_v9 }
0x12a3   : > { %8547 = vmatmul.mubr.bf16.vlgmr.msra.gmra.mrb[100].mxu0 %v5934_v7 }
0x12a4   : > { %8586 = vmatprep.mubr.msk.bf16.mxu0 %vm9944_vm1, %v9943_v0  ;;  %8571 = vmatpush3.bf16.msra.mxu0 %v9164_v37 }
0x12a5   : > { %8572 = vmatprep.subr.bf16.mxu0 %v9943_v0 }
0x12a8   : > { %8573 = vmatpush3.bf16.msra.mxu0 %v9165_v38 }
0x12a9   : > { %8574 = vmatprep.subr.bf16.mxu0 %v9943_v0 }
0x12ac   : > { %8575 = vmatpush3.bf16.msra.mxu0 %v9166_v39 }
0x12ad   : > { %8576 = vmatprep.subr.bf16.mxu0 %v9943_v0 }
0x12b0   : > { %8577 = vmatpush3.bf16.msra.mxu0 %v9167_v41 }
0x12b1   : > { %8578 = vmatprep.subr.bf16.mxu0 %v9943_v0 }
0x12b4   : > { %8579 = vmatpush3.bf16.msra.mxu0 %v9168_v45 }
0x12b5   : > { %8580 = vmatprep.subr.bf16.mxu0 %v9943_v0 }
0x12b8   : > { %8581 = vmatpush3.bf16.msra.mxu0 %v9169_v16 }
0x12b9   : > { %8582 = vmatprep.subr.bf16.mxu0 %v9943_v0 }
0x12bc   : > { %8583 = vmatpush3.bf16.msra.mxu0 %v9170_v29 }
0x12bd   : > { %8584 = vmatprep.subr.bf16.mxu0 %v9943_v0 }
0x12c0   : > { %8585 = vmatpush3.bf16.msra.mxu0 %v9171_v55 }
0x1376   : > { %v6042_v17 = vpop.f32.mrb[100].mxu0 }
0x1377   : > { %v6043_v18 = vadd.f32 %v7187_v47, %v6042_v17  ;;  %v8548_v20 = vpop.f32.mrb[101].mxu0 }
0x1378   : > { %v6045_v1 = vpop.f32.mrb[102].mxu0 }
0x1379   : > { %v6049_v21 = vmax.f32 %v6043_v18, 0.0  ;;  %v6046_v22 = vadd.f32 %v7187_v47, %v6045_v1  ;;  %v8549_v23 = vpop.f32.mrb[103].mxu0 }
0x137b   : > { %v6050_v24 = vmax.f32 %v6046_v22, 0.0  ;;  %v6051_v25 = vadd.f32 %v6049_v21, %v5932_v9 }
0x137d   : > { %v6052_v26 = vadd.f32 %v6050_v24, %v5933_v10 }
0x137f   : > { %v6053_v27 = vpack.c.bf16 %v6052_v26, %v6051_v25 }
0x1381   : > { %8567 = vmatmul.mubr.bf16.vlgmr.msra.gmra.mrb[92].mxu1 %v6053_v27 }
0x1382   : > { %8606 = vmatprep.mubr.msk.bf16.mxu1 %vm9944_vm1, %v9943_v0  ;;  %8591 = vmatpush3.bf16.msra.mxu1 %v9172_v56  ;;  %vm6406_vm1 = vcmp.lt.s32.totalorder %v6405_v49, 24 }
0x1383   : > { %8592 = vmatprep.subr.bf16.mxu1 %v9943_v0 }
0x1386   : > { %8593 = vmatpush3.bf16.msra.mxu1 %v9173_v59 }
0x1387   : > { %8594 = vmatprep.subr.bf16.mxu1 %v9943_v0 }
0x138a   : > { %8595 = vmatpush3.bf16.msra.mxu1 %v9174_v62 }
0x138b   : > { %8596 = vmatprep.subr.bf16.mxu1 %v9943_v0 }
0x138e   : > { %8597 = vmatpush3.bf16.msra.mxu1 %v9175_v2 }
0x138f   : > { %8598 = vmatprep.subr.bf16.mxu1 %v9943_v0 }
0x1392   : > { %8599 = vmatpush3.bf16.msra.mxu1 %v9176_v4 }
0x1393   : > { %8600 = vmatprep.subr.bf16.mxu1 %v9943_v0 }
0x1396   : > { %8601 = vmatpush3.bf16.msra.mxu1 %v9177_v51 }
0x1397   : > { %8602 = vmatprep.subr.bf16.mxu1 %v9943_v0 }
0x139a   : > { %8603 = vmatpush3.bf16.msra.mxu1 %v9178_v52 }
0x139b   : > { %8604 = vmatprep.subr.bf16.mxu1 %v9943_v0  ;;  %v7246_v0 = vld [vmem:[%s10106_s13] ss:$0 sm:$0xff] }
0x139e   : > { %8605 = vmatpush3.bf16.msra.mxu1 %v9179_v54 }
0x1454   : > { %v6161_v32 = vpop.f32.mrb[92].mxu1 }
0x1455   : > { %v6162_v40 = vadd.f32 %v7212_v31, %v6161_v32  ;;  %v8568_v11 = vpop.f32.mrb[93].mxu1 }
0x1456   : > { %v6164_v63 = vpop.f32.mrb[94].mxu1 }
0x1457   : > { %v6168_v3 = vmax.f32 %v6162_v40, 0.0  ;;  %v6165_v42 = vadd.f32 %v7212_v31, %v6164_v63  ;;  %v8569_v43 = vpop.f32.mrb[95].mxu1 }
0x1459   : > { %v6169_v44 = vmax.f32 %v6165_v42, 0.0  ;;  %v6170_v46 = vadd.f32 %v6168_v3, %v6051_v25 }
0x145b   : > { %v6171_v48 = vadd.f32 %v6169_v44, %v6052_v26 }
0x145d   : > { %v6172_v50 = vpack.c.bf16 %v6171_v48, %v6170_v46 }
0x145f   : > { %8587 = vmatmul.mubr.bf16.vlgmr.msra.gmra.mrb[104].mxu0 %v6172_v50 }
0x1532   : > { %v6280_v6 = vpop.f32.mrb[104].mxu0 }
0x1533   : > { %v6281_v15 = vadd.f32 %v7237_v60, %v6280_v6  ;;  %v8588_v53 = vpop.f32.mrb[105].mxu0 }
0x1534   : > { %v6283_v12 = vpop.f32.mrb[106].mxu0 }
0x1535   : > { %v6287_v61 = vmax.f32 %v6281_v15, 0.0  ;;  %v6284_v36 = vadd.f32 %v7237_v60, %v6283_v12  ;;  %v8589_v13 = vpop.f32.mrb[107].mxu0 }
0x1537   : > { %v6288_v14 = vmax.f32 %v6284_v36, 0.0  ;;  %v6289_v28 = vadd.f32 %v6287_v61, %v6170_v46 }
0x1539   : > { %v6290_v19 = vadd.f32 %v6288_v14, %v6171_v48 }
0x153b   : > { %v6291_v34 = vpack.c.bf16 %v6290_v19, %v6289_v28 }
0x153d   : > { %8607 = vmatmul.mubr.bf16.vlgmr.msra.gmra.mrb[96].mxu1 %v6291_v34 }
0x1610   : > { %v6397_v58 = vpop.f32.mrb[96].mxu1 }
0x1611   : > { %v6398_v5 = vadd.f32 %v7246_v0, %v6397_v58  ;;  %v8608_v8 = vpop.f32.mrb[97].mxu1 }
0x1612   : > { %v6400_v9 = vpop.f32.mrb[98].mxu1 }
0x1613   : > { %v7255_v10 = vclamps-f32 %v6398_v5, 5.0  ;;  %v6401_v7 = vadd.f32 %v7246_v0, %v6400_v9  ;;  %v8609_v30 = vpop.f32.mrb[99].mxu1 }
0x1615   : > { %v7256_v33 = vclamps-f32 %v6401_v7, 5.0  ;;  %v6411_v35 = vsel %vm6406_vm1, %v6398_v5, %v7255_v10 }
0x1617   : > { %v6412_v37 = vsel %vm6406_vm1, %v6401_v7, %v7256_v33 }
0x1618   : > { %6414 = vrot.lane.b32.xlu1 %v6412_v37, %s9947_s18 }
0x168a   : > { %v6415_v38 = vpop.permute.xlu1 %6414 }
0x168b   : > { %v6417_v39 = vsel %vm3913_vm3, %v6411_v35, %v6415_v38 }
0x168c   : > { %6419 = vst.msk [vmem:[%s1340_s16] sm:$0xff] %vm6418_vm7, %v6417_v39 }
0x168d PF: > { %s88_s28 = sadd.s32 1, %s9882_s28  }
0x168e   : > { %p85_p9 = scmp.ge.s32.totalorder %s88_s28, 4  }
0x1690   :  { %87 = sbr.rel (!%p85_p9) target bundleno = 67 (0x43), region = 349 }
0x1697   :  { %6453 = vsyncpa [#allocation10], 1 }
0x1698   :  { %6455 = vsyncpa [#allocation10 + $0x1], 1 }
0x1699   :  { %6456 = vsyncpa [#allocation12], 1 }
0x169a   :  { %6457 = vsyncpa [#allocation15], 1 }
0x169b   :  { %6458 = vsyncpa [#allocation18], 1 }
0x169c   :  { %6459 = vsyncpa [#allocation21], 1 }
0x169d   :  { %6460 = vsyncpa [#allocation24], 1 }
0x169e   :  { %6461 = vsyncpa [#allocation27], 1 }
0x169f   :  { %6462 = vsyncpa [#allocation30], 1 }
0x16a0   :  { %6463 = vsyncpa [#allocation33], 1 }
0x16a1   :  { %6464 = vsyncpa [#allocation36], 1 }
0x16a2   :  { %6465 = vsyncpa [#allocation39], 1 }
0x16a3   :  { %6466 = vsyncpa [#allocation42], 1 }

</bundles_post_ra>
